<compile_context>
chip_gen: v7x
topology: tpu7x:2x2x1
jax: 0.10.0
libtpu: 0.0.40
codegen_flags: <defaults>
</compile_context>

<pallas_src>
import functools

import jax
import jax.numpy as jnp
from jax import lax
from jax.experimental import pallas as pl
from jax.experimental.pallas import tpu as pltpu

_LOG2_E = 1.4426950408889634


def _round_up(x, m):
    return ((x + m - 1) // m) * m


def _sublane_multiple(dtype):
    # 8 sublanes of 32-bit words per vreg: 8 for f32, 16 for bf16, 32 for int8/fp8.
    return max(8, 32 // jnp.dtype(dtype).itemsize)


def _attend_fwd_kernel(q_ref, k_ref, v_ref, o_ref, m_scr, l_scr, acc_scr,
                       *, scale_log2e, kv_len, block_k, kv_padded):
    """One (batch*head, q-tile) output block; kv tiles stream along grid axis 2."""
    kv_idx = pl.program_id(2)
    n_kv = pl.num_programs(2)

    @pl.when(kv_idx == 0)
    def _init():
        m_scr[...] = jnp.full_like(m_scr, -jnp.inf)
        l_scr[...] = jnp.zeros_like(l_scr)
        acc_scr[...] = jnp.zeros_like(acc_scr)

    # Fold softmax scale * log2(e) into q (tq, D) instead of scaling the much
    # larger (tq, tk) score tile every kv step. Keep q in its native dtype so
    # bf16 inputs stay on the native MXU path.
    q = q_ref[0] * jnp.asarray(scale_log2e, q_ref.dtype)   # (tq, D)
    k = k_ref[0]                                           # (tk, D)
    v = v_ref[0]                                           # (tk, D)

    # scores (in log2 domain): (tq, tk) on the MXU, f32 accumulation.
    s = lax.dot_general(q, k, (((1,), (1,)), ((), ())),
                        preferred_element_type=jnp.float32)

    if kv_padded:  # static: only emitted when the key length was padded
        def _mask_tail(x):
            col = lax.broadcasted_iota(jnp.int32, x.shape, 1) + kv_idx * block_k
            return jnp.where(col < kv_len, x, -1e30)
        # Only the last kv tile can be ragged; skip the mask VALU work elsewhere.
        s = lax.cond(kv_idx == n_kv - 1, _mask_tail, lambda x: x, s)

    # online softmax update (base-2 exponentials; scale already folded in)
    m_prev = m_scr[...]                                          # (tq, 1)
    m_new = jnp.maximum(m_prev, jnp.max(s, axis=-1, keepdims=True))
    alpha = jnp.exp2(m_prev - m_new)
    p = jnp.exp2(s - m_new)                                      # (tq, tk)

    l_scr[...] = alpha * l_scr[...] + jnp.sum(p, axis=-1, keepdims=True)
    acc_scr[...] = alpha * acc_scr[...] + jnp.dot(
        p.astype(v.dtype), v, preferred_element_type=jnp.float32)
    m_scr[...] = m_new

    @pl.when(kv_idx == n_kv - 1)
    def _finalize():
        # Exact divide: runs once per q tile, so it costs nothing measurable and
        # keeps full accuracy.
        o_ref[0] = (acc_scr[...] / l_scr[...]).astype(o_ref.dtype)


def attend(q, k, v, *, block_q=256, block_k=512):
    """q: (B, H, Lq, D), k/v: (B, H, Lk, D). Returns (B, H, Lq, D)."""
    B, H, Lq, D = q.shape
    Lk = k.shape[2]
    scale_log2e = (float(D) ** -0.5) * _LOG2_E

    sub = _sublane_multiple(q.dtype)
    block_q = min(block_q, _round_up(Lq, sub))
    block_k = min(block_k, _round_up(Lk, sub))
    Lq_p = _round_up(Lq, block_q)
    Lk_p = _round_up(Lk, block_k)

    def prep(t, L, Lp):
        t = t.reshape(B * H, L, D)            # free reshape, no HBM copy
        if Lp != L:                           # pad only if actually needed
            t = jnp.pad(t, ((0, 0), (0, Lp - L), (0, 0)))
        return t

    qf = prep(q, Lq, Lq_p)
    kf = prep(k, Lk, Lk_p)
    vf = prep(v, Lk, Lk_p)

    grid = (B * H, Lq_p // block_q, Lk_p // block_k)

    kernel = functools.partial(
        _attend_fwd_kernel, scale_log2e=scale_log2e, kv_len=Lk,
        block_k=block_k, kv_padded=(Lk_p != Lk))

    out = pl.pallas_call(
        kernel,
        out_shape=jax.ShapeDtypeStruct((B * H, Lq_p, D), q.dtype),
        grid_spec=pltpu.PrefetchScalarGridSpec(
            num_scalar_prefetch=0,
            grid=grid,
            in_specs=[
                pl.BlockSpec((1, block_q, D), lambda b, qi, ki: (b, qi, 0)),  # q
                pl.BlockSpec((1, block_k, D), lambda b, qi, ki: (b, ki, 0)),  # k
                pl.BlockSpec((1, block_k, D), lambda b, qi, ki: (b, ki, 0)),  # v
            ],
            out_specs=pl.BlockSpec((1, block_q, D), lambda b, qi, ki: (b, qi, 0)),
            scratch_shapes=[
                pltpu.VMEM((block_q, 1), jnp.float32),    # running max m
                pltpu.VMEM((block_q, 1), jnp.float32),    # running denom l
                pltpu.VMEM((block_q, D), jnp.float32),    # output accumulator
            ],
        ),
        compiler_params=pltpu.CompilerParams(
            dimension_semantics=("parallel", "parallel", "arbitrary")),
    )(qf, kf, vf)

    if Lq_p != Lq:
        out = out[:, :Lq, :]
    return out.reshape(B, H, Lq, D)


def reference(q, k, v):
    """Pure-JAX mirror of Attend.forward (eval mode, non-flash branch)."""
    scale = q.shape[-1] ** -0.5
    sim = jnp.einsum('bhid,bhjd->bhij', q, k) * scale
    attn = jax.nn.softmax(sim, axis=-1)
    return jnp.einsum('bhij,bhjd->bhid', attn, v)


if __name__ == "__main__":
    B, H, N, D = 2, 2, 256, 64   # small shapes consistent with the module

    key = jax.random.PRNGKey(0)
    kq, kk, kv = jax.random.split(key, 3)
    q = jax.random.normal(kq, (B, H, N, D), dtype=jnp.float32)
    k = jax.random.normal(kk, (B, H, N, D), dtype=jnp.float32)
    v = jax.random.normal(kv, (B, H, N, D), dtype=jnp.float32)

    # f32 path
    out = jax.block_until_ready(attend(q, k, v))
    ref = reference(q, k, v)
    assert out.shape == (B, H, N, D)
    assert jnp.allclose(out, ref, atol=2e-3, rtol=2e-3), \
        float(jnp.max(jnp.abs(out - ref)))

    # bf16 path (recommended deployment dtype: half the HBM bytes, native MXU)
    out_bf = jax.block_until_ready(
        attend(q.astype(jnp.bfloat16), k.astype(jnp.bfloat16),
               v.astype(jnp.bfloat16)))
    assert jnp.allclose(out_bf.astype(jnp.float32), ref, atol=8e-2, rtol=5e-2), \
        float(jnp.max(jnp.abs(out_bf.astype(jnp.float32) - ref)))

    # ragged key length (exercises the last-kv-tile padding mask path)
    B2, H2, Lq2, Lk2 = 1, 2, 64, 100
    k2q, k2k, k2v = jax.random.split(jax.random.PRNGKey(1), 3)
    q2 = jax.random.normal(k2q, (B2, H2, Lq2, D), dtype=jnp.float32)
    k2 = jax.random.normal(k2k, (B2, H2, Lk2, D), dtype=jnp.float32)
    v2 = jax.random.normal(k2v, (B2, H2, Lk2, D), dtype=jnp.float32)
    out2 = jax.block_until_ready(attend(q2, k2, v2))
    ref2 = reference(q2, k2, v2)
    assert jnp.allclose(out2, ref2, atol=2e-3, rtol=2e-3), \
        float(jnp.max(jnp.abs(out2 - ref2)))

    print("KERNEL_OK")
</pallas_src>

<mosaic_0001>
module attributes {stable_mosaic.version = 11 : i64} {
  func.func @_attend_fwd_kernel(%arg0: i32, %arg1: i32, %arg2: i32, %arg3: memref<1x256x64xf32, #tpu.memory_space<vmem>>, %arg4: memref<1x256x64xf32, #tpu.memory_space<vmem>>, %arg5: memref<1x256x64xf32, #tpu.memory_space<vmem>>, %arg6: memref<1x256x64xf32, #tpu.memory_space<vmem>>, %arg7: memref<256x1xf32, #tpu.memory_space<vmem>>, %arg8: memref<256x1xf32, #tpu.memory_space<vmem>>, %arg9: memref<256x64xf32, #tpu.memory_space<vmem>>) attributes {dimension_semantics = [#tpu.dimension_semantics<parallel>, #tpu.dimension_semantics<parallel>, #tpu.dimension_semantics<arbitrary>], iteration_bounds = array<i64: 4, 1, 1>, scalar_prefetch = 0 : i64, scratch_operands = 3 : i64, tpu.core_type = #tpu.core_type<tc>, window_params = [{transform_indices = @transform_0, window_bounds = array<i64: 1, 256, 64>}, {transform_indices = @transform_1, window_bounds = array<i64: 1, 256, 64>}, {transform_indices = @transform_2, window_bounds = array<i64: 1, 256, 64>}, {transform_indices = @transform_3, window_bounds = array<i64: 1, 256, 64>}]} {
    %c0_i32 = arith.constant 0 : i32
    %0 = arith.cmpi eq, %arg2, %c0_i32 : i32
    %1 = arith.extui %0 : i1 to i32
    %c0_i32_0 = arith.constant 0 : i32
    %2 = arith.cmpi ne, %1, %c0_i32_0 : i32
    scf.if %2 {
      %cst_27 = arith.constant 0xFF800000 : f32
      %37 = vector.broadcast %cst_27 : f32 to vector<256x1xf32>
      %c0_28 = arith.constant 0 : index
      %c0_29 = arith.constant 0 : index
      %38 = vector.load %arg7[%c0_28, %c0_29] : memref<256x1xf32, #tpu.memory_space<vmem>>, vector<256x1xf32>
      tpu.vector_store %arg7[%c0_28, %c0_29], %37 {strides = array<i32>} : memref<256x1xf32, #tpu.memory_space<vmem>>, vector<256x1xf32>,
      %cst_30 = arith.constant 0.000000e+00 : f32
      %39 = vector.broadcast %cst_30 : f32 to vector<256x1xf32>
      %c0_31 = arith.constant 0 : index
      %c0_32 = arith.constant 0 : index
      %40 = vector.load %arg8[%c0_31, %c0_32] : memref<256x1xf32, #tpu.memory_space<vmem>>, vector<256x1xf32>
      tpu.vector_store %arg8[%c0_31, %c0_32], %39 {strides = array<i32>} : memref<256x1xf32, #tpu.memory_space<vmem>>, vector<256x1xf32>,
      %cst_33 = arith.constant 0.000000e+00 : f32
      %41 = vector.broadcast %cst_33 : f32 to vector<256x64xf32>
      %c0_34 = arith.constant 0 : index
      %c0_35 = arith.constant 0 : index
      %42 = vector.load %arg9[%c0_34, %c0_35] : memref<256x64xf32, #tpu.memory_space<vmem>>, vector<256x64xf32>
      tpu.vector_store %arg9[%c0_34, %c0_35], %41 {strides = array<i32>} : memref<256x64xf32, #tpu.memory_space<vmem>>, vector<256x64xf32>,
    } else {
    }
    %c0 = arith.constant 0 : index
    %c0_1 = arith.constant 0 : index
    %c0_2 = arith.constant 0 : index
    %3 = vector.load %arg3[%c0, %c0_1, %c0_2] : memref<1x256x64xf32, #tpu.memory_space<vmem>>, vector<1x256x64xf32>
    %4 = vector.shape_cast %3 : vector<1x256x64xf32> to vector<256x64xf32>
    %cst = arith.constant 0.180336878 : f32
    %5 = vector.broadcast %cst : f32 to vector<256x64xf32>
    %6 = arith.mulf %4, %5 : vector<256x64xf32>
    %c0_3 = arith.constant 0 : index
    %c0_4 = arith.constant 0 : index
    %c0_5 = arith.constant 0 : index
    %7 = vector.load %arg4[%c0_3, %c0_4, %c0_5] : memref<1x256x64xf32, #tpu.memory_space<vmem>>, vector<1x256x64xf32>
    %8 = vector.shape_cast %7 : vector<1x256x64xf32> to vector<256x64xf32>
    %c0_6 = arith.constant 0 : index
    %c0_7 = arith.constant 0 : index
    %c0_8 = arith.constant 0 : index
    %9 = vector.load %arg5[%c0_6, %c0_7, %c0_8] : memref<1x256x64xf32, #tpu.memory_space<vmem>>, vector<1x256x64xf32>
    %10 = vector.shape_cast %9 : vector<1x256x64xf32> to vector<256x64xf32>
    %cst_9 = arith.constant dense<0.000000e+00> : vector<256x256xf32>
    %11 = tpu.matmul %6, %8, %cst_9 {dimension_numbers = #tpu.dot_dimension_numbers<[1], [1], [0], [0], [0, 0, 1, 0], [], []>} : vector<256x64xf32>, vector<256x64xf32>, vector<256x256xf32> -> vector<256x256xf32>
    %c0_10 = arith.constant 0 : index
    %c0_11 = arith.constant 0 : index
    %12 = vector.load %arg7[%c0_10, %c0_11] : memref<256x1xf32, #tpu.memory_space<vmem>>, vector<256x1xf32>
    %cst_12 = arith.constant dense<0xFF800000> : vector<256xf32>
    %13 = vector.multi_reduction <maximumf>, %11, %cst_12 [1] : vector<256x256xf32> to vector<256xf32>
    %14 = vector.shape_cast %13 : vector<256xf32> to vector<256x1xf32>
    %15 = arith.maximumf %12, %14 : vector<256x1xf32>
    %16 = arith.subf %12, %15 : vector<256x1xf32>
    %17 = math.exp2 %16 : vector<256x1xf32>
    %18 = vector.broadcast %15 : vector<256x1xf32> to vector<256x256xf32>
    %19 = arith.subf %11, %18 : vector<256x256xf32>
    %20 = math.exp2 %19 : vector<256x256xf32>
    %c0_13 = arith.constant 0 : index
    %c0_14 = arith.constant 0 : index
    %21 = vector.load %arg8[%c0_13, %c0_14] : memref<256x1xf32, #tpu.memory_space<vmem>>, vector<256x1xf32>
    %22 = arith.mulf %17, %21 : vector<256x1xf32>
    %cst_15 = arith.constant dense<0.000000e+00> : vector<256xf32>
    %23 = vector.multi_reduction <add>, %20, %cst_15 [1] : vector<256x256xf32> to vector<256xf32>
    %24 = vector.shape_cast %23 : vector<256xf32> to vector<256x1xf32>
    %25 = arith.addf %22, %24 : vector<256x1xf32>
    %c0_16 = arith.constant 0 : index
    %c0_17 = arith.constant 0 : index
    %26 = vector.load %arg8[%c0_16, %c0_17] : memref<256x1xf32, #tpu.memory_space<vmem>>, vector<256x1xf32>
    tpu.vector_store %arg8[%c0_16, %c0_17], %25 {strides = array<i32>} : memref<256x1xf32, #tpu.memory_space<vmem>>, vector<256x1xf32>,
    %c0_18 = arith.constant 0 : index
    %c0_19 = arith.constant 0 : index
    %27 = vector.load %arg9[%c0_18, %c0_19] : memref<256x64xf32, #tpu.memory_space<vmem>>, vector<256x64xf32>
    %28 = vector.broadcast %17 : vector<256x1xf32> to vector<256x64xf32>
    %29 = arith.mulf %28, %27 : vector<256x64xf32>
    %cst_20 = arith.constant dense<0.000000e+00> : vector<256x64xf32>
    %30 = tpu.matmul %20, %10, %cst_20 {dimension_numbers = #tpu.dot_dimension_numbers<[1], [0], [0], [1], [0, 0, 1, 1], [], []>} : vector<256x256xf32>, vector<256x64xf32>, vector<256x64xf32> -> vector<256x64xf32>
    %31 = arith.addf %29, %30 : vector<256x64xf32>
    %c0_21 = arith.constant 0 : index
    %c0_22 = arith.constant 0 : index
    %32 = vector.load %arg9[%c0_21, %c0_22] : memref<256x64xf32, #tpu.memory_space<vmem>>, vector<256x64xf32>
    tpu.vector_store %arg9[%c0_21, %c0_22], %31 {strides = array<i32>} : memref<256x64xf32, #tpu.memory_space<vmem>>, vector<256x64xf32>,
    %c0_23 = arith.constant 0 : index
    %c0_24 = arith.constant 0 : index
    %33 = vector.load %arg7[%c0_23, %c0_24] : memref<256x1xf32, #tpu.memory_space<vmem>>, vector<256x1xf32>
    tpu.vector_store %arg7[%c0_23, %c0_24], %15 {strides = array<i32>} : memref<256x1xf32, #tpu.memory_space<vmem>>, vector<256x1xf32>,
    %c0_i32_25 = arith.constant 0 : i32
    %34 = arith.cmpi eq, %arg2, %c0_i32_25 : i32
    %35 = arith.extui %34 : i1 to i32
    %c0_i32_26 = arith.constant 0 : i32
    %36 = arith.cmpi ne, %35, %c0_i32_26 : i32
    scf.if %36 {
      %c0_27 = arith.constant 0 : index
      %c0_28 = arith.constant 0 : index
      %37 = vector.load %arg9[%c0_27, %c0_28] : memref<256x64xf32, #tpu.memory_space<vmem>>, vector<256x64xf32>
      %c0_29 = arith.constant 0 : index
      %c0_30 = arith.constant 0 : index
      %38 = vector.load %arg8[%c0_29, %c0_30] : memref<256x1xf32, #tpu.memory_space<vmem>>, vector<256x1xf32>
      %39 = vector.broadcast %38 : vector<256x1xf32> to vector<256x64xf32>
      %40 = arith.divf %37, %39 : vector<256x64xf32>
      %c0_31 = arith.constant 0 : index
      %c0_32 = arith.constant 0 : index
      %c0_33 = arith.constant 0 : index
      %41 = vector.load %arg6[%c0_31, %c0_32, %c0_33] : memref<1x256x64xf32, #tpu.memory_space<vmem>>, vector<1x256x64xf32>
      %42 = vector.shape_cast %41 : vector<1x256x64xf32> to vector<256x64xf32>
      %43 = vector.shape_cast %40 : vector<256x64xf32> to vector<1x256x64xf32>
      tpu.vector_store %arg6[%c0_31, %c0_32, %c0_33], %43 {strides = array<i32>} : memref<1x256x64xf32, #tpu.memory_space<vmem>>, vector<1x256x64xf32>,
    } else {
    }
    return
  }
  func.func @transform_0(%arg0: i32, %arg1: i32, %arg2: i32) -> (i32, i32, i32) {
    %c0_i32 = arith.constant 0 : i32
    %c0_i32_0 = arith.constant 0 : i32
    return %arg0, %arg1, %c0_i32 : i32, i32, i32
  }
  func.func @transform_1(%arg0: i32, %arg1: i32, %arg2: i32) -> (i32, i32, i32) {
    %c0_i32 = arith.constant 0 : i32
    %c0_i32_0 = arith.constant 0 : i32
    return %arg0, %arg2, %c0_i32 : i32, i32, i32
  }
  func.func @transform_2(%arg0: i32, %arg1: i32, %arg2: i32) -> (i32, i32, i32) {
    %c0_i32 = arith.constant 0 : i32
    %c0_i32_0 = arith.constant 0 : i32
    return %arg0, %arg2, %c0_i32 : i32, i32, i32
  }
  func.func @transform_3(%arg0: i32, %arg1: i32, %arg2: i32) -> (i32, i32, i32) {
    %c0_i32 = arith.constant 0 : i32
    %c0_i32_0 = arith.constant 0 : i32
    return %arg0, %arg1, %c0_i32 : i32, i32, i32
  }
}

</mosaic_0001>

<bundles_post_ra>
// kernel: tpu_custom_call.1
= control target key start
LH: loop header
LB: loop body
LE: loop exit
PB: predicated region body
PF: predicated region fallthrough
CT: control target
= control target key end

     0   :  { %s3309_s12 = smov 0   ;;  %s3311_s13 = smov 0   ;;  %s4802_s0 = inlined_call_operand.vmem [shape: f32[4,256,64], index: 0, kind: input, shape index: {}]   ;;  %s4803_s1 = inlined_call_operand.vmem [shape: f32[4,256,64], index: 1, kind: input, shape index: {}]   ;;  %s4804_s2 = inlined_call_operand.vmem [shape: f32[4,256,64], index: 2, kind: input, shape index: {}]   ;;  %s4805_s3 = inlined_call_operand.vmem [shape: f32[4,256,64], index: 3, kind: output, shape index: {}]  }
   0x1   :  { %s3313_s14 = smov 0  }
   0x2 LB: > { %s32_s15 = sadd.s32 1, %s3279_s13  ;;  %p2704_p0 = scmp.ge.s32.totalorder %s3283_s14, 1  ;;  %s3283_s14 = sphi %s3313_s14, %s13_s14   ;;  %s3279_s13 = sphi %s3311_s13, %s5037_s13   ;;  %s3275_s12 = sphi %s3309_s12, %s5036_s12  }
   0x3   : > { %p34_p1 = scmp.ge.s32.totalorder %s32_s15, 4  ;;  %p199_p2 = scmp.lt.s32.totalorder %s3283_s14, 5 }
   0x5   : > { %s5039_s15 = smov (%p34_p1, %s32_s15), 0  ;;  %p200_p3 = pnand %p2704_p0, %p199_p2 }
   0x7   : > { %203 = sbr.rel (%p200_p3) target bundleno = 1012 (0x3f4), region = 32 }
   0xe   : > { %p250_p4 = scmp.lt.s32.totalorder %s3275_s12, 3  ;;  %vm358_vm0 = vcmask 523264   ;;  %vm293_vm2 = vcmask 7168  }
   0xf   : > { %vm3337_vm1 = vmpackc.low %vm358_vm0, %vm358_vm0 }
  0x10   : > { %s5041_s12 = smov (!%p250_p4, %s3275_s12), 3 }
  0x11   : > { %s3327_s16 = sshll.u32 %s5041_s12, 8 }
  0x12   : > { %s3333_s19 = scalar_lea.vmem %s4803_s1, %s3327_s16  ;;  %s3361_s22 = scalar_lea.vmem %s4802_s0, %s3327_s16 }
  0x13   : > { %v471_v1 = vld [vmem:[%s3333_s19 + $0x80] sm:$0xff]  ;;  %v472_v2 = vld [vmem:[%s3333_s19 + $0x88] sm:$0xff]  ;;  %v473_v6 = vld [vmem:[%s3333_s19 + $0x90] sm:$0xff]  ;;  %s3818_s25 = scalar_lea.vmem %s4804_s2, %s3327_s16  ;;  %s4727_s28 = scalar_lea.vmem %s4805_s3, %s3327_s16 }
  0x14   : > { %v455_v3 = vld [vmem:[%s3333_s19] sm:$0xff]  ;;  %v2879_v4 = vpack.c.bf16 %v472_v2, %v471_v1  ;;  %v456_v5 = vld [vmem:[%s3333_s19 + $0x8] sm:$0xff]  ;;  %v474_v7 = vld [vmem:[%s3333_s19 + $0x98] sm:$0xff] }
  0x15   : > { %v2882_v8 = vpack.c.bf16 %v456_v5, %v455_v3  ;;  %v2885_v9 = vpack.c.bf16 %v474_v7, %v473_v6  ;;  %v457_v10 = vld [vmem:[%s3333_s19 + $0x10] sm:$0xff]  ;;  %v458_v11 = vld [vmem:[%s3333_s19 + $0x18] sm:$0xff]  ;;  %v475_v12 = vld [vmem:[%s3333_s19 + $0xa0] sm:$0xff] }
  0x16   : > { %2881 = vmatprep.subr.msk.bf16.mxu0 %vm3337_vm1, %v2879_v4  ;;  %v476_v13 = vld [vmem:[%s3333_s19 + $0xa8] sm:$0xff]  ;;  %v2888_v14 = vpack.c.bf16 %v458_v11, %v457_v10  ;;  %v391_v16 = vld [vmem:[%s3361_s22] sm:$0xff]  ;;  %v477_v20 = vld [vmem:[%s3333_s19 + $0xb0] sm:$0xff] }
  0x17   : > { %2884 = vmatpush3.bf16.xpose.msk.msra.mxu0 %vm3337_vm1, %v2882_v8  ;;  %v2891_v15 = vpack.c.bf16 %v476_v13, %v475_v12  ;;  %v423_v17 = vmul.f32 0.18033688, %v391_v16  ;;  %v459_v18 = vld [vmem:[%s3333_s19 + $0x20] sm:$0xff]  ;;  %v460_v19 = vld [vmem:[%s3333_s19 + $0x28] sm:$0xff]  ;;  %v478_v21 = vld [vmem:[%s3333_s19 + $0xb8] sm:$0xff] }
  0x18   : > { %2887 = vmatprep.subr.msk.bf16.mxu0 %vm3337_vm1, %v2885_v9  ;;  %v2894_v22 = vpack.c.bf16 %v460_v19, %v459_v18  ;;  %v2897_v23 = vpack.c.bf16 %v478_v21, %v477_v20  ;;  %v461_v24 = vld [vmem:[%s3333_s19 + $0x30] sm:$0xff]  ;;  %v462_v25 = vld [vmem:[%s3333_s19 + $0x38] sm:$0xff]  ;;  %v479_v26 = vld [vmem:[%s3333_s19 + $0xc0] sm:$0xff] }
  0x19   : > { %2815 = vmatprep.mubr.msk.f32.mxu0 %vm358_vm0, %v423_v17  ;;  %v480_v27 = vld [vmem:[%s3333_s19 + $0xc8] sm:$0xff]  ;;  %v2900_v28 = vpack.c.bf16 %v462_v25, %v461_v24  ;;  %v463_v30 = vld [vmem:[%s3333_s19 + $0x40] sm:$0xff]  ;;  %v481_v32 = vld [vmem:[%s3333_s19 + $0xd0] sm:$0xff] }
  0x1a   : > { %v2903_v29 = vpack.c.bf16 %v480_v27, %v479_v26  ;;  %v464_v31 = vld [vmem:[%s3333_s19 + $0x48] sm:$0xff]  ;;  %v482_v33 = vld [vmem:[%s3333_s19 + $0xd8] sm:$0xff]  ;;  %v465_v36 = vld [vmem:[%s3333_s19 + $0x50] sm:$0xff] }
  0x1b   : > { %v2906_v34 = vpack.c.bf16 %v464_v31, %v463_v30  ;;  %v2909_v35 = vpack.c.bf16 %v482_v33, %v481_v32  ;;  %v466_v37 = vld [vmem:[%s3333_s19 + $0x58] sm:$0xff]  ;;  %v483_v38 = vld [vmem:[%s3333_s19 + $0xe0] sm:$0xff]  ;;  %v484_v39 = vld [vmem:[%s3333_s19 + $0xe8] sm:$0xff] }
  0x1c   : > { %v2912_v40 = vpack.c.bf16 %v466_v37, %v465_v36  ;;  %v2915_v41 = vpack.c.bf16 %v484_v39, %v483_v38  ;;  %v467_v42 = vld [vmem:[%s3333_s19 + $0x60] sm:$0xff]  ;;  %v468_v43 = vld [vmem:[%s3333_s19 + $0x68] sm:$0xff]  ;;  %v485_v44 = vld [vmem:[%s3333_s19 + $0xf0] sm:$0xff] }
  0x1d   : > { %v486_v45 = vld [vmem:[%s3333_s19 + $0xf8] sm:$0xff]  ;;  %v2918_v46 = vpack.c.bf16 %v468_v43, %v467_v42  ;;  %v469_v48 = vld [vmem:[%s3333_s19 + $0x70] sm:$0xff]  ;;  %v392_v51 = vld [vmem:[%s3361_s22 + $0x8] sm:$0xff] }
  0x1e   : > { %v2921_v47 = vpack.c.bf16 %v486_v45, %v485_v44  ;;  %v470_v49 = vld [vmem:[%s3333_s19 + $0x78] sm:$0xff]  ;;  %v424_v52 = vmul.f32 0.18033688, %v392_v51  ;;  %v393_v53 = vld [vmem:[%s3361_s22 + $0x10] sm:$0xff]  ;;  %v395_v57 = vld [vmem:[%s3361_s22 + $0x20] sm:$0xff]  ;;  %v3285_v51 = vmov -inf  }
  0x1f   : > { %2890 = vmatpush3.bf16.xpose.msk.msra.mxu0 %vm3337_vm1, %v2888_v14  ;;  %v2924_v50 = vpack.c.bf16 %v470_v49, %v469_v48  ;;  %v425_v54 = vmul.f32 0.18033688, %v393_v53  ;;  %v394_v55 = vld [vmem:[%s3361_s22 + $0x18] sm:$0xff]  ;;  %v427_v58 = vmul.f32 0.18033688, %v395_v57  ;;  %v396_v59 = vld [vmem:[%s3361_s22 + $0x28] sm:$0xff] }
  0x20   : > { %2893 = vmatprep.subr.msk.bf16.mxu0 %vm3337_vm1, %v2891_v15  ;;  %v426_v56 = vmul.f32 0.18033688, %v394_v55  ;;  %v428_v60 = vmul.f32 0.18033688, %v396_v59  ;;  %v397_v61 = vld [vmem:[%s3361_s22 + $0x30] sm:$0xff]  ;;  %v398_v63 = vld [vmem:[%s3361_s22 + $0x38] sm:$0xff] }
  0x21   : > { %v429_v62 = vmul.f32 0.18033688, %v397_v61  ;;  %v430_v0 = vmul.f32 0.18033688, %v398_v63  ;;  %v399_v1 = vld [vmem:[%s3361_s22 + $0x40] sm:$0xff]  ;;  %v400_v3 = vld [vmem:[%s3361_s22 + $0x48] sm:$0xff] }
  0x22   : > { %v431_v2 = vmul.f32 0.18033688, %v399_v1  ;;  %v432_v4 = vmul.f32 0.18033688, %v400_v3  ;;  %v401_v5 = vld [vmem:[%s3361_s22 + $0x50] sm:$0xff]  ;;  %v402_v7 = vld [vmem:[%s3361_s22 + $0x58] sm:$0xff] }
  0x23   : > { %v433_v6 = vmul.f32 0.18033688, %v401_v5  ;;  %v434_v8 = vmul.f32 0.18033688, %v402_v7  ;;  %v403_v9 = vld [vmem:[%s3361_s22 + $0x60] sm:$0xff]  ;;  %v404_v11 = vld [vmem:[%s3361_s22 + $0x68] sm:$0xff] }
  0x24   : > { %v435_v10 = vmul.f32 0.18033688, %v403_v9  ;;  %v436_v12 = vmul.f32 0.18033688, %v404_v11  ;;  %v405_v13 = vld [vmem:[%s3361_s22 + $0x70] sm:$0xff]  ;;  %v406_v15 = vld [vmem:[%s3361_s22 + $0x78] sm:$0xff] }
  0x25   : > { %v437_v14 = vmul.f32 0.18033688, %v405_v13  ;;  %v438_v16 = vmul.f32 0.18033688, %v406_v15  ;;  %v408_v19 = vld [vmem:[%s3361_s22 + $0x88] sm:$0xff]  ;;  %v409_v21 = vld [vmem:[%s3361_s22 + $0x90] sm:$0xff] }
  0x26   : > { %v440_v20 = vmul.f32 0.18033688, %v408_v19  ;;  %v411_v25 = vld [vmem:[%s3361_s22 + $0xa0] sm:$0xff]  ;;  %v412_v27 = vld [vmem:[%s3361_s22 + $0xa8] sm:$0xff]  ;;  %v414_v31 = vld [vmem:[%s3361_s22 + $0xb8] sm:$0xff]  ;;  %294 = vst.msk [vmem:[#allocation2] sm:$0xff] %vm293_vm2, %v3285_v51 }
  0x27   : > { %2896 = vmatpush3.bf16.xpose.msk.msra.mxu0 %vm3337_vm1, %v2894_v22  ;;  %v441_v22 = vmul.f32 0.18033688, %v409_v21  ;;  %v443_v26 = vmul.f32 0.18033688, %v411_v25  ;;  %v446_v32 = vmul.f32 0.18033688, %v414_v31 }
  0x28   : > { %2899 = vmatprep.subr.msk.bf16.mxu0 %vm3337_vm1, %v2897_v23  ;;  %v410_v23 = vld [vmem:[%s3361_s22 + $0x98] sm:$0xff]  ;;  %v415_v33 = vld [vmem:[%s3361_s22 + $0xc0] sm:$0xff]  ;;  %v417_v37 = vld [vmem:[%s3361_s22 + $0xd0] sm:$0xff]  ;;  %295 = vst.msk [vmem:[#allocation2 + $0x8] sm:$0xff] %vm293_vm2, %v3285_v51  ;;  %v3286_v1 = vmov 0  }
  0x29   : > { %v442_v24 = vmul.f32 0.18033688, %v410_v23  ;;  %v449_v38 = vmul.f32 0.18033688, %v417_v37  ;;  %v418_v39 = vld [vmem:[%s3361_s22 + $0xd8] sm:$0xff]  ;;  %v420_v43 = vld [vmem:[%s3361_s22 + $0xe8] sm:$0xff]  ;;  %3003 = vset.pattern.permute.xlu0 %v3286_v1  ;;  %3004 = vset.pattern.permute.xlu1 %v3286_v1 }
  0x2a   : > { %v452_v44 = vmul.f32 0.18033688, %v420_v43  ;;  %v421_v45 = vld [vmem:[%s3361_s22 + $0xf0] sm:$0xff]  ;;  %296 = vst.msk [vmem:[#allocation2 + $0x10] sm:$0xff] %vm293_vm2, %v3285_v51  ;;  %297 = vst.msk [vmem:[#allocation2 + $0x18] sm:$0xff] %vm293_vm2, %v3285_v51 }
  0x2b   : > { %298 = vst.msk [vmem:[#allocation2 + $0x20] sm:$0xff] %vm293_vm2, %v3285_v51  ;;  %299 = vst.msk [vmem:[#allocation2 + $0x28] sm:$0xff] %vm293_vm2, %v3285_v51 }
  0x2c   : > { %300 = vst.msk [vmem:[#allocation2 + $0x30] sm:$0xff] %vm293_vm2, %v3285_v51  ;;  %301 = vst.msk [vmem:[#allocation2 + $0x38] sm:$0xff] %vm293_vm2, %v3285_v51 }
  0x2d   : > { %302 = vst.msk [vmem:[#allocation2 + $0x40] sm:$0xff] %vm293_vm2, %v3285_v51  ;;  %303 = vst.msk [vmem:[#allocation2 + $0x48] sm:$0xff] %vm293_vm2, %v3285_v51 }
  0x2e   : > { %304 = vst.msk [vmem:[#allocation2 + $0x50] sm:$0xff] %vm293_vm2, %v3285_v51  ;;  %305 = vst.msk [vmem:[#allocation2 + $0x58] sm:$0xff] %vm293_vm2, %v3285_v51 }
  0x2f   : > { %2902 = vmatpush3.bf16.xpose.msk.msra.mxu0 %vm3337_vm1, %v2900_v28  ;;  %v444_v28 = vmul.f32 0.18033688, %v412_v27  ;;  %306 = vst.msk [vmem:[#allocation2 + $0x60] sm:$0xff] %vm293_vm2, %v3285_v51  ;;  %307 = vst.msk [vmem:[#allocation2 + $0x68] sm:$0xff] %vm293_vm2, %v3285_v51 }
  0x30   : > { %2905 = vmatprep.subr.msk.bf16.mxu0 %vm3337_vm1, %v2903_v29  ;;  %v413_v29 = vld [vmem:[%s3361_s22 + $0xb0] sm:$0xff]  ;;  %308 = vst.msk [vmem:[#allocation2 + $0x70] sm:$0xff] %vm293_vm2, %v3285_v51  ;;  %309 = vst.msk [vmem:[#allocation2 + $0x78] sm:$0xff] %vm293_vm2, %v3285_v51 }
  0x31   : > { %v445_v30 = vmul.f32 0.18033688, %v413_v29  ;;  %310 = vst.msk [vmem:[#allocation2 + $0x80] sm:$0xff] %vm293_vm2, %v3285_v51  ;;  %311 = vst.msk [vmem:[#allocation2 + $0x88] sm:$0xff] %vm293_vm2, %v3285_v51 }
  0x32   : > { %312 = vst.msk [vmem:[#allocation2 + $0x90] sm:$0xff] %vm293_vm2, %v3285_v51  ;;  %313 = vst.msk [vmem:[#allocation2 + $0x98] sm:$0xff] %vm293_vm2, %v3285_v51 }
  0x33   : > { %314 = vst.msk [vmem:[#allocation2 + $0xa0] sm:$0xff] %vm293_vm2, %v3285_v51  ;;  %315 = vst.msk [vmem:[#allocation2 + $0xa8] sm:$0xff] %vm293_vm2, %v3285_v51 }
  0x34   : > { %316 = vst.msk [vmem:[#allocation2 + $0xb0] sm:$0xff] %vm293_vm2, %v3285_v51  ;;  %317 = vst.msk [vmem:[#allocation2 + $0xb8] sm:$0xff] %vm293_vm2, %v3285_v51 }
  0x35   : > { %318 = vst.msk [vmem:[#allocation2 + $0xc0] sm:$0xff] %vm293_vm2, %v3285_v51  ;;  %319 = vst.msk [vmem:[#allocation2 + $0xc8] sm:$0xff] %vm293_vm2, %v3285_v51 }
  0x36   : > { %320 = vst.msk [vmem:[#allocation2 + $0xd0] sm:$0xff] %vm293_vm2, %v3285_v51  ;;  %321 = vst.msk [vmem:[#allocation2 + $0xd8] sm:$0xff] %vm293_vm2, %v3285_v51 }
  0x37   : > { %2908 = vmatpush3.bf16.xpose.msk.msra.mxu0 %vm3337_vm1, %v2906_v34  ;;  %v447_v34 = vmul.f32 0.18033688, %v415_v33  ;;  %322 = vst.msk [vmem:[#allocation2 + $0xe0] sm:$0xff] %vm293_vm2, %v3285_v51  ;;  %323 = vst.msk [vmem:[#allocation2 + $0xe8] sm:$0xff] %vm293_vm2, %v3285_v51 }
  0x38   : > { %2911 = vmatprep.subr.msk.bf16.mxu0 %vm3337_vm1, %v2909_v35  ;;  %v416_v35 = vld [vmem:[%s3361_s22 + $0xc8] sm:$0xff]  ;;  %324 = vst.msk [vmem:[#allocation2 + $0xf0] sm:$0xff] %vm293_vm2, %v3285_v51  ;;  %325 = vst.msk [vmem:[#allocation2 + $0xf8] sm:$0xff] %vm293_vm2, %v3285_v51 }
  0x39   : > { %v448_v36 = vmul.f32 0.18033688, %v416_v35 }
  0x3f   : > { %2914 = vmatpush3.bf16.xpose.msk.msra.mxu0 %vm3337_vm1, %v2912_v40  ;;  %v450_v40 = vmul.f32 0.18033688, %v418_v39 }
  0x40   : > { %2917 = vmatprep.subr.msk.bf16.mxu0 %vm3337_vm1, %v2915_v41  ;;  %v419_v41 = vld [vmem:[%s3361_s22 + $0xe0] sm:$0xff] }
  0x41   : > { %v451_v42 = vmul.f32 0.18033688, %v419_v41 }
  0x47   : > { %2920 = vmatpush3.bf16.xpose.msk.msra.mxu0 %vm3337_vm1, %v2918_v46  ;;  %v453_v46 = vmul.f32 0.18033688, %v421_v45 }
  0x48   : > { %2923 = vmatprep.subr.msk.bf16.mxu0 %vm3337_vm1, %v2921_v47  ;;  %v422_v47 = vld [vmem:[%s3361_s22 + $0xf8] sm:$0xff] }
  0x49   : > { %v454_v48 = vmul.f32 0.18033688, %v422_v47 }
  0x4f   : > { %2926 = vmatpush3.bf16.xpose.msk.msra.mxu0 %vm3337_vm1, %v2924_v50 }
  0x56   : > { %2816 = vmatmul.mubr.msk.f32.vlgmr.msra.gmra.mrb[0].mxu0 %vm358_vm0, %v423_v17  ;;  %v407_v17 = vld [vmem:[%s3361_s22 + $0x80] sm:$0xff] }
  0x57   : > { %2817 = vmatprep.mubr.msk.f32.mxu0 %vm358_vm0, %v424_v52  ;;  %v439_v18 = vmul.f32 0.18033688, %v407_v17 }
  0x5a   : > { %2818 = vmatmul.mubr.msk.f32.gmra.mrb[2].mxu0 %vm358_vm0, %v424_v52 }
  0x5b   : > { %2819 = vmatprep.mubr.msk.f32.mxu0 %vm358_vm0, %v425_v54 }
  0x5e   : > { %2820 = vmatmul.mubr.msk.f32.gmra.mrb[4].mxu0 %vm358_vm0, %v425_v54 }
  0x5f   : > { %2821 = vmatprep.mubr.msk.f32.mxu0 %vm358_vm0, %v426_v56 }
  0x62   : > { %2822 = vmatmul.mubr.msk.f32.gmra.mrb[6].mxu0 %vm358_vm0, %v426_v56 }
  0x63   : > { %2823 = vmatprep.mubr.msk.f32.mxu0 %vm358_vm0, %v427_v58 }
  0x66   : > { %2824 = vmatmul.mubr.msk.f32.gmra.mrb[8].mxu0 %vm358_vm0, %v427_v58 }
  0x67   : > { %2825 = vmatprep.mubr.msk.f32.mxu0 %vm358_vm0, %v428_v60 }
  0x6a   : > { %2826 = vmatmul.mubr.msk.f32.gmra.mrb[10].mxu0 %vm358_vm0, %v428_v60 }
  0x6b   : > { %2827 = vmatprep.mubr.msk.f32.mxu0 %vm358_vm0, %v429_v62 }
  0x6e   : > { %2828 = vmatmul.mubr.msk.f32.gmra.mrb[12].mxu0 %vm358_vm0, %v429_v62 }
  0x6f   : > { %2829 = vmatprep.mubr.msk.f32.mxu0 %vm358_vm0, %v430_v0 }
  0x72   : > { %2830 = vmatmul.mubr.msk.f32.gmra.mrb[14].mxu0 %vm358_vm0, %v430_v0 }
  0x73   : > { %2831 = vmatprep.mubr.msk.f32.mxu0 %vm358_vm0, %v431_v2 }
  0x76   : > { %2832 = vmatmul.mubr.msk.f32.gmra.mrb[16].mxu0 %vm358_vm0, %v431_v2 }
  0x77   : > { %2833 = vmatprep.mubr.msk.f32.mxu0 %vm358_vm0, %v432_v4 }
  0x7a   : > { %2834 = vmatmul.mubr.msk.f32.gmra.mrb[18].mxu0 %vm358_vm0, %v432_v4 }
  0x7b   : > { %2835 = vmatprep.mubr.msk.f32.mxu0 %vm358_vm0, %v433_v6 }
  0x7e   : > { %2836 = vmatmul.mubr.msk.f32.gmra.mrb[20].mxu0 %vm358_vm0, %v433_v6 }
  0x7f   : > { %2837 = vmatprep.mubr.msk.f32.mxu0 %vm358_vm0, %v434_v8 }
  0x82   : > { %2838 = vmatmul.mubr.msk.f32.gmra.mrb[22].mxu0 %vm358_vm0, %v434_v8  ;;  %v3287_v8 = vmov 0.0  }
  0x83   : > { %2839 = vmatprep.mubr.msk.f32.mxu0 %vm358_vm0, %v435_v10  ;;  %359 = vst.msk [vmem:[#allocation4] sm:$0xff] %vm358_vm0, %v3287_v8  ;;  %360 = vst.msk [vmem:[#allocation4 + $0x8] sm:$0xff] %vm358_vm0, %v3287_v8 }
  0x84   : > { %326 = vst.msk [vmem:[#allocation3] sm:$0xff] %vm293_vm2, %v3287_v8  ;;  %327 = vst.msk [vmem:[#allocation3 + $0x8] sm:$0xff] %vm293_vm2, %v3287_v8 }
  0x85   : > { %328 = vst.msk [vmem:[#allocation3 + $0x10] sm:$0xff] %vm293_vm2, %v3287_v8  ;;  %329 = vst.msk [vmem:[#allocation3 + $0x18] sm:$0xff] %vm293_vm2, %v3287_v8 }
  0x86   : > { %2840 = vmatmul.mubr.msk.f32.gmra.mrb[24].mxu0 %vm358_vm0, %v435_v10  ;;  %330 = vst.msk [vmem:[#allocation3 + $0x20] sm:$0xff] %vm293_vm2, %v3287_v8  ;;  %331 = vst.msk [vmem:[#allocation3 + $0x28] sm:$0xff] %vm293_vm2, %v3287_v8 }
  0x87   : > { %2841 = vmatprep.mubr.msk.f32.mxu0 %vm358_vm0, %v436_v12  ;;  %332 = vst.msk [vmem:[#allocation3 + $0x30] sm:$0xff] %vm293_vm2, %v3287_v8  ;;  %333 = vst.msk [vmem:[#allocation3 + $0x38] sm:$0xff] %vm293_vm2, %v3287_v8 }
  0x88   : > { %334 = vst.msk [vmem:[#allocation3 + $0x40] sm:$0xff] %vm293_vm2, %v3287_v8  ;;  %335 = vst.msk [vmem:[#allocation3 + $0x48] sm:$0xff] %vm293_vm2, %v3287_v8 }
  0x89   : > { %336 = vst.msk [vmem:[#allocation3 + $0x50] sm:$0xff] %vm293_vm2, %v3287_v8  ;;  %337 = vst.msk [vmem:[#allocation3 + $0x58] sm:$0xff] %vm293_vm2, %v3287_v8 }
  0x8a   : > { %2842 = vmatmul.mubr.msk.f32.gmra.mrb[26].mxu0 %vm358_vm0, %v436_v12  ;;  %338 = vst.msk [vmem:[#allocation3 + $0x60] sm:$0xff] %vm293_vm2, %v3287_v8  ;;  %339 = vst.msk [vmem:[#allocation3 + $0x68] sm:$0xff] %vm293_vm2, %v3287_v8 }
  0x8b   : > { %2843 = vmatprep.mubr.msk.f32.mxu0 %vm358_vm0, %v437_v14  ;;  %340 = vst.msk [vmem:[#allocation3 + $0x70] sm:$0xff] %vm293_vm2, %v3287_v8  ;;  %341 = vst.msk [vmem:[#allocation3 + $0x78] sm:$0xff] %vm293_vm2, %v3287_v8 }
  0x8c   : > { %342 = vst.msk [vmem:[#allocation3 + $0x80] sm:$0xff] %vm293_vm2, %v3287_v8  ;;  %343 = vst.msk [vmem:[#allocation3 + $0x88] sm:$0xff] %vm293_vm2, %v3287_v8 }
  0x8d   : > { %344 = vst.msk [vmem:[#allocation3 + $0x90] sm:$0xff] %vm293_vm2, %v3287_v8  ;;  %345 = vst.msk [vmem:[#allocation3 + $0x98] sm:$0xff] %vm293_vm2, %v3287_v8 }
  0x8e   : > { %2844 = vmatmul.mubr.msk.f32.gmra.mrb[28].mxu0 %vm358_vm0, %v437_v14  ;;  %346 = vst.msk [vmem:[#allocation3 + $0xa0] sm:$0xff] %vm293_vm2, %v3287_v8  ;;  %347 = vst.msk [vmem:[#allocation3 + $0xa8] sm:$0xff] %vm293_vm2, %v3287_v8 }
  0x8f   : > { %2845 = vmatprep.mubr.msk.f32.mxu0 %vm358_vm0, %v438_v16  ;;  %348 = vst.msk [vmem:[#allocation3 + $0xb0] sm:$0xff] %vm293_vm2, %v3287_v8  ;;  %349 = vst.msk [vmem:[#allocation3 + $0xb8] sm:$0xff] %vm293_vm2, %v3287_v8 }
  0x90   : > { %350 = vst.msk [vmem:[#allocation3 + $0xc0] sm:$0xff] %vm293_vm2, %v3287_v8  ;;  %351 = vst.msk [vmem:[#allocation3 + $0xc8] sm:$0xff] %vm293_vm2, %v3287_v8 }
  0x91   : > { %352 = vst.msk [vmem:[#allocation3 + $0xd0] sm:$0xff] %vm293_vm2, %v3287_v8  ;;  %353 = vst.msk [vmem:[#allocation3 + $0xd8] sm:$0xff] %vm293_vm2, %v3287_v8 }
  0x92   : > { %2846 = vmatmul.mubr.msk.f32.gmra.mrb[30].mxu0 %vm358_vm0, %v438_v16  ;;  %354 = vst.msk [vmem:[#allocation3 + $0xe0] sm:$0xff] %vm293_vm2, %v3287_v8  ;;  %355 = vst.msk [vmem:[#allocation3 + $0xe8] sm:$0xff] %vm293_vm2, %v3287_v8 }
  0x93   : > { %2847 = vmatprep.mubr.msk.f32.mxu0 %vm358_vm0, %v439_v18  ;;  %356 = vst.msk [vmem:[#allocation3 + $0xf0] sm:$0xff] %vm293_vm2, %v3287_v8  ;;  %357 = vst.msk [vmem:[#allocation3 + $0xf8] sm:$0xff] %vm293_vm2, %v3287_v8 }
  0x94   : > { %361 = vst.msk [vmem:[#allocation4 + $0x10] sm:$0xff] %vm358_vm0, %v3287_v8  ;;  %362 = vst.msk [vmem:[#allocation4 + $0x18] sm:$0xff] %vm358_vm0, %v3287_v8 }
  0x95   : > { %363 = vst.msk [vmem:[#allocation4 + $0x20] sm:$0xff] %vm358_vm0, %v3287_v8  ;;  %364 = vst.msk [vmem:[#allocation4 + $0x28] sm:$0xff] %vm358_vm0, %v3287_v8 }
  0x96   : > { %2848 = vmatmul.mubr.msk.f32.gmra.mrb[32].mxu0 %vm358_vm0, %v439_v18  ;;  %365 = vst.msk [vmem:[#allocation4 + $0x30] sm:$0xff] %vm358_vm0, %v3287_v8  ;;  %366 = vst.msk [vmem:[#allocation4 + $0x38] sm:$0xff] %vm358_vm0, %v3287_v8 }
  0x97   : > { %2849 = vmatprep.mubr.msk.f32.mxu0 %vm358_vm0, %v440_v20  ;;  %367 = vst.msk [vmem:[#allocation4 + $0x40] sm:$0xff] %vm358_vm0, %v3287_v8  ;;  %368 = vst.msk [vmem:[#allocation4 + $0x48] sm:$0xff] %vm358_vm0, %v3287_v8 }
  0x98   : > { %369 = vst.msk [vmem:[#allocation4 + $0x50] sm:$0xff] %vm358_vm0, %v3287_v8  ;;  %370 = vst.msk [vmem:[#allocation4 + $0x58] sm:$0xff] %vm358_vm0, %v3287_v8 }
  0x99   : > { %371 = vst.msk [vmem:[#allocation4 + $0x60] sm:$0xff] %vm358_vm0, %v3287_v8  ;;  %372 = vst.msk [vmem:[#allocation4 + $0x68] sm:$0xff] %vm358_vm0, %v3287_v8 }
  0x9a   : > { %2850 = vmatmul.mubr.msk.f32.gmra.mrb[34].mxu0 %vm358_vm0, %v440_v20  ;;  %373 = vst.msk [vmem:[#allocation4 + $0x70] sm:$0xff] %vm358_vm0, %v3287_v8  ;;  %374 = vst.msk [vmem:[#allocation4 + $0x78] sm:$0xff] %vm358_vm0, %v3287_v8 }
  0x9b   : > { %2851 = vmatprep.mubr.msk.f32.mxu0 %vm358_vm0, %v441_v22  ;;  %375 = vst.msk [vmem:[#allocation4 + $0x80] sm:$0xff] %vm358_vm0, %v3287_v8  ;;  %376 = vst.msk [vmem:[#allocation4 + $0x88] sm:$0xff] %vm358_vm0, %v3287_v8 }
  0x9c   : > { %377 = vst.msk [vmem:[#allocation4 + $0x90] sm:$0xff] %vm358_vm0, %v3287_v8  ;;  %378 = vst.msk [vmem:[#allocation4 + $0x98] sm:$0xff] %vm358_vm0, %v3287_v8 }
  0x9d   : > { %379 = vst.msk [vmem:[#allocation4 + $0xa0] sm:$0xff] %vm358_vm0, %v3287_v8  ;;  %380 = vst.msk [vmem:[#allocation4 + $0xa8] sm:$0xff] %vm358_vm0, %v3287_v8 }
  0x9e   : > { %2852 = vmatmul.mubr.msk.f32.gmra.mrb[36].mxu0 %vm358_vm0, %v441_v22  ;;  %381 = vst.msk [vmem:[#allocation4 + $0xb0] sm:$0xff] %vm358_vm0, %v3287_v8  ;;  %382 = vst.msk [vmem:[#allocation4 + $0xb8] sm:$0xff] %vm358_vm0, %v3287_v8 }
  0x9f   : > { %2853 = vmatprep.mubr.msk.f32.mxu0 %vm358_vm0, %v442_v24  ;;  %383 = vst.msk [vmem:[#allocation4 + $0xc0] sm:$0xff] %vm358_vm0, %v3287_v8  ;;  %384 = vst.msk [vmem:[#allocation4 + $0xc8] sm:$0xff] %vm358_vm0, %v3287_v8 }
  0xa0   : > { %385 = vst.msk [vmem:[#allocation4 + $0xd0] sm:$0xff] %vm358_vm0, %v3287_v8  ;;  %386 = vst.msk [vmem:[#allocation4 + $0xd8] sm:$0xff] %vm358_vm0, %v3287_v8 }
  0xa1   : > { %387 = vst.msk [vmem:[#allocation4 + $0xe0] sm:$0xff] %vm358_vm0, %v3287_v8  ;;  %388 = vst.msk [vmem:[#allocation4 + $0xe8] sm:$0xff] %vm358_vm0, %v3287_v8 }
  0xa2   : > { %2854 = vmatmul.mubr.msk.f32.gmra.mrb[38].mxu0 %vm358_vm0, %v442_v24  ;;  %389 = vst.msk [vmem:[#allocation4 + $0xf0] sm:$0xff] %vm358_vm0, %v3287_v8  ;;  %390 = vst.msk [vmem:[#allocation4 + $0xf8] sm:$0xff] %vm358_vm0, %v3287_v8 }
  0xa3   : > { %2855 = vmatprep.mubr.msk.f32.mxu0 %vm358_vm0, %v443_v26 }
  0xa6   : > { %2856 = vmatmul.mubr.msk.f32.gmra.mrb[40].mxu0 %vm358_vm0, %v443_v26 }
  0xa7   : > { %2857 = vmatprep.mubr.msk.f32.mxu0 %vm358_vm0, %v444_v28 }
  0xaa   : > { %2858 = vmatmul.mubr.msk.f32.gmra.mrb[42].mxu0 %vm358_vm0, %v444_v28 }
  0xab   : > { %2859 = vmatprep.mubr.msk.f32.mxu0 %vm358_vm0, %v445_v30 }
  0xae   : > { %2860 = vmatmul.mubr.msk.f32.gmra.mrb[44].mxu0 %vm358_vm0, %v445_v30 }
  0xaf   : > { %2861 = vmatprep.mubr.msk.f32.mxu0 %vm358_vm0, %v446_v32 }
  0xb2   : > { %2862 = vmatmul.mubr.msk.f32.gmra.mrb[46].mxu0 %vm358_vm0, %v446_v32 }
  0xb3   : > { %2863 = vmatprep.mubr.msk.f32.mxu0 %vm358_vm0, %v447_v34 }
  0xb6   : > { %2864 = vmatmul.mubr.msk.f32.gmra.mrb[48].mxu0 %vm358_vm0, %v447_v34 }
  0xb7   : > { %2865 = vmatprep.mubr.msk.f32.mxu0 %vm358_vm0, %v448_v36 }
  0xba   : > { %2866 = vmatmul.mubr.msk.f32.gmra.mrb[50].mxu0 %vm358_vm0, %v448_v36 }
  0xbb   : > { %2867 = vmatprep.mubr.msk.f32.mxu0 %vm358_vm0, %v449_v38 }
  0xbe   : > { %2868 = vmatmul.mubr.msk.f32.gmra.mrb[52].mxu0 %vm358_vm0, %v449_v38 }
  0xbf   : > { %2869 = vmatprep.mubr.msk.f32.mxu0 %vm358_vm0, %v450_v40 }
  0xc2   : > { %2870 = vmatmul.mubr.msk.f32.gmra.mrb[54].mxu0 %vm358_vm0, %v450_v40 }
  0xc3   : > { %2871 = vmatprep.mubr.msk.f32.mxu0 %vm358_vm0, %v451_v42 }
  0xc6   : > { %2872 = vmatmul.mubr.msk.f32.gmra.mrb[56].mxu0 %vm358_vm0, %v451_v42 }
  0xc7   : > { %2873 = vmatprep.mubr.msk.f32.mxu0 %vm358_vm0, %v452_v44 }
  0xca   : > { %2874 = vmatmul.mubr.msk.f32.gmra.mrb[58].mxu0 %vm358_vm0, %v452_v44 }
  0xcb   : > { %2875 = vmatprep.mubr.msk.f32.mxu0 %vm358_vm0, %v453_v46 }
  0xce   : > { %2876 = vmatmul.mubr.msk.f32.gmra.mrb[60].mxu0 %vm358_vm0, %v453_v46 }
  0xcf   : > { %2877 = vmatprep.mubr.msk.f32.mxu0 %vm358_vm0, %v454_v48 }
  0xd2   : > { %2878 = vmatmul.mubr.msk.f32.gmra.mrb[62].mxu0 %vm358_vm0, %v454_v48 }
 0x129   : > { %v3507_v49 = vpop.f32.mrb[0].mxu0 }
 0x12a   : > { %v3509_v50 = vpop.f32.mrb[1].mxu0 }
 0x12b   : > { %v1001_v52 = vmax.f32 %v3507_v49, %v3509_v50 }
 0x12d   : > { %1002 = vmax.xlane.f32.xlu0 %v1001_v52  ;;  %v3545_v53 = vpop.f32.mrb[2].mxu0 }
 0x12e   : > { %v3547_v54 = vpop.f32.mrb[3].mxu0 }
 0x12f   : > { %v1004_v55 = vmax.f32 %v3545_v53, %v3547_v54 }
 0x131   : > { %1005 = vmax.xlane.f32.xlu0 %v1004_v55  ;;  %v3551_v56 = vpop.f32.mrb[4].mxu0 }
 0x132   : > { %v3553_v57 = vpop.f32.mrb[5].mxu0 }
 0x133   : > { %v1007_v58 = vmax.f32 %v3551_v56, %v3553_v57 }
 0x135   : > { %1008 = vmax.xlane.f32.xlu1 %v1007_v58  ;;  %v3557_v59 = vpop.f32.mrb[6].mxu0 }
 0x136   : > { %v3559_v60 = vpop.f32.mrb[7].mxu0 }
 0x137   : > { %v1010_v61 = vmax.f32 %v3557_v59, %v3559_v60 }
 0x139   : > { %1011 = vmax.xlane.f32.xlu1 %v1010_v61  ;;  %v3563_v62 = vpop.f32.mrb[8].mxu0 }
 0x13a   : > { %v3565_v63 = vpop.f32.mrb[9].mxu0 }
 0x13b   : > { %v1013_v0 = vmax.f32 %v3563_v62, %v3565_v63 }
 0x13d   : > { %1014 = vmax.xlane.f32.xlu0 %v1013_v0  ;;  %v3569_v2 = vpop.f32.mrb[10].mxu0 }
 0x13e   : > { %4867 = vst [vmem:[#allocation5_spill] sm:$0xff] %v3569_v2  ;;  %v3571_v3 = vpop.f32.mrb[11].mxu0 }
 0x13f   : > { %4868 = vst [vmem:[#allocation6_spill] sm:$0xff] %v3571_v3  ;;  %v1016_v4 = vmax.f32 %v3569_v2, %v3571_v3  ;;  %v4158_v2 = vld [vmem:[#allocation2 + $0xc8] sm:$0xff] }
 0x141   : > { %1017 = vmax.xlane.f32.xlu1 %v1016_v4  ;;  %v3575_v5 = vpop.f32.mrb[12].mxu0 }
 0x142   : > { %4869 = vst [vmem:[#allocation7_spill] sm:$0xff] %v3575_v5  ;;  %v3577_v6 = vpop.f32.mrb[13].mxu0 }
 0x143   : > { %4870 = vst [vmem:[#allocation8_spill] sm:$0xff] %v3577_v6  ;;  %v1019_v7 = vmax.f32 %v3575_v5, %v3577_v6  ;;  %v4147_v6 = vld [vmem:[#allocation2 + $0xc0] sm:$0xff] }
 0x145   : > { %1020 = vmax.xlane.f32.xlu0 %v1019_v7  ;;  %v3712_v9 = vpop.f32.mrb[14].mxu0 }
 0x146   : > { %4871 = vst [vmem:[#allocation9_spill] sm:$0xff] %v3712_v9  ;;  %v3714_v10 = vpop.f32.mrb[15].mxu0 }
 0x147   : > { %4872 = vst [vmem:[#allocation10_spill] sm:$0xff] %v3714_v10  ;;  %v1022_v11 = vmax.f32 %v3712_v9, %v3714_v10 }
 0x149   : > { %1023 = vmax.xlane.f32.xlu1 %v1022_v11  ;;  %v3718_v12 = vpop.f32.mrb[16].mxu0 }
 0x14a   : > { %4873 = vst [vmem:[#allocation11_spill] sm:$0xff] %v3718_v12  ;;  %v3720_v13 = vpop.f32.mrb[17].mxu0 }
 0x14b   : > { %4874 = vst [vmem:[#allocation12_spill] sm:$0xff] %v3720_v13  ;;  %v1025_v14 = vmax.f32 %v3718_v12, %v3720_v13  ;;  %v4131_v12 = vld [vmem:[#allocation2 + $0xb0] sm:$0xff] }
 0x14d   : > { %1026 = vmax.xlane.f32.xlu0 %v1025_v14  ;;  %v3724_v15 = vpop.f32.mrb[18].mxu0 }
 0x14e   : > { %4875 = vst [vmem:[#allocation13_spill] sm:$0xff] %v3724_v15  ;;  %v3726_v16 = vpop.f32.mrb[19].mxu0 }
 0x14f   : > { %4876 = vst [vmem:[#allocation14_spill] sm:$0xff] %v3726_v16  ;;  %v1028_v17 = vmax.f32 %v3724_v15, %v3726_v16  ;;  %v4121_v15 = vld [vmem:[#allocation2 + $0xa8] sm:$0xff] }
 0x151   : > { %1029 = vmax.xlane.f32.xlu1 %v1028_v17  ;;  %v3730_v18 = vpop.f32.mrb[20].mxu0  ;;  %v487_v17 = vld [vmem:[%s3818_s25] sm:$0xff] }
 0x152   : > { %4877 = vst [vmem:[#allocation15_spill] sm:$0xff] %v3730_v18  ;;  %v3732_v19 = vpop.f32.mrb[21].mxu0 }
 0x153   : > { %4878 = vst [vmem:[#allocation16_spill] sm:$0xff] %v3732_v19  ;;  %v1031_v20 = vmax.f32 %v3730_v18, %v3732_v19  ;;  %v4111_v18 = vld [vmem:[#allocation2 + $0xa0] sm:$0xff] }
 0x155   : > { %1032 = vmax.xlane.f32.xlu0 %v1031_v20  ;;  %v3736_v21 = vpop.f32.mrb[22].mxu0  ;;  %v488_v20 = vld [vmem:[%s3818_s25 + $0x8] sm:$0xff] }
 0x156   : > { %4879 = vst [vmem:[#allocation17_spill] sm:$0xff] %v3736_v21  ;;  %v3738_v22 = vpop.f32.mrb[23].mxu0 }
 0x157   : > { %4880 = vst [vmem:[#allocation18_spill] sm:$0xff] %v3738_v22  ;;  %v1034_v23 = vmax.f32 %v3736_v21, %v3738_v22  ;;  %v4101_v21 = vld [vmem:[#allocation2 + $0x98] sm:$0xff] }
 0x159   : > { %1035 = vmax.xlane.f32.xlu1 %v1034_v23  ;;  %v3742_v24 = vpop.f32.mrb[24].mxu0 }
 0x15a   : > { %4881 = vst [vmem:[#allocation19_spill] sm:$0xff] %v3742_v24  ;;  %v3744_v25 = vpop.f32.mrb[25].mxu0 }
 0x15b   : > { %4882 = vst [vmem:[#allocation20_spill] sm:$0xff] %v3744_v25  ;;  %v1037_v26 = vmax.f32 %v3742_v24, %v3744_v25  ;;  %v4091_v24 = vld [vmem:[#allocation2 + $0x90] sm:$0xff] }
 0x15d   : > { %1038 = vmax.xlane.f32.xlu0 %v1037_v26  ;;  %v3748_v27 = vpop.f32.mrb[26].mxu0  ;;  %v2928_v26 = vpack.c.bf16 %v488_v20, %v487_v17 }
 0x15e   : > { %4883 = vst [vmem:[#allocation21_spill] sm:$0xff] %v3748_v27  ;;  %v3750_v28 = vpop.f32.mrb[27].mxu0 }
 0x15f   : > { %4884 = vst [vmem:[#allocation22_spill] sm:$0xff] %v3750_v28  ;;  %v1040_v29 = vmax.f32 %v3748_v27, %v3750_v28  ;;  %v4081_v27 = vld [vmem:[#allocation2 + $0x88] sm:$0xff] }
 0x161   : > { %1041 = vmax.xlane.f32.xlu1 %v1040_v29  ;;  %v3754_v30 = vpop.f32.mrb[28].mxu0 }
 0x162   : > { %4885 = vst [vmem:[#allocation23_spill] sm:$0xff] %v3754_v30  ;;  %v3756_v31 = vpop.f32.mrb[29].mxu0 }
 0x163   : > { %4886 = vst [vmem:[#allocation24_spill] sm:$0xff] %v3756_v31  ;;  %v1043_v32 = vmax.f32 %v3754_v30, %v3756_v31  ;;  %v4071_v30 = vld [vmem:[#allocation2 + $0x80] sm:$0xff] }
 0x165   : > { %1044 = vmax.xlane.f32.xlu0 %v1043_v32  ;;  %v3760_v33 = vpop.f32.mrb[30].mxu0  ;;  %v3288_v32 = vmov 0.0|0.0  }
 0x166   : > { %4887 = vst [vmem:[#allocation25_spill] sm:$0xff] %v3760_v33  ;;  %v3762_v34 = vpop.f32.mrb[31].mxu0  ;;  %2927 = vmatprep.subr.bf16.mxu1 %v3288_v32 }
 0x167   : > { %4888 = vst [vmem:[#allocation26_spill] sm:$0xff] %v3762_v34  ;;  %v1046_v35 = vmax.f32 %v3760_v33, %v3762_v34  ;;  %2929 = vmatpush1.bf16.msra.mxu1 %v2928_v26  ;;  %v4061_v33 = vld [vmem:[#allocation2 + $0x78] sm:$0xff] }
 0x168   : > { %2930 = vmatprep.subr.bf16.mxu1 %v3288_v32 }
 0x169   : > { %1047 = vmax.xlane.f32.xlu1 %v1046_v35  ;;  %v3766_v36 = vpop.f32.mrb[32].mxu0 }
 0x16a   : > { %4889 = vst [vmem:[#allocation27_spill] sm:$0xff] %v3766_v36  ;;  %v3768_v37 = vpop.f32.mrb[33].mxu0 }
 0x16b   : > { %4890 = vst [vmem:[#allocation28_spill] sm:$0xff] %v3768_v37  ;;  %v1049_v38 = vmax.f32 %v3766_v36, %v3768_v37  ;;  %v4051_v36 = vld [vmem:[#allocation2 + $0x70] sm:$0xff] }
 0x16d   : > { %1050 = vmax.xlane.f32.xlu0 %v1049_v38  ;;  %v3772_v39 = vpop.f32.mrb[34].mxu0  ;;  %v489_v38 = vld [vmem:[%s3818_s25 + $0x10] sm:$0xff] }
 0x16e   : > { %4891 = vst [vmem:[#allocation29_spill] sm:$0xff] %v3772_v39  ;;  %v3774_v40 = vpop.f32.mrb[35].mxu0 }
 0x16f   : > { %4892 = vst [vmem:[#allocation30_spill] sm:$0xff] %v3774_v40  ;;  %v1052_v41 = vmax.f32 %v3772_v39, %v3774_v40  ;;  %v4041_v39 = vld [vmem:[#allocation2 + $0x68] sm:$0xff] }
 0x171   : > { %1053 = vmax.xlane.f32.xlu1 %v1052_v41  ;;  %v3778_v42 = vpop.f32.mrb[36].mxu0  ;;  %v490_v41 = vld [vmem:[%s3818_s25 + $0x18] sm:$0xff] }
 0x172   : > { %4893 = vst [vmem:[#allocation31_spill] sm:$0xff] %v3778_v42  ;;  %v3780_v43 = vpop.f32.mrb[37].mxu0 }
 0x173   : > { %4894 = vst [vmem:[#allocation32_spill] sm:$0xff] %v3780_v43  ;;  %v1055_v44 = vmax.f32 %v3778_v42, %v3780_v43  ;;  %v4031_v42 = vld [vmem:[#allocation2 + $0x60] sm:$0xff] }
 0x175   : > { %1056 = vmax.xlane.f32.xlu0 %v1055_v44  ;;  %v3784_v45 = vpop.f32.mrb[38].mxu0 }
 0x176   : > { %4895 = vst [vmem:[#allocation33_spill] sm:$0xff] %v3784_v45  ;;  %v3786_v46 = vpop.f32.mrb[39].mxu0 }
 0x177   : > { %4896 = vst [vmem:[#allocation34_spill] sm:$0xff] %v3786_v46  ;;  %v1058_v47 = vmax.f32 %v3784_v45, %v3786_v46  ;;  %v4021_v45 = vld [vmem:[#allocation2 + $0x58] sm:$0xff] }
 0x179   : > { %1059 = vmax.xlane.f32.xlu1 %v1058_v47  ;;  %v3790_v48 = vpop.f32.mrb[40].mxu0  ;;  %v2931_v47 = vpack.c.bf16 %v490_v41, %v489_v38  ;;  %v493_v38 = vld [vmem:[%s3818_s25 + $0x30] sm:$0xff]  ;;  %v494_v41 = vld [vmem:[%s3818_s25 + $0x38] sm:$0xff] }
 0x17a   : > { %4897 = vst [vmem:[#allocation35_spill] sm:$0xff] %v3790_v48  ;;  %v3792_v51 = vpop.f32.mrb[41].mxu0 }
 0x17b   : > { %4898 = vst [vmem:[#allocation36_spill] sm:$0xff] %v3792_v51  ;;  %v1061_v52 = vmax.f32 %v3790_v48, %v3792_v51  ;;  %2932 = vmatpush1.bf16.msra.mxu1 %v2931_v47  ;;  %v4011_v48 = vld [vmem:[#allocation2 + $0x50] sm:$0xff] }
 0x17c   : > { %2933 = vmatprep.subr.bf16.mxu1 %v3288_v32 }
 0x17d   : > { %1062 = vmax.xlane.f32.xlu0 %v1061_v52  ;;  %v3796_v55 = vpop.f32.mrb[42].mxu0 }
 0x17e   : > { %4899 = vst [vmem:[#allocation37_spill] sm:$0xff] %v3796_v55  ;;  %v3798_v58 = vpop.f32.mrb[43].mxu0 }
 0x17f   : > { %4900 = vst [vmem:[#allocation38_spill] sm:$0xff] %v3798_v58  ;;  %v1064_v61 = vmax.f32 %v3796_v55, %v3798_v58  ;;  %v4001_v55 = vld [vmem:[#allocation2 + $0x48] sm:$0xff] }
 0x181   : > { %1065 = vmax.xlane.f32.xlu1 %v1064_v61  ;;  %v3802_v0 = vpop.f32.mrb[44].mxu0 }
 0x182   : > { %4901 = vst [vmem:[#allocation39_spill] sm:$0xff] %v3802_v0  ;;  %v3804_v1 = vpop.f32.mrb[45].mxu0 }
 0x183   : > { %4902 = vst [vmem:[#allocation40_spill] sm:$0xff] %v3804_v1  ;;  %v1067_v4 = vmax.f32 %v3802_v0, %v3804_v1  ;;  %v3991_v0 = vld [vmem:[#allocation2 + $0x40] sm:$0xff] }
 0x185   : > { %1068 = vmax.xlane.f32.xlu0 %v1067_v4  ;;  %v3808_v7 = vpop.f32.mrb[46].mxu0  ;;  %v491_v4 = vld [vmem:[%s3818_s25 + $0x20] sm:$0xff] }
 0x186   : > { %4903 = vst [vmem:[#allocation41_spill] sm:$0xff] %v3808_v7  ;;  %v3810_v8 = vpop.f32.mrb[47].mxu0 }
 0x187   : > { %4904 = vst [vmem:[#allocation42_spill] sm:$0xff] %v3810_v8  ;;  %v1070_v11 = vmax.f32 %v3808_v7, %v3810_v8  ;;  %v3961_v8 = vld [vmem:[#allocation2 + $0x28] sm:$0xff]  ;;  %v3981_v7 = vld [vmem:[#allocation2 + $0x38] sm:$0xff] }
 0x189   : > { %1071 = vmax.xlane.f32.xlu1 %v1070_v11  ;;  %v3820_v14 = vpop.f32.mrb[48].mxu0  ;;  %v492_v11 = vld [vmem:[%s3818_s25 + $0x28] sm:$0xff] }
 0x18a   : > { %4905 = vst [vmem:[#allocation43_spill] sm:$0xff] %v3820_v14  ;;  %v3824_v23 = vpop.f32.mrb[49].mxu0  ;;  %v2934_v20 = vpack.c.bf16 %v492_v11, %v491_v4 }
 0x18b   : > { %4906 = vst [vmem:[#allocation44_spill] sm:$0xff] %v3824_v23  ;;  %v1073_v29 = vmax.f32 %v3820_v14, %v3824_v23  ;;  %v517_v23 = vld [vmem:[%s3818_s25 + $0xf0] sm:$0xff]  ;;  %v518_v14 = vld [vmem:[%s3818_s25 + $0xf8] sm:$0xff] }
 0x18c   : > { %2935 = vmatpush1.bf16.msra.mxu1 %v2934_v20  ;;  %v495_v20 = vld [vmem:[%s3818_s25 + $0x40] sm:$0xff] }
 0x18d   : > { %1074 = vmax.xlane.f32.xlu0 %v1073_v29  ;;  %v3829_v35 = vpop.f32.mrb[50].mxu0  ;;  %2936 = vmatprep.subr.bf16.mxu1 %v3288_v32 }
 0x18e   : > { %4907 = vst [vmem:[#allocation45_spill] sm:$0xff] %v3829_v35  ;;  %v3834_v44 = vpop.f32.mrb[51].mxu0 }
 0x18f   : > { %4908 = vst [vmem:[#allocation46_spill] sm:$0xff] %v3834_v44  ;;  %v1076_v52 = vmax.f32 %v3829_v35, %v3834_v44  ;;  %v3938_v35 = vld [vmem:[#allocation2 + $0x18] sm:$0xff] }
 0x191   : > { %1077 = vmax.xlane.f32.xlu1 %v1076_v52  ;;  %v3838_v61 = vpop.f32.mrb[52].mxu0  ;;  %v2937_v52 = vpack.c.bf16 %v494_v41, %v493_v38 }
 0x192   : > { %4909 = vst [vmem:[#allocation47_spill] sm:$0xff] %v3838_v61  ;;  %v3843_v17 = vpop.f32.mrb[53].mxu0 }
 0x193   : > { %4910 = vst [vmem:[#allocation48_spill] sm:$0xff] %v3843_v17  ;;  %v1079_v26 = vmax.f32 %v3838_v61, %v3843_v17  ;;  %2938 = vmatpush1.bf16.msra.mxu1 %v2937_v52  ;;  %v497_v52 = vld [vmem:[%s3818_s25 + $0x50] sm:$0xff] }
 0x194   : > { %2939 = vmatprep.subr.bf16.mxu1 %v3288_v32 }
 0x195   : > { %1080 = vmax.xlane.f32.xlu0 %v1079_v26  ;;  %v3847_v29 = vpop.f32.mrb[54].mxu0  ;;  %v496_v26 = vld [vmem:[%s3818_s25 + $0x48] sm:$0xff] }
 0x196   : > { %4911 = vst [vmem:[#allocation49_spill] sm:$0xff] %v3847_v29  ;;  %v3852_v47 = vpop.f32.mrb[55].mxu0  ;;  %v2940_v61 = vpack.c.bf16 %v496_v26, %v495_v20 }
 0x197   : > { %4912 = vst [vmem:[#allocation50_spill] sm:$0xff] %v3852_v47  ;;  %v1082_v4 = vmax.f32 %v3847_v29, %v3852_v47 }
 0x198   : > { %2941 = vmatpush1.bf16.msra.mxu1 %v2940_v61  ;;  %v499_v61 = vld [vmem:[%s3818_s25 + $0x60] sm:$0xff] }
 0x199   : > { %1083 = vmax.xlane.f32.xlu1 %v1082_v4  ;;  %v3856_v11 = vpop.f32.mrb[56].mxu0  ;;  %2942 = vmatprep.subr.bf16.mxu1 %v3288_v32  ;;  %v498_v4 = vld [vmem:[%s3818_s25 + $0x58] sm:$0xff] }
 0x19a   : > { %4913 = vst [vmem:[#allocation51_spill] sm:$0xff] %v3856_v11  ;;  %v3861_v17 = vpop.f32.mrb[57].mxu0  ;;  %v2943_v29 = vpack.c.bf16 %v498_v4, %v497_v52 }
 0x19b   : > { %4914 = vst [vmem:[#allocation52_spill] sm:$0xff] %v3861_v17  ;;  %v1085_v38 = vmax.f32 %v3856_v11, %v3861_v17 }
 0x19c   : > { %2944 = vmatpush1.bf16.msra.mxu1 %v2943_v29  ;;  %v501_v29 = vld [vmem:[%s3818_s25 + $0x70] sm:$0xff] }
 0x19d   : > { %1086 = vmax.xlane.f32.xlu0 %v1085_v38  ;;  %v3865_v41 = vpop.f32.mrb[58].mxu0  ;;  %2945 = vmatprep.subr.bf16.mxu1 %v3288_v32  ;;  %v500_v38 = vld [vmem:[%s3818_s25 + $0x68] sm:$0xff] }
 0x19e   : > { %4915 = vst [vmem:[#allocation53_spill] sm:$0xff] %v3865_v41  ;;  %v3870_v47 = vpop.f32.mrb[59].mxu0  ;;  %v2946_v11 = vpack.c.bf16 %v500_v38, %v499_v61  ;;  %v504_v38 = vld [vmem:[%s3818_s25 + $0x88] sm:$0xff] }
 0x19f   : > { %4916 = vst [vmem:[#allocation54_spill] sm:$0xff] %v3870_v47  ;;  %v1088_v20 = vmax.f32 %v3865_v41, %v3870_v47 }
 0x1a0   : > { %2947 = vmatpush1.bf16.msra.mxu1 %v2946_v11  ;;  %v503_v11 = vld [vmem:[%s3818_s25 + $0x80] sm:$0xff] }
 0x1a1   : > { %1089 = vmax.xlane.f32.xlu1 %v1088_v20  ;;  %v3874_v26 = vpop.f32.mrb[60].mxu0  ;;  %2948 = vmatprep.subr.bf16.mxu1 %v3288_v32  ;;  %v502_v20 = vld [vmem:[%s3818_s25 + $0x78] sm:$0xff] }
 0x1a2   : > { %4917 = vst [vmem:[#allocation55_spill] sm:$0xff] %v3874_v26  ;;  %v3879_v17 = vpop.f32.mrb[61].mxu0  ;;  %v2949_v41 = vpack.c.bf16 %v502_v20, %v501_v29  ;;  %v508_v20 = vld [vmem:[%s3818_s25 + $0xa8] sm:$0xff] }
 0x1a3   : > { %4918 = vst [vmem:[#allocation56_spill] sm:$0xff] %v3879_v17  ;;  %v1091_v52 = vmax.f32 %v3874_v26, %v3879_v17  ;;  %v505_v17 = vld [vmem:[%s3818_s25 + $0x90] sm:$0xff]  ;;  %v506_v26 = vld [vmem:[%s3818_s25 + $0x98] sm:$0xff] }
 0x1a4   : > { %2950 = vmatpush1.bf16.msra.mxu1 %v2949_v41  ;;  %v2955_v29 = vpack.c.bf16 %v506_v26, %v505_v17  ;;  %v507_v41 = vld [vmem:[%s3818_s25 + $0xa0] sm:$0xff]  ;;  %v512_v26 = vld [vmem:[%s3818_s25 + $0xc8] sm:$0xff] }
 0x1a5   : > { %1092 = vmax.xlane.f32.xlu0 %v1091_v52  ;;  %v3883_v4 = vpop.f32.mrb[62].mxu0  ;;  %2951 = vmatprep.subr.bf16.mxu1 %v3288_v32  ;;  %v2952_v52 = vpack.c.bf16 %v504_v38, %v503_v11  ;;  %v3904_v38 = vld [vmem:[#allocation2] sm:$0xff] }
 0x1a6   : > { %4919 = vst [vmem:[#allocation57_spill] sm:$0xff] %v3883_v4  ;;  %v3888_v47 = vpop.f32.mrb[63].mxu0  ;;  %v511_v17 = vld [vmem:[%s3818_s25 + $0xc0] sm:$0xff] }
 0x1a7   : > { %4920 = vst [vmem:[#allocation58_spill] sm:$0xff] %v3888_v47  ;;  %v1094_v61 = vmax.f32 %v3883_v4, %v3888_v47  ;;  %v509_v47 = vld [vmem:[%s3818_s25 + $0xb0] sm:$0xff]  ;;  %v510_v4 = vld [vmem:[%s3818_s25 + $0xb8] sm:$0xff] }
 0x1a8   : > { %2953 = vmatpush1.bf16.msra.mxu1 %v2952_v52  ;;  %v2961_v11 = vpack.c.bf16 %v510_v4, %v509_v47  ;;  %v515_v47 = vld [vmem:[%s3818_s25 + $0xe0] sm:$0xff] }
 0x1a9   : > { %1095 = vmax.xlane.f32.xlu1 %v1094_v61  ;;  %2954 = vmatprep.subr.bf16.mxu1 %v3288_v32  ;;  %v2958_v61 = vpack.c.bf16 %v508_v20, %v507_v41  ;;  %v3912_v41 = vld [vmem:[#allocation2 + $0x8] sm:$0xff]  ;;  %v513_v20 = vld [vmem:[%s3818_s25 + $0xd0] sm:$0xff] }
 0x1ac   : > { %2956 = vmatpush1.bf16.msra.mxu1 %v2955_v29  ;;  %v2964_v29 = vpack.c.bf16 %v512_v26, %v511_v17  ;;  %v3925_v26 = vld [vmem:[#allocation2 + $0x10] sm:$0xff] }
 0x1ad   : > { %2957 = vmatprep.subr.bf16.mxu1 %v3288_v32 }
 0x1b0   : > { %2959 = vmatpush1.bf16.msra.mxu1 %v2958_v61  ;;  %v514_v61 = vld [vmem:[%s3818_s25 + $0xd8] sm:$0xff] }
 0x1b1   : > { %2960 = vmatprep.subr.bf16.mxu1 %v3288_v32  ;;  %v2967_v17 = vpack.c.bf16 %v514_v61, %v513_v20 }
 0x1b4   : > { %2962 = vmatpush1.bf16.msra.mxu1 %v2961_v11 }
 0x1b5   : > { %2963 = vmatprep.subr.bf16.mxu1 %v3288_v32 }
 0x1b8   : > { %2965 = vmatpush1.bf16.msra.mxu1 %v2964_v29 }
 0x1b9   : > { %2966 = vmatprep.subr.bf16.mxu1 %v3288_v32 }
 0x1ba   : > { %v1003_v52 = vpop.xlane.xlu0 %1002 }
 0x1bb   : > { %v3910_v44 = vmax.f32 %v3904_v38, %v1003_v52  ;;  %v3971_v52 = vld [vmem:[#allocation2 + $0x30] sm:$0xff] }
 0x1bc   : > { %2968 = vmatpush1.bf16.msra.mxu1 %v2967_v17 }
 0x1bd   : > { %2219 = vst.msk [vmem:[#allocation2] sm:$0xff] %vm293_vm2, %v3910_v44  ;;  %1195 = vperm.xlu0 %3003, %v3910_v44   ;;  %2969 = vmatprep.subr.bf16.mxu1 %v3288_v32 }
 0x1be   : > { %v1006_v4 = vpop.xlane.xlu0 %1005 }
 0x1bf   : > { %v3923_v11 = vmax.f32 %v3912_v41, %v1006_v4  ;;  %v516_v4 = vld [vmem:[%s3818_s25 + $0xe8] sm:$0xff] }
 0x1c0   : > { %v2970_v61 = vpack.c.bf16 %v516_v4, %v515_v47  ;;  %v2973_v47 = vpack.c.bf16 %v518_v14, %v517_v23  ;;  %v3951_v4 = vld [vmem:[#allocation2 + $0x20] sm:$0xff] }
 0x1c1   : > { %2220 = vst.msk [vmem:[#allocation2 + $0x8] sm:$0xff] %vm293_vm2, %v3923_v11  ;;  %1200 = vperm.xlu1 %3004, %v3923_v11  }
 0x1c2   : > { %v1009_v29 = vpop.xlane.xlu1 %1008  ;;  %2971 = vmatpush1.bf16.msra.mxu1 %v2970_v61 }
 0x1c3   : > { %v3936_v20 = vmax.f32 %v3925_v26, %v1009_v29  ;;  %2972 = vmatprep.subr.bf16.mxu1 %v3288_v32 }
 0x1c5   : > { %2221 = vst.msk [vmem:[#allocation2 + $0x10] sm:$0xff] %vm293_vm2, %v3936_v20  ;;  %1205 = vperm.xlu1 %3004, %v3936_v20  }
 0x1c6   : > { %v1012_v17 = vpop.xlane.xlu1 %1011  ;;  %2974 = vmatpush1.bf16.msra.mxu1 %v2973_v47 }
 0x1c7   : > { %v3949_v29 = vmax.f32 %v3938_v35, %v1012_v17 }
 0x1c9   : > { %2222 = vst.msk [vmem:[#allocation2 + $0x18] sm:$0xff] %vm293_vm2, %v3949_v29  ;;  %1210 = vperm.xlu1 %3004, %v3949_v29  }
 0x1ca   : > { %v1015_v61 = vpop.xlane.xlu0 %1014 }
 0x1cb   : > { %v3959_v32 = vmax.f32 %v3951_v4, %v1015_v61 }
 0x1cd   : > { %2223 = vst.msk [vmem:[#allocation2 + $0x20] sm:$0xff] %vm293_vm2, %v3959_v32  ;;  %1215 = vperm.xlu1 %3004, %v3959_v32  }
 0x1ce   : > { %v1018_v23 = vpop.xlane.xlu1 %1017 }
 0x1cf   : > { %v3969_v17 = vmax.f32 %v3961_v8, %v1018_v23 }
 0x1d1   : > { %2224 = vst.msk [vmem:[#allocation2 + $0x28] sm:$0xff] %vm293_vm2, %v3969_v17  ;;  %1220 = vperm.xlu1 %3004, %v3969_v17  }
 0x1d2   : > { %v1021_v61 = vpop.xlane.xlu0 %1020 }
 0x1d3   : > { %v3979_v14 = vmax.f32 %v3971_v52, %v1021_v61 }
 0x1d5   : > { %2225 = vst.msk [vmem:[#allocation2 + $0x30] sm:$0xff] %vm293_vm2, %v3979_v14  ;;  %1225 = vperm.xlu1 %3004, %v3979_v14  }
 0x1d6   : > { %v1024_v47 = vpop.xlane.xlu1 %1023 }
 0x1d7   : > { %v3989_v1 = vmax.f32 %v3981_v7, %v1024_v47 }
 0x1d9   : > { %2226 = vst.msk [vmem:[#allocation2 + $0x38] sm:$0xff] %vm293_vm2, %v3989_v1  ;;  %1230 = vperm.xlu1 %3004, %v3989_v1  }
 0x1da   : > { %v1027_v23 = vpop.xlane.xlu0 %1026 }
 0x1db   : > { %v3999_v58 = vmax.f32 %v3991_v0, %v1027_v23 }
 0x1dd   : > { %2227 = vst.msk [vmem:[#allocation2 + $0x40] sm:$0xff] %vm293_vm2, %v3999_v58  ;;  %1235 = vperm.xlu1 %3004, %v3999_v58  }
 0x1de   : > { %v1030_v61 = vpop.xlane.xlu1 %1029 }
 0x1df   : > { %v4009_v51 = vmax.f32 %v4001_v55, %v1030_v61 }
 0x1e1   : > { %2228 = vst.msk [vmem:[#allocation2 + $0x48] sm:$0xff] %vm293_vm2, %v4009_v51  ;;  %1240 = vperm.xlu0 %3003, %v4009_v51  }
 0x1e2   : > { %v1033_v47 = vpop.xlane.xlu0 %1032 }
 0x1e3   : > { %v4019_v46 = vmax.f32 %v4011_v48, %v1033_v47 }
 0x1e5   : > { %2229 = vst.msk [vmem:[#allocation2 + $0x50] sm:$0xff] %vm293_vm2, %v4019_v46  ;;  %1245 = vperm.xlu1 %3004, %v4019_v46  }
 0x1e6   : > { %v1036_v23 = vpop.xlane.xlu1 %1035 }
 0x1e7   : > { %v4029_v43 = vmax.f32 %v4021_v45, %v1036_v23 }
 0x1e9   : > { %2230 = vst.msk [vmem:[#allocation2 + $0x58] sm:$0xff] %vm293_vm2, %v4029_v43  ;;  %1250 = vperm.xlu0 %3003, %v4029_v43  }
 0x1ea   : > { %v1039_v61 = vpop.xlane.xlu0 %1038 }
 0x1eb   : > { %v4039_v40 = vmax.f32 %v4031_v42, %v1039_v61 }
 0x1ed   : > { %2231 = vst.msk [vmem:[#allocation2 + $0x60] sm:$0xff] %vm293_vm2, %v4039_v40  ;;  %1255 = vperm.xlu1 %3004, %v4039_v40  }
 0x1ee   : > { %v1042_v47 = vpop.xlane.xlu1 %1041 }
 0x1ef   : > { %v4049_v37 = vmax.f32 %v4041_v39, %v1042_v47 }
 0x1f1   : > { %2232 = vst.msk [vmem:[#allocation2 + $0x68] sm:$0xff] %vm293_vm2, %v4049_v37  ;;  %1260 = vperm.xlu0 %3003, %v4049_v37  }
 0x1f2   : > { %v1045_v23 = vpop.xlane.xlu0 %1044 }
 0x1f3   : > { %v4059_v34 = vmax.f32 %v4051_v36, %v1045_v23 }
 0x1f5   : > { %2233 = vst.msk [vmem:[#allocation2 + $0x70] sm:$0xff] %vm293_vm2, %v4059_v34  ;;  %1265 = vperm.xlu1 %3004, %v4059_v34  }
 0x1f6   : > { %v1048_v61 = vpop.xlane.xlu1 %1047 }
 0x1f7   : > { %v4069_v31 = vmax.f32 %v4061_v33, %v1048_v61 }
 0x1f9   : > { %2234 = vst.msk [vmem:[#allocation2 + $0x78] sm:$0xff] %vm293_vm2, %v4069_v31  ;;  %1270 = vperm.xlu0 %3003, %v4069_v31  }
 0x1fa   : > { %v1051_v47 = vpop.xlane.xlu0 %1050 }
 0x1fb   : > { %v4079_v28 = vmax.f32 %v4071_v30, %v1051_v47 }
 0x1fd   : > { %2235 = vst.msk [vmem:[#allocation2 + $0x80] sm:$0xff] %vm293_vm2, %v4079_v28  ;;  %1275 = vperm.xlu1 %3004, %v4079_v28  }
 0x1fe   : > { %v1054_v23 = vpop.xlane.xlu1 %1053 }
 0x1ff   : > { %v4089_v25 = vmax.f32 %v4081_v27, %v1054_v23 }
 0x201   : > { %2236 = vst.msk [vmem:[#allocation2 + $0x88] sm:$0xff] %vm293_vm2, %v4089_v25  ;;  %1280 = vperm.xlu0 %3003, %v4089_v25  }
 0x202   : > { %v1057_v61 = vpop.xlane.xlu0 %1056 }
 0x203   : > { %v4099_v22 = vmax.f32 %v4091_v24, %v1057_v61 }
 0x205   : > { %2237 = vst.msk [vmem:[#allocation2 + $0x90] sm:$0xff] %vm293_vm2, %v4099_v22  ;;  %1285 = vperm.xlu1 %3004, %v4099_v22  }
 0x206   : > { %v1060_v47 = vpop.xlane.xlu1 %1059 }
 0x207   : > { %v4109_v19 = vmax.f32 %v4101_v21, %v1060_v47  ;;  %v4139_v47 = vld [vmem:[#allocation2 + $0xb8] sm:$0xff] }
 0x208   : > { %4921 = vst [vmem:[#allocation59_spill] sm:$0xff] %v4139_v47 }
 0x209   : > { %2238 = vst.msk [vmem:[#allocation2 + $0x98] sm:$0xff] %vm293_vm2, %v4109_v19  ;;  %1290 = vperm.xlu0 %3003, %v4109_v19  }
 0x20a   : > { %v1063_v23 = vpop.xlane.xlu0 %1062 }
 0x20b   : > { %v4119_v16 = vmax.f32 %v4111_v18, %v1063_v23 }
 0x20d   : > { %2239 = vst.msk [vmem:[#allocation2 + $0xa0] sm:$0xff] %vm293_vm2, %v4119_v16  ;;  %1295 = vperm.xlu1 %3004, %v4119_v16  }
 0x20e   : > { %v1066_v61 = vpop.xlane.xlu1 %1065 }
 0x20f   : > { %v4129_v13 = vmax.f32 %v4121_v15, %v1066_v61 }
 0x211   : > { %2240 = vst.msk [vmem:[#allocation2 + $0xa8] sm:$0xff] %vm293_vm2, %v4129_v13  ;;  %1300 = vperm.xlu0 %3003, %v4129_v13  }
 0x212   : > { %v1069_v23 = vpop.xlane.xlu0 %1068 }
 0x213   : > { %v4137_v10 = vmax.f32 %v4131_v12, %v1069_v23  ;;  %v4923_v23 = vsub.f32 %v3904_v38, %v3910_v44  ;;  %v4169_v44 = vld [vmem:[#allocation2 + $0xd0] sm:$0xff] }
 0x215   : > { %2241 = vst.msk [vmem:[#allocation2 + $0xb0] sm:$0xff] %vm293_vm2, %v4137_v10  ;;  %1305 = vperm.xlu1 %3004, %v4137_v10   ;;  %3005 = vpow2.f32 %v4923_v23 }
 0x216   : > { %v1072_v61 = vpop.xlane.xlu1 %1071 }
 0x217   : > { %v4145_v9 = vmax.f32 %v4139_v47, %v1072_v61  ;;  %v4924_v61 = vsub.f32 %v3912_v41, %v3923_v11  ;;  %v4182_v11 = vld [vmem:[#allocation2 + $0xd8] sm:$0xff] }
 0x219   : > { %4922 = vst [vmem:[#allocation60_spill] sm:$0xff] %v4145_v9  ;;  %2242 = vst.msk [vmem:[#allocation2 + $0xb8] sm:$0xff] %vm293_vm2, %v4145_v9  ;;  %1310 = vperm.xlu0 %3003, %v4145_v9   ;;  %3007 = vpow2.f32 %v4924_v61 }
 0x21a   : > { %v1075_v5 = vpop.xlane.xlu0 %1074 }
 0x21b   : > { %v4156_v3 = vmax.f32 %v4147_v6, %v1075_v5  ;;  %v4925_v5 = vsub.f32 %v3938_v35, %v3949_v29 }
 0x21d   : > { %2243 = vst.msk [vmem:[#allocation2 + $0xc0] sm:$0xff] %vm293_vm2, %v4156_v3  ;;  %1315 = vperm.xlu1 %3004, %v4156_v3   ;;  %3009 = vpow2.f32 %v4925_v5  ;;  %v4196_v5 = vld [vmem:[#allocation2 + $0xe0] sm:$0xff] }
 0x21e   : > { %v1078_v47 = vpop.xlane.xlu1 %1077 }
 0x21f   : > { %v4167_v9 = vmax.f32 %v4158_v2, %v1078_v47  ;;  %v4180_v41 = vpop.eup %3005  ;;  %v4927_v47 = vsub.f32 %v3925_v26, %v3936_v20 }
 0x220   : > { %4926 = vst [vmem:[#allocation61_spill] sm:$0xff] %v4180_v41 }
 0x221   : > { %2244 = vst.msk [vmem:[#allocation2 + $0xc8] sm:$0xff] %vm293_vm2, %v4167_v9  ;;  %1320 = vperm.xlu0 %3003, %v4167_v9   ;;  %3011 = vpow2.f32 %v4927_v47 }
 0x222   : > { %v1081_v38 = vpop.xlane.xlu0 %1080 }
 0x223   : > { %v4178_v23 = vmax.f32 %v4169_v44, %v1081_v38  ;;  %v4194_v61 = vpop.eup %3007  ;;  %v4929_v38 = vsub.f32 %v3961_v8, %v3969_v17 }
 0x224   : > { %4928 = vst [vmem:[#allocation62_spill] sm:$0xff] %v4194_v61 }
 0x225   : > { %2245 = vst.msk [vmem:[#allocation2 + $0xd0] sm:$0xff] %vm293_vm2, %v4178_v23  ;;  %1740 = vperm.xlu0 %3003, %v4180_v41   ;;  %1325 = vperm.xlu1 %3004, %v4178_v23   ;;  %3013 = vpow2.f32 %v4929_v38  ;;  %v4931_v41 = vsub.f32 %v3951_v4, %v3959_v32  ;;  %v4933_v4 = vsub.f32 %v3981_v7, %v3989_v1 }
 0x226   : > { %v1084_v35 = vpop.xlane.xlu1 %1083  ;;  %v4935_v1 = vsub.f32 %v4001_v55, %v4009_v51  ;;  %v4937_v51 = vsub.f32 %v4021_v45, %v4029_v43  ;;  %v4939_v43 = vsub.f32 %v4041_v39, %v4049_v37  ;;  %v4941_v37 = vsub.f32 %v4061_v33, %v4069_v31 }
 0x227   : > { %v4192_v29 = vmax.f32 %v4182_v11, %v1084_v35  ;;  %v4208_v47 = vpop.eup %3009  ;;  %v4210_v35 = vld [vmem:[#allocation2 + $0xe8] sm:$0xff]  ;;  %3015 = vpow2.f32 %v4931_v41  ;;  %v4943_v31 = vsub.f32 %v4081_v27, %v4089_v25  ;;  %v4945_v27 = vsub.f32 %v4101_v21, %v4109_v19 }
 0x228   : > { %4930 = vst [vmem:[#allocation63_spill] sm:$0xff] %v4208_v47  ;;  %v1151_v19 = vsub.f32 %v4131_v12, %v4137_v10  ;;  %v1153_v12 = vsub.f32 %v4147_v6, %v4156_v3 }
 0x229   : > { %2246 = vst.msk [vmem:[#allocation2 + $0xd8] sm:$0xff] %vm293_vm2, %v4192_v29  ;;  %1330 = vperm.xlu0 %3003, %v4192_v29   ;;  %1745 = vperm.xlu1 %3004, %v4194_v61   ;;  %v4932_v61 = vsub.f32 %v3971_v52, %v3979_v14  ;;  %v4934_v52 = vsub.f32 %v3991_v0, %v3999_v58 }
 0x22a   : > { %v1087_v26 = vpop.xlane.xlu0 %1086  ;;  %v4936_v58 = vsub.f32 %v4011_v48, %v4019_v46  ;;  %v4938_v46 = vsub.f32 %v4031_v42, %v4039_v40 }
 0x22b   : > { %v4206_v20 = vmax.f32 %v4196_v5, %v1087_v26  ;;  %v4222_v38 = vpop.eup %3011  ;;  %v4224_v26 = vld [vmem:[#allocation2 + $0xf0] sm:$0xff]  ;;  %3017 = vpow2.f32 %v4932_v61 }
 0x22c   : > { %3019 = vpow2.f32 %v4933_v4 }
 0x22d   : > { %2247 = vst.msk [vmem:[#allocation2 + $0xe0] sm:$0xff] %vm293_vm2, %v4206_v20  ;;  %1755 = vperm.xlu0 %3003, %v4208_v47   ;;  %1335 = vperm.xlu1 %3004, %v4206_v20   ;;  %v4241_v47 = vld [vmem:[#allocation2 + $0xf8] sm:$0xff]  ;;  %3021 = vpow2.f32 %v4934_v52 }
 0x22e   : > { %v1090_v8 = vpop.xlane.xlu1 %1089  ;;  %3023 = vpow2.f32 %v4935_v1 }
 0x22f   : > { %v4220_v17 = vmax.f32 %v4210_v35, %v1090_v8  ;;  %v4239_v8 = vpop.eup %3013  ;;  %3025 = vpow2.f32 %v4936_v58 }
 0x230   : > { %3027 = vpow2.f32 %v4937_v51  ;;  %v1150_v51 = vsub.f32 %v4121_v15, %v4129_v13 }
 0x231   : > { %2248 = vst.msk [vmem:[#allocation2 + $0xe8] sm:$0xff] %vm293_vm2, %v4220_v17  ;;  %1340 = vperm.xlu0 %3003, %v4220_v17   ;;  %1750 = vperm.xlu1 %3004, %v4222_v38   ;;  %v4256_v61 = vpop.eup %3015  ;;  %3029 = vpow2.f32 %v4938_v46  ;;  %v4946_v46 = vsub.f32 %v4111_v18, %v4119_v16  ;;  %v4949_v18 = vld [vmem:[#allocation5_spill] sm:$0xff] }
 0x232   : > { %v1093_v32 = vpop.xlane.xlu0 %1092  ;;  %3031 = vpow2.f32 %v4939_v43 }
 0x233   : > { %v4237_v41 = vmax.f32 %v4224_v26, %v1093_v32 }
 0x235   : > { %2249 = vst.msk [vmem:[#allocation2 + $0xf0] sm:$0xff] %vm293_vm2, %v4237_v41  ;;  %1765 = vperm.xlu0 %3003, %v4239_v8   ;;  %1345 = vperm.xlu1 %3004, %v4237_v41   ;;  %v4268_v55 = vpop.eup %3017 }
 0x236   : > { %v1096_v7 = vpop.xlane.xlu1 %1095  ;;  %v4270_v0 = vpop.eup %3019 }
 0x237   : > { %v4254_v14 = vmax.f32 %v4241_v47, %v1096_v7  ;;  %v4282_v45 = vpop.eup %3021 }
 0x238   : > { %v4284_v52 = vpop.eup %3023 }
 0x239   : > { %2250 = vst.msk [vmem:[#allocation2 + $0xf8] sm:$0xff] %vm293_vm2, %v4254_v14  ;;  %1760 = vperm.xlu1 %3004, %v4256_v61   ;;  %1350 = vperm.xlu0 %3003, %v4254_v14   ;;  %v4296_v39 = vpop.eup %3025 }
 0x23a   : > { %v4298_v1 = vpop.eup %3027 }
 0x23b   : > { %v4310_v33 = vpop.eup %3029 }
 0x23c   : > { %v1196_v4 = vpop.permute.xlu0 %1195  ;;  %v4312_v7 = vpop.eup %3031 }
 0x23d   : > { %v1353_v48 = vsub.f32 %v3507_v49, %v1196_v4  ;;  %v1354_v32 = vsub.f32 %v3509_v50, %v1196_v4  ;;  %1770 = vperm.xlu1 %3004, %v4268_v55   ;;  %1775 = vperm.xlu0 %3003, %v4270_v0   ;;  %v4940_v49 = vsub.f32 %v4051_v36, %v4059_v34 }
 0x23f   : > { %3033 = vpow2.f32 %v1353_v48  ;;  %v4947_v48 = vld [vmem:[#allocation60_spill] sm:$0xff] }
 0x240   : > { %3035 = vpow2.f32 %v1354_v32  ;;  %v1201_v40 = vpop.permute.xlu1 %1200  ;;  %v4948_v32 = vld [vmem:[#allocation59_spill] sm:$0xff] }
 0x241   : > { %3037 = vpow2.f32 %v4940_v49  ;;  %v1355_v50 = vsub.f32 %v3545_v53, %v1201_v40  ;;  %v1356_v42 = vsub.f32 %v3547_v54, %v1201_v40  ;;  %1780 = vperm.xlu1 %3004, %v4282_v45   ;;  %1785 = vperm.xlu0 %3003, %v4284_v52   ;;  %v4942_v53 = vsub.f32 %v4071_v30, %v4079_v28 }
 0x242   : > { %3039 = vpow2.f32 %v4941_v37  ;;  %v1152_v43 = vsub.f32 %v4948_v32, %v4947_v48  ;;  %v1159_v48 = vsub.f32 %v4224_v26, %v4237_v41  ;;  %v4955_v32 = vld [vmem:[#allocation11_spill] sm:$0xff] }
 0x243   : > { %3041 = vpow2.f32 %v1355_v50  ;;  %v4950_v50 = vld [vmem:[#allocation6_spill] sm:$0xff] }
 0x244   : > { %3043 = vpow2.f32 %v1356_v42  ;;  %v1206_v34 = vpop.permute.xlu1 %1205 }
 0x245   : > { %3045 = vpow2.f32 %v4942_v53  ;;  %v1357_v54 = vsub.f32 %v3551_v56, %v1206_v34  ;;  %v1358_v36 = vsub.f32 %v3553_v57, %v1206_v34  ;;  %1790 = vperm.xlu1 %3004, %v4296_v39   ;;  %1795 = vperm.xlu0 %3003, %v4298_v1   ;;  %v4944_v56 = vsub.f32 %v4091_v24, %v4099_v22 }
 0x246   : > { %3047 = vpow2.f32 %v4943_v31  ;;  %v1154_v34 = vsub.f32 %v4158_v2, %v4167_v9  ;;  %v1155_v31 = vsub.f32 %v4169_v44, %v4178_v23 }
 0x247   : > { %3049 = vpow2.f32 %v1357_v54 }
 0x248   : > { %3051 = vpow2.f32 %v1358_v36  ;;  %v1211_v28 = vpop.permute.xlu1 %1210 }
 0x249   : > { %v3034_v30 = vpop.eup %3033  ;;  %3053 = vpow2.f32 %v4944_v56  ;;  %v1359_v57 = vsub.f32 %v3557_v59, %v1211_v28  ;;  %v1360_v58 = vsub.f32 %v3559_v60, %v1211_v28  ;;  %1800 = vperm.xlu1 %3004, %v4310_v33   ;;  %1805 = vperm.xlu0 %3003, %v4312_v7   ;;  %v4951_v28 = vld [vmem:[#allocation7_spill] sm:$0xff]  ;;  %v4952_v56 = vld [vmem:[#allocation8_spill] sm:$0xff] }
 0x24a   : > { %v3036_v25 = vpop.eup %3035  ;;  %3055 = vpow2.f32 %v4945_v27 }
 0x24b   : > { %v4326_v4 = vpop.eup %3037  ;;  %3057 = vpow2.f32 %v1359_v57  ;;  %1994 = vmatprep.mubr.f32.mxu1 %v3036_v25  ;;  %v4328_v22 = vadd.f32 %v3036_v25, %v3034_v30  ;;  %v1156_v57 = vsub.f32 %v4182_v11, %v4192_v29 }
 0x24c   : > { %v4330_v59 = vpop.eup %3039  ;;  %3059 = vpow2.f32 %v1360_v58  ;;  %1995 = vmatmul.mubr.f32.vlgmr.msra.gmra.mrb[0].mxu1 %v3034_v30  ;;  %v1216_v60 = vpop.permute.xlu1 %1215 }
 0x24d   : > { %v3042_v24 = vpop.eup %3041  ;;  %3061 = vpow2.f32 %v4946_v46  ;;  %v1361_v13 = vsub.f32 %v3563_v62, %v1216_v60  ;;  %v1362_v15 = vsub.f32 %v3565_v63, %v1216_v60  ;;  %1810 = vperm.xlu1 %3004, %v4326_v4   ;;  %1815 = vperm.xlu0 %3003, %v4330_v59   ;;  %v4953_v60 = vld [vmem:[#allocation9_spill] sm:$0xff]  ;;  %v4954_v46 = vld [vmem:[#allocation10_spill] sm:$0xff] }
 0x24e   : > { %v3044_v21 = vpop.eup %3043  ;;  %3063 = vpow2.f32 %v1150_v51  ;;  %v1157_v51 = vsub.f32 %v4196_v5, %v4206_v20 }
 0x24f   : > { %v4343_v40 = vpop.eup %3045  ;;  %3065 = vpow2.f32 %v1361_v13  ;;  %1999 = vmatprep.mubr.f32.mxu1 %v3044_v21  ;;  %v4345_v16 = vadd.f32 %v3044_v21, %v3042_v24 }
 0x250   : > { %v4347_v10 = vpop.eup %3047  ;;  %3067 = vpow2.f32 %v1362_v15  ;;  %2000 = vmatmul.mubr.f32.gmra.mrb[2].mxu1 %v3042_v24  ;;  %v1221_v62 = vpop.permute.xlu1 %1220 }
 0x251   : > { %v3050_v63 = vpop.eup %3049  ;;  %3069 = vpow2.f32 %v1151_v19  ;;  %v1363_v49 = vsub.f32 %v4949_v18, %v1221_v62  ;;  %v1364_v42 = vsub.f32 %v4950_v50, %v1221_v62  ;;  %1820 = vperm.xlu1 %3004, %v4343_v40   ;;  %1825 = vperm.xlu0 %3003, %v4347_v10   ;;  %v1158_v19 = vsub.f32 %v4210_v35, %v4220_v17  ;;  %v4956_v62 = vld [vmem:[#allocation12_spill] sm:$0xff]  ;;  %v4957_v50 = vld [vmem:[#allocation13_spill] sm:$0xff] }
 0x252   : > { %v3052_v37 = vpop.eup %3051  ;;  %3071 = vpow2.f32 %v1152_v43 }
 0x253   : > { %v4357_v53 = vpop.eup %3053  ;;  %3073 = vpow2.f32 %v1363_v49  ;;  %2004 = vmatprep.mubr.f32.mxu1 %v3052_v37  ;;  %v4359_v54 = vadd.f32 %v3052_v37, %v3050_v63  ;;  %v4958_v37 = vld [vmem:[#allocation14_spill] sm:$0xff] }
 0x254   : > { %v4361_v3 = vpop.eup %3055  ;;  %3075 = vpow2.f32 %v1364_v42  ;;  %2005 = vmatmul.mubr.f32.gmra.mrb[4].mxu1 %v3050_v63  ;;  %v1226_v6 = vpop.permute.xlu1 %1225  ;;  %v1160_v63 = vsub.f32 %v4241_v47, %v4254_v14 }
 0x255   : > { %v3058_v36 = vpop.eup %3057  ;;  %3077 = vpow2.f32 %v1153_v12  ;;  %v1365_v30 = vsub.f32 %v4951_v28, %v1226_v6  ;;  %v1366_v2 = vsub.f32 %v4952_v56, %v1226_v6  ;;  %1830 = vperm.xlu1 %3004, %v4357_v53   ;;  %1835 = vperm.xlu0 %3003, %v4361_v3  }
 0x256   : > { %v3060_v9 = vpop.eup %3059  ;;  %3079 = vpow2.f32 %v1154_v34 }
 0x257   : > { %v4371_v58 = vpop.eup %3061  ;;  %3081 = vpow2.f32 %v1365_v30  ;;  %2009 = vmatprep.mubr.f32.mxu1 %v3060_v9  ;;  %v4373_v25 = vadd.f32 %v3060_v9, %v3058_v36  ;;  %v4959_v30 = vld [vmem:[#allocation15_spill] sm:$0xff] }
 0x258   : > { %v4375_v44 = vpop.eup %3063  ;;  %3083 = vpow2.f32 %v1366_v2  ;;  %2010 = vmatmul.mubr.f32.gmra.mrb[6].mxu1 %v3058_v36  ;;  %v1231_v23 = vpop.permute.xlu1 %1230  ;;  %v4960_v2 = vld [vmem:[#allocation16_spill] sm:$0xff] }
 0x259   : > { %v3066_v27 = vpop.eup %3065  ;;  %3085 = vpow2.f32 %v1155_v31  ;;  %v1367_v24 = vsub.f32 %v4953_v60, %v1231_v23  ;;  %v1368_v11 = vsub.f32 %v4954_v46, %v1231_v23  ;;  %1840 = vperm.xlu1 %3004, %v4371_v58   ;;  %1845 = vperm.xlu0 %3003, %v4375_v44   ;;  %v4961_v46 = vld [vmem:[#allocation17_spill] sm:$0xff] }
 0x25a   : > { %v3068_v29 = vpop.eup %3067  ;;  %3087 = vpow2.f32 %v1156_v57 }
 0x25b   : > { %v4385_v13 = vpop.eup %3069  ;;  %3089 = vpow2.f32 %v1367_v24  ;;  %2014 = vmatprep.mubr.f32.mxu1 %v3068_v29  ;;  %v4387_v15 = vadd.f32 %v3068_v29, %v3066_v27  ;;  %v4962_v29 = vld [vmem:[#allocation18_spill] sm:$0xff] }
 0x25c   : > { %v4389_v5 = vpop.eup %3071  ;;  %3091 = vpow2.f32 %v1368_v11  ;;  %2015 = vmatmul.mubr.f32.gmra.mrb[8].mxu1 %v3066_v27  ;;  %v1236_v20 = vpop.permute.xlu1 %1235 }
 0x25d   : > { %v3074_v21 = vpop.eup %3073  ;;  %3093 = vpow2.f32 %v1157_v51  ;;  %v1369_v43 = vsub.f32 %v4955_v32, %v1236_v20  ;;  %v1370_v35 = vsub.f32 %v4956_v62, %v1236_v20  ;;  %1850 = vperm.xlu1 %3004, %v4385_v13   ;;  %1855 = vperm.xlu0 %3003, %v4389_v5  }
 0x25e   : > { %v3076_v17 = vpop.eup %3075  ;;  %3095 = vpow2.f32 %v1158_v19 }
 0x25f   : > { %v4399_v12 = vpop.eup %3077  ;;  %3097 = vpow2.f32 %v1369_v43  ;;  %2019 = vmatprep.mubr.f32.mxu1 %v3076_v17  ;;  %v4401_v18 = vadd.f32 %v3076_v17, %v3074_v21 }
 0x260   : > { %v4403_v26 = vpop.eup %3079  ;;  %3099 = vpow2.f32 %v1370_v35  ;;  %2020 = vmatmul.mubr.f32.gmra.mrb[10].mxu1 %v3074_v21  ;;  %v1241_v41 = vpop.permute.xlu0 %1240  ;;  %v4963_v35 = vld [vmem:[#allocation19_spill] sm:$0xff] }
 0x261   : > { %v3082_v49 = vpop.eup %3081  ;;  %3101 = vpow2.f32 %v1159_v48  ;;  %v1371_v42 = vsub.f32 %v4957_v50, %v1241_v41  ;;  %v1372_v34 = vsub.f32 %v4958_v37, %v1241_v41  ;;  %1860 = vperm.xlu1 %3004, %v4399_v12   ;;  %1865 = vperm.xlu0 %3003, %v4403_v26  }
 0x262   : > { %v3084_v47 = vpop.eup %3083  ;;  %3103 = vpow2.f32 %v1160_v63  ;;  %v4964_v63 = vld [vmem:[#allocation20_spill] sm:$0xff] }
 0x263   : > { %v4409_v14 = vpop.eup %3085  ;;  %3105 = vpow2.f32 %v1371_v42  ;;  %2024 = vmatprep.mubr.f32.mxu1 %v3084_v47  ;;  %v4411_v6 = vadd.f32 %v3084_v47, %v3082_v49 }
 0x264   : > { %v4413_v36 = vpop.eup %3087  ;;  %3107 = vpow2.f32 %v1372_v34  ;;  %2025 = vmatmul.mubr.f32.gmra.mrb[12].mxu1 %v3082_v49  ;;  %v1246_v31 = vpop.permute.xlu1 %1245  ;;  %v4965_v34 = vld [vmem:[#allocation21_spill] sm:$0xff] }
 0x265   : > { %v3090_v28 = vpop.eup %3089  ;;  %v1373_v56 = vsub.f32 %v4959_v30, %v1246_v31  ;;  %v1374_v9 = vsub.f32 %v4960_v2, %v1246_v31  ;;  %1870 = vperm.xlu1 %3004, %v4409_v14   ;;  %1875 = vperm.xlu0 %3003, %v4413_v36   ;;  %v4966_v31 = vld [vmem:[#allocation22_spill] sm:$0xff] }
 0x266   : > { %v3092_v57 = vpop.eup %3091 }
 0x267   : > { %v4419_v23 = vpop.eup %3093  ;;  %3109 = vpow2.f32 %v1373_v56  ;;  %2029 = vmatprep.mubr.f32.mxu1 %v3092_v57  ;;  %v4421_v27 = vadd.f32 %v3092_v57, %v3090_v28  ;;  %v4967_v57 = vld [vmem:[#allocation23_spill] sm:$0xff] }
 0x268   : > { %v4423_v51 = vpop.eup %3095  ;;  %3111 = vpow2.f32 %v1374_v9  ;;  %2030 = vmatmul.mubr.f32.gmra.mrb[14].mxu1 %v3090_v28  ;;  %v1251_v60 = vpop.permute.xlu0 %1250 }
 0x269   : > { %v3098_v24 = vpop.eup %3097  ;;  %v1375_v11 = vsub.f32 %v4961_v46, %v1251_v60  ;;  %v1376_v19 = vsub.f32 %v4962_v29, %v1251_v60  ;;  %1880 = vperm.xlu1 %3004, %v4419_v23   ;;  %1885 = vperm.xlu0 %3003, %v4423_v51  }
 0x26a   : > { %v3100_v20 = vpop.eup %3099 }
 0x26b   : > { %v4429_v21 = vpop.eup %3101  ;;  %3113 = vpow2.f32 %v1375_v11  ;;  %2034 = vmatprep.mubr.f32.mxu1 %v3100_v20  ;;  %v4431_v48 = vadd.f32 %v3100_v20, %v3098_v24 }
 0x26c   : > { %v4433_v32 = vpop.eup %3103  ;;  %3115 = vpow2.f32 %v1376_v19  ;;  %2035 = vmatmul.mubr.f32.gmra.mrb[16].mxu1 %v3098_v24  ;;  %v1256_v43 = vpop.permute.xlu1 %1255  ;;  %v4968_v24 = vld [vmem:[#allocation24_spill] sm:$0xff] }
 0x26d   : > { %v3106_v62 = vpop.eup %3105  ;;  %v1377_v17 = vsub.f32 %v4963_v35, %v1256_v43  ;;  %v1378_v41 = vsub.f32 %v4964_v63, %v1256_v43  ;;  %1890 = vperm.xlu1 %3004, %v4429_v21   ;;  %1895 = vperm.xlu0 %3003, %v4433_v32   ;;  %v4969_v43 = vld [vmem:[#allocation25_spill] sm:$0xff]  ;;  %v4970_v35 = vld [vmem:[#allocation26_spill] sm:$0xff] }
 0x26e   : > { %v3108_v49 = vpop.eup %3107 }
 0x26f   : > { %3117 = vpow2.f32 %v1377_v17  ;;  %2039 = vmatprep.mubr.f32.mxu1 %v3108_v49  ;;  %v4439_v50 = vadd.f32 %v3108_v49, %v3106_v62 }
 0x270   : > { %3119 = vpow2.f32 %v1378_v41  ;;  %2040 = vmatmul.mubr.f32.gmra.mrb[18].mxu1 %v3106_v62  ;;  %v1261_v42 = vpop.permute.xlu0 %1260 }
 0x271   : > { %v3110_v37 = vpop.eup %3109  ;;  %v1379_v47 = vsub.f32 %v4965_v34, %v1261_v42  ;;  %v1380_v28 = vsub.f32 %v4966_v31, %v1261_v42 }
 0x272   : > { %v3112_v30 = vpop.eup %3111 }
 0x273   : > { %3121 = vpow2.f32 %v1379_v47  ;;  %2044 = vmatprep.mubr.f32.mxu1 %v3112_v30  ;;  %v4443_v56 = vadd.f32 %v3112_v30, %v3110_v37  ;;  %v4972_v47 = vld [vmem:[#allocation28_spill] sm:$0xff] }
 0x274   : > { %3123 = vpow2.f32 %v1380_v28  ;;  %2045 = vmatmul.mubr.f32.gmra.mrb[20].mxu1 %v3110_v37  ;;  %v1266_v2 = vpop.permute.xlu1 %1265  ;;  %v4971_v37 = vld [vmem:[#allocation27_spill] sm:$0xff] }
 0x275   : > { %v3114_v9 = vpop.eup %3113  ;;  %v1381_v60 = vsub.f32 %v4967_v57, %v1266_v2  ;;  %v1382_v46 = vsub.f32 %v4968_v24, %v1266_v2  ;;  %v4973_v57 = vld [vmem:[#allocation29_spill] sm:$0xff]  ;;  %v4974_v24 = vld [vmem:[#allocation30_spill] sm:$0xff] }
 0x276   : > { %v3116_v11 = vpop.eup %3115 }
 0x277   : > { %3125 = vpow2.f32 %v1381_v60  ;;  %2049 = vmatprep.mubr.f32.mxu1 %v3116_v11  ;;  %v4447_v29 = vadd.f32 %v3116_v11, %v3114_v9 }
 0x278   : > { %3127 = vpow2.f32 %v1382_v46  ;;  %2050 = vmatmul.mubr.f32.gmra.mrb[22].mxu1 %v3114_v9  ;;  %v1271_v19 = vpop.permute.xlu0 %1270 }
 0x279   : > { %v3118_v20 = vpop.eup %3117  ;;  %v1383_v62 = vsub.f32 %v4969_v43, %v1271_v19  ;;  %v1384_v17 = vsub.f32 %v4970_v35, %v1271_v19 }
 0x27a   : > { %v3120_v63 = vpop.eup %3119 }
 0x27b   : > { %3129 = vpow2.f32 %v1383_v62  ;;  %2054 = vmatprep.mubr.f32.mxu1 %v3120_v63  ;;  %v4451_v41 = vadd.f32 %v3120_v63, %v3118_v20  ;;  %v4975_v62 = vld [vmem:[#allocation31_spill] sm:$0xff] }
 0x27c   : > { %3131 = vpow2.f32 %v1384_v17  ;;  %2055 = vmatmul.mubr.f32.gmra.mrb[24].mxu1 %v3118_v20  ;;  %v1276_v49 = vpop.permute.xlu1 %1275  ;;  %v4976_v17 = vld [vmem:[#allocation32_spill] sm:$0xff] }
 0x27d   : > { %v3122_v42 = vpop.eup %3121  ;;  %v1385_v34 = vsub.f32 %v4971_v37, %v1276_v49  ;;  %v1386_v31 = vsub.f32 %v4972_v47, %v1276_v49  ;;  %v4977_v47 = vld [vmem:[#allocation33_spill] sm:$0xff] }
 0x27e   : > { %v3124_v28 = vpop.eup %3123 }
 0x27f   : > { %3133 = vpow2.f32 %v1385_v34  ;;  %2059 = vmatprep.mubr.f32.mxu1 %v3124_v28  ;;  %v4455_v30 = vadd.f32 %v3124_v28, %v3122_v42  ;;  %v4978_v28 = vld [vmem:[#allocation34_spill] sm:$0xff] }
 0x280   : > { %3135 = vpow2.f32 %v1386_v31  ;;  %2060 = vmatmul.mubr.f32.gmra.mrb[26].mxu1 %v3122_v42  ;;  %v1281_v2 = vpop.permute.xlu0 %1280 }
 0x281   : > { %v3126_v9 = vpop.eup %3125  ;;  %v1387_v60 = vsub.f32 %v4973_v57, %v1281_v2  ;;  %v1388_v46 = vsub.f32 %v4974_v24, %v1281_v2 }
 0x282   : > { %v3128_v11 = vpop.eup %3127 }
 0x283   : > { %3137 = vpow2.f32 %v1387_v60  ;;  %2064 = vmatprep.mubr.f32.mxu1 %v3128_v11  ;;  %v4459_v19 = vadd.f32 %v3128_v11, %v3126_v9 }
 0x284   : > { %3139 = vpow2.f32 %v1388_v46  ;;  %2065 = vmatmul.mubr.f32.gmra.mrb[28].mxu1 %v3126_v9  ;;  %v1286_v20 = vpop.permute.xlu1 %1285  ;;  %v4979_v46 = vld [vmem:[#allocation35_spill] sm:$0xff] }
 0x285   : > { %v3130_v43 = vpop.eup %3129  ;;  %v1389_v35 = vsub.f32 %v4975_v62, %v1286_v20  ;;  %v1390_v63 = vsub.f32 %v4976_v17, %v1286_v20  ;;  %v4980_v20 = vld [vmem:[#allocation36_spill] sm:$0xff] }
 0x286   : > { %v3132_v49 = vpop.eup %3131 }
 0x287   : > { %3141 = vpow2.f32 %v1389_v35  ;;  %2069 = vmatprep.mubr.f32.mxu1 %v3132_v49  ;;  %v4463_v42 = vadd.f32 %v3132_v49, %v3130_v43  ;;  %v4981_v49 = vld [vmem:[#allocation37_spill] sm:$0xff] }
 0x288   : > { %3143 = vpow2.f32 %v1390_v63  ;;  %2070 = vmatmul.mubr.f32.gmra.mrb[30].mxu1 %v3130_v43  ;;  %v1291_v37 = vpop.permute.xlu0 %1290 }
 0x289   : > { %v3134_v34 = vpop.eup %3133  ;;  %v1391_v31 = vsub.f32 %v4977_v47, %v1291_v37  ;;  %v1392_v2 = vsub.f32 %v4978_v28, %v1291_v37 }
 0x28a   : > { %v3136_v9 = vpop.eup %3135 }
 0x28b   : > { %3145 = vpow2.f32 %v1391_v31  ;;  %2074 = vmatprep.mubr.f32.mxu1 %v3136_v9  ;;  %v4467_v57 = vadd.f32 %v3136_v9, %v3134_v34  ;;  %v4983_v9 = vld [vmem:[#allocation39_spill] sm:$0xff] }
 0x28c   : > { %3147 = vpow2.f32 %v1392_v2  ;;  %2075 = vmatmul.mubr.f32.gmra.mrb[32].mxu1 %v3134_v34  ;;  %1549 = vadd.xlane.f32.xlu0 %v4345_v16  ;;  %v1296_v60 = vpop.permute.xlu1 %1295  ;;  %v4982_v16 = vld [vmem:[#allocation38_spill] sm:$0xff] }
 0x28d   : > { %v3138_v24 = vpop.eup %3137  ;;  %v1393_v11 = vsub.f32 %v4979_v46, %v1296_v60  ;;  %v1394_v43 = vsub.f32 %v4980_v20, %v1296_v60  ;;  %v4984_v60 = vld [vmem:[#allocation40_spill] sm:$0xff] }
 0x28e   : > { %v3140_v62 = vpop.eup %3139 }
 0x28f   : > { %3149 = vpow2.f32 %v1393_v11  ;;  %2079 = vmatprep.mubr.f32.mxu1 %v3140_v62  ;;  %v4472_v35 = vadd.f32 %v3140_v62, %v3138_v24  ;;  %v4986_v62 = vld [vmem:[#allocation42_spill] sm:$0xff] }
 0x290   : > { %3151 = vpow2.f32 %v1394_v43  ;;  %2080 = vmatmul.mubr.f32.gmra.mrb[34].mxu1 %v3138_v24  ;;  %v1301_v17 = vpop.permute.xlu0 %1300  ;;  %1552 = vadd.xlane.f32.xlu0 %v4359_v54 }
 0x291   : > { %v3142_v63 = vpop.eup %3141  ;;  %v1395_v37 = vsub.f32 %v4981_v49, %v1301_v17  ;;  %v1396_v34 = vsub.f32 %v4982_v16, %v1301_v17  ;;  %1546 = vadd.xlane.f32.xlu1 %v4328_v22  ;;  %v4987_v16 = vld [vmem:[#allocation43_spill] sm:$0xff] }
 0x292   : > { %v3144_v47 = vpop.eup %3143 }
 0x293   : > { %3153 = vpow2.f32 %v1395_v37  ;;  %2084 = vmatprep.mubr.f32.mxu1 %v3144_v47  ;;  %v4478_v31 = vadd.f32 %v3144_v47, %v3142_v63 }
 0x294   : > { %3155 = vpow2.f32 %v1396_v34  ;;  %2085 = vmatmul.mubr.f32.gmra.mrb[36].mxu1 %v3142_v63  ;;  %1558 = vadd.xlane.f32.xlu0 %v4387_v15  ;;  %v1306_v28 = vpop.permute.xlu1 %1305  ;;  %v4985_v15 = vld [vmem:[#allocation41_spill] sm:$0xff]  ;;  %v4988_v34 = vld [vmem:[#allocation44_spill] sm:$0xff] }
 0x295   : > { %v3146_v2 = vpop.eup %3145  ;;  %v1397_v54 = vsub.f32 %v4983_v9, %v1306_v28  ;;  %v1398_v24 = vsub.f32 %v4984_v60, %v1306_v28  ;;  %1555 = vadd.xlane.f32.xlu1 %v4373_v25  ;;  %v4990_v60 = vld [vmem:[#allocation46_spill] sm:$0xff] }
 0x296   : > { %v3148_v46 = vpop.eup %3147 }
 0x297   : > { %3157 = vpow2.f32 %v1397_v54  ;;  %2089 = vmatprep.mubr.f32.mxu1 %v3148_v46  ;;  %v4484_v22 = vadd.f32 %v3148_v46, %v3146_v2 }
 0x298   : > { %3159 = vpow2.f32 %v1398_v24  ;;  %2090 = vmatmul.mubr.f32.gmra.mrb[38].mxu1 %v3146_v2  ;;  %v1311_v11 = vpop.permute.xlu0 %1310  ;;  %1564 = vadd.xlane.f32.xlu0 %v4411_v6 }
 0x299   : > { %v3150_v20 = vpop.eup %3149  ;;  %v1399_v43 = vsub.f32 %v4985_v15, %v1311_v11  ;;  %v1400_v17 = vsub.f32 %v4986_v62, %v1311_v11  ;;  %1561 = vadd.xlane.f32.xlu1 %v4401_v18  ;;  %v4991_v15 = vld [vmem:[#allocation47_spill] sm:$0xff]  ;;  %v4992_v62 = vld [vmem:[#allocation48_spill] sm:$0xff] }
 0x29a   : > { %v3152_v63 = vpop.eup %3151 }
 0x29b   : > { %3161 = vpow2.f32 %v1399_v43  ;;  %2094 = vmatprep.mubr.f32.mxu1 %v3152_v63  ;;  %v4490_v25 = vadd.f32 %v3152_v63, %v3150_v20 }
 0x29c   : > { %3163 = vpow2.f32 %v1400_v17  ;;  %2095 = vmatmul.mubr.f32.gmra.mrb[40].mxu1 %v3150_v20  ;;  %1570 = vadd.xlane.f32.xlu0 %v4431_v48  ;;  %v1316_v49 = vpop.permute.xlu1 %1315  ;;  %v4989_v48 = vld [vmem:[#allocation45_spill] sm:$0xff] }
 0x29d   : > { %v3154_v37 = vpop.eup %3153  ;;  %v1401_v6 = vsub.f32 %v4987_v16, %v1316_v49  ;;  %v1402_v47 = vsub.f32 %v4988_v34, %v1316_v49  ;;  %1567 = vadd.xlane.f32.xlu1 %v4421_v27  ;;  %v4993_v16 = vld [vmem:[#allocation49_spill] sm:$0xff]  ;;  %v4994_v34 = vld [vmem:[#allocation50_spill] sm:$0xff] }
 0x29e   : > { %v3156_v28 = vpop.eup %3155 }
 0x29f   : > { %3165 = vpow2.f32 %v1401_v6  ;;  %2099 = vmatprep.mubr.f32.mxu1 %v3156_v28  ;;  %v4496_v18 = vadd.f32 %v3156_v28, %v3154_v37 }
 0x2a0   : > { %3167 = vpow2.f32 %v1402_v47  ;;  %2100 = vmatmul.mubr.f32.gmra.mrb[42].mxu1 %v3154_v37  ;;  %v1321_v2 = vpop.permute.xlu0 %1320  ;;  %1576 = vadd.xlane.f32.xlu0 %v4443_v56 }
 0x2a1   : > { %v3158_v9 = vpop.eup %3157  ;;  %v1403_v54 = vsub.f32 %v4989_v48, %v1321_v2  ;;  %v1404_v24 = vsub.f32 %v4990_v60, %v1321_v2  ;;  %1573 = vadd.xlane.f32.xlu1 %v4439_v50  ;;  %v4995_v48 = vld [vmem:[#allocation51_spill] sm:$0xff]  ;;  %v4996_v60 = vld [vmem:[#allocation52_spill] sm:$0xff] }
 0x2a2   : > { %v3160_v46 = vpop.eup %3159 }
 0x2a3   : > { %3169 = vpow2.f32 %v1403_v54  ;;  %2104 = vmatprep.mubr.f32.mxu1 %v3160_v46  ;;  %v4502_v27 = vadd.f32 %v3160_v46, %v3158_v9 }
 0x2a4   : > { %3171 = vpow2.f32 %v1404_v24  ;;  %2105 = vmatmul.mubr.f32.gmra.mrb[44].mxu1 %v3158_v9  ;;  %v4504_v11 = vpop.permute.xlu0 %1740  ;;  %1582 = vadd.xlane.f32.xlu0 %v4451_v41  ;;  %v1326_v20 = vpop.permute.xlu1 %1325 }
 0x2a5   : > { %v3162_v56 = vpop.eup %3161  ;;  %v1405_v43 = vsub.f32 %v4991_v15, %v1326_v20  ;;  %v1406_v17 = vsub.f32 %v4992_v62, %v1326_v20  ;;  %1579 = vadd.xlane.f32.xlu1 %v4447_v29  ;;  %v4997_v15 = vld [vmem:[#allocation53_spill] sm:$0xff]  ;;  %v4998_v62 = vld [vmem:[#allocation54_spill] sm:$0xff] }
 0x2a6   : > { %v3164_v50 = vpop.eup %3163 }
 0x2a7   : > { %3173 = vpow2.f32 %v1405_v43  ;;  %2109 = vmatprep.mubr.f32.mxu1 %v3164_v50  ;;  %v4510_v63 = vadd.f32 %v3164_v50, %v3162_v56 }
 0x2a8   : > { %3175 = vpow2.f32 %v1406_v17  ;;  %2110 = vmatmul.mubr.f32.gmra.mrb[46].mxu1 %v3162_v56  ;;  %v1331_v49 = vpop.permute.xlu0 %1330  ;;  %1588 = vadd.xlane.f32.xlu0 %v4459_v19  ;;  %v4513_v37 = vpop.permute.xlu1 %1745 }
 0x2a9   : > { %v3166_v41 = vpop.eup %3165  ;;  %v1407_v6 = vsub.f32 %v4993_v16, %v1331_v49  ;;  %v1408_v47 = vsub.f32 %v4994_v34, %v1331_v49  ;;  %1585 = vadd.xlane.f32.xlu1 %v4455_v30  ;;  %v4999_v16 = vld [vmem:[#allocation55_spill] sm:$0xff]  ;;  %v5000_v34 = vld [vmem:[#allocation56_spill] sm:$0xff] }
 0x2aa   : > { %v3168_v29 = vpop.eup %3167 }
 0x2ab   : > { %3177 = vpow2.f32 %v1407_v6  ;;  %2114 = vmatprep.mubr.f32.mxu1 %v3168_v29  ;;  %v1617_v28 = vadd.f32 %v3168_v29, %v3166_v41 }
 0x2ac   : > { %3179 = vpow2.f32 %v1408_v47  ;;  %2115 = vmatmul.mubr.f32.gmra.mrb[48].mxu1 %v3166_v41  ;;  %v4518_v2 = vpop.permute.xlu0 %1755  ;;  %1594 = vadd.xlane.f32.xlu0 %v4467_v57  ;;  %v1336_v19 = vpop.permute.xlu1 %1335 }
 0x2ad   : > { %v3170_v9 = vpop.eup %3169  ;;  %v1409_v54 = vsub.f32 %v4995_v48, %v1336_v19  ;;  %v1410_v24 = vsub.f32 %v4996_v60, %v1336_v19  ;;  %1591 = vadd.xlane.f32.xlu1 %v4463_v42  ;;  %v5001_v48 = vld [vmem:[#allocation57_spill] sm:$0xff] }
 0x2ae   : > { %v3172_v46 = vpop.eup %3171 }
 0x2af   : > { %3181 = vpow2.f32 %v1409_v54  ;;  %2119 = vmatprep.mubr.f32.mxu1 %v3172_v46  ;;  %v1620_v30 = vadd.f32 %v3172_v46, %v3170_v9  ;;  %v5002_v54 = vld [vmem:[#allocation58_spill] sm:$0xff] }
 0x2b0   : > { %3183 = vpow2.f32 %v1410_v24  ;;  %2120 = vmatmul.mubr.f32.gmra.mrb[50].mxu1 %v3170_v9  ;;  %v1341_v20 = vpop.permute.xlu0 %1340  ;;  %1600 = vadd.xlane.f32.xlu0 %v4478_v31  ;;  %v4525_v56 = vpop.permute.xlu1 %1750 }
 0x2b1   : > { %v3174_v57 = vpop.eup %3173  ;;  %v1411_v43 = vsub.f32 %v4997_v15, %v1341_v20  ;;  %v1412_v17 = vsub.f32 %v4998_v62, %v1341_v20  ;;  %1597 = vadd.xlane.f32.xlu1 %v4472_v35 }
 0x2b2   : > { %v3176_v50 = vpop.eup %3175 }
 0x2b3   : > { %3185 = vpow2.f32 %v1411_v43  ;;  %2124 = vmatprep.mubr.f32.mxu1 %v3176_v50  ;;  %v1623_v42 = vadd.f32 %v3176_v50, %v3174_v57 }
 0x2b4   : > { %3187 = vpow2.f32 %v1412_v17  ;;  %2125 = vmatmul.mubr.f32.gmra.mrb[52].mxu1 %v3174_v57  ;;  %v4530_v49 = vpop.permute.xlu0 %1765  ;;  %1606 = vadd.xlane.f32.xlu0 %v4490_v25  ;;  %v1346_v31 = vpop.permute.xlu1 %1345 }
 0x2b5   : > { %v3178_v41 = vpop.eup %3177  ;;  %v1413_v6 = vsub.f32 %v4999_v16, %v1346_v31  ;;  %v1414_v47 = vsub.f32 %v5000_v34, %v1346_v31  ;;  %1603 = vadd.xlane.f32.xlu1 %v4484_v22 }
 0x2b6   : > { %v3180_v29 = vpop.eup %3179 }
 0x2b7   : > { %3189 = vpow2.f32 %v1413_v6  ;;  %2129 = vmatprep.mubr.f32.mxu1 %v3180_v29  ;;  %v1626_v35 = vadd.f32 %v3180_v29, %v3178_v41 }
 0x2b8   : > { %3191 = vpow2.f32 %v1414_v47  ;;  %2130 = vmatmul.mubr.f32.gmra.mrb[54].mxu1 %v3178_v41  ;;  %v1351_v19 = vpop.permute.xlu0 %1350  ;;  %1612 = vadd.xlane.f32.xlu0 %v4502_v27 }
 0x2b9   : > { %v3182_v9 = vpop.eup %3181  ;;  %v1415_v25 = vsub.f32 %v5001_v48, %v1351_v19  ;;  %v1416_v60 = vsub.f32 %v5002_v54, %v1351_v19  ;;  %1609 = vadd.xlane.f32.xlu1 %v4496_v18 }
 0x2ba   : > { %v3184_v24 = vpop.eup %3183 }
 0x2bb   : > { %3193 = vpow2.f32 %v1415_v25  ;;  %2134 = vmatprep.mubr.f32.mxu1 %v3184_v24  ;;  %v1629_v22 = vadd.f32 %v3184_v24, %v3182_v9 }
 0x2bc   : > { %3195 = vpow2.f32 %v1416_v60  ;;  %2135 = vmatmul.mubr.f32.gmra.mrb[56].mxu1 %v3182_v9  ;;  %1618 = vadd.xlane.f32.xlu0 %v1617_v28  ;;  %v4543_v17 = vpop.permute.xlu0 %1775 }
 0x2bd   : > { %v3186_v46 = vpop.eup %3185  ;;  %1615 = vadd.xlane.f32.xlu1 %v4510_v63  ;;  %v4541_v63 = vpop.permute.xlu1 %1760 }
 0x2be   : > { %v3188_v20 = vpop.eup %3187 }
 0x2bf   : > { %2139 = vmatprep.mubr.f32.mxu1 %v3188_v20  ;;  %v1632_v27 = vadd.f32 %v3188_v20, %v3186_v46 }
 0x2c0   : > { %2140 = vmatmul.mubr.f32.gmra.mrb[58].mxu1 %v3186_v46  ;;  %1624 = vadd.xlane.f32.xlu0 %v1623_v42 }
 0x2c1   : > { %v3190_v57 = vpop.eup %3189  ;;  %1621 = vadd.xlane.f32.xlu1 %v1620_v30  ;;  %v4545_v50 = vpop.permute.xlu1 %1770 }
 0x2c2   : > { %v3192_v15 = vpop.eup %3191  ;;  %v4547_v30 = vpop.permute.xlu0 %1785 }
 0x2c3   : > { %2144 = vmatprep.mubr.f32.mxu1 %v3192_v15  ;;  %v1635_v18 = vadd.f32 %v3192_v15, %v3190_v57 }
 0x2c4   : > { %2145 = vmatmul.mubr.f32.gmra.mrb[60].mxu1 %v3190_v57  ;;  %1630 = vadd.xlane.f32.xlu0 %v1629_v22 }
 0x2c5   : > { %v3194_v43 = vpop.eup %3193  ;;  %1627 = vadd.xlane.f32.xlu1 %v1626_v35  ;;  %v4549_v42 = vpop.permute.xlu1 %1780 }
 0x2c6   : > { %v3196_v62 = vpop.eup %3195  ;;  %v4551_v31 = vpop.permute.xlu0 %1795 }
 0x2c7   : > { %2149 = vmatprep.mubr.f32.mxu1 %v3196_v62  ;;  %v1638_v28 = vadd.f32 %v3196_v62, %v3194_v43 }
 0x2c8   : > { %2150 = vmatmul.mubr.f32.gmra.mrb[62].mxu1 %v3194_v43  ;;  %1636 = vadd.xlane.f32.xlu0 %v1635_v18  ;;  %v1482_v18 = vld [vmem:[#allocation3 + $0x8] sm:$0xff] }
 0x2c9   : > { %1633 = vadd.xlane.f32.xlu1 %v1632_v27  ;;  %v4553_v41 = vpop.permute.xlu1 %1790  ;;  %v5018_v43 = vld [vmem:[#allocation62_spill] sm:$0xff] }
 0x2ca   : > { %v4555_v16 = vpop.permute.xlu0 %1805  ;;  %v1514_v62 = vmul.f32 %v5018_v43, %v1482_v18  ;;  %v1484_v18 = vld [vmem:[#allocation3 + $0x18] sm:$0xff]  ;;  %v1707_v43 = vld [vmem:[#allocation4 + $0x8] sm:$0xff] }
 0x2cd   : > { %1639 = vadd.xlane.f32.xlu1 %v1638_v28  ;;  %v4557_v6 = vpop.permute.xlu1 %1800 }
 0x2ce   : > { %v4559_v34 = vpop.permute.xlu0 %1815 }
 0x2d1   : > { %v4561_v47 = vpop.permute.xlu1 %1810 }
 0x2d2   : > { %v4563_v29 = vpop.permute.xlu0 %1825 }
 0x2d3   : > { %5003 = vst [vmem:[#allocation60_spill] sm:$0xff] %v4563_v29 }
 0x2d5   : > { %v4565_v35 = vpop.permute.xlu1 %1820 }
 0x2d6   : > { %5004 = vst [vmem:[#allocation59_spill] sm:$0xff] %v4565_v35  ;;  %v4567_v19 = vpop.permute.xlu0 %1835 }
 0x2d7   : > { %5005 = vst [vmem:[#allocation5_spill] sm:$0xff] %v4567_v19 }
 0x2d9   : > { %v4569_v9 = vpop.permute.xlu1 %1830 }
 0x2da   : > { %5006 = vst [vmem:[#allocation6_spill] sm:$0xff] %v4569_v9  ;;  %v4571_v48 = vpop.permute.xlu0 %1845 }
 0x2db   : > { %5007 = vst [vmem:[#allocation7_spill] sm:$0xff] %v4571_v48  ;;  %v1481_v48 = vld [vmem:[#allocation3] sm:$0xff] }
 0x2dd   : > { %v4573_v25 = vpop.permute.xlu1 %1840 }
 0x2de   : > { %5008 = vst [vmem:[#allocation8_spill] sm:$0xff] %v4573_v25  ;;  %v4575_v54 = vpop.permute.xlu0 %1855 }
 0x2df   : > { %5009 = vst [vmem:[#allocation9_spill] sm:$0xff] %v4575_v54  ;;  %v1483_v54 = vld [vmem:[#allocation3 + $0x10] sm:$0xff] }
 0x2e1   : > { %v4577_v60 = vpop.permute.xlu1 %1850 }
 0x2e2   : > { %5010 = vst [vmem:[#allocation10_spill] sm:$0xff] %v4577_v60  ;;  %v4579_v24 = vpop.permute.xlu0 %1865 }
 0x2e3   : > { %5011 = vst [vmem:[#allocation11_spill] sm:$0xff] %v4579_v24 }
 0x2e5   : > { %v4581_v22 = vpop.permute.xlu1 %1860 }
 0x2e6   : > { %5012 = vst [vmem:[#allocation12_spill] sm:$0xff] %v4581_v22  ;;  %v4583_v46 = vpop.permute.xlu0 %1875  ;;  %v1706_v22 = vld [vmem:[#allocation4] sm:$0xff] }
 0x2e7   : > { %5013 = vst [vmem:[#allocation13_spill] sm:$0xff] %v4583_v46  ;;  %v1515_v46 = vmul.f32 %v4222_v38, %v1483_v54  ;;  %v5020_v54 = vld [vmem:[#allocation63_spill] sm:$0xff] }
 0x2e9   : > { %v4585_v20 = vpop.permute.xlu1 %1870 }
 0x2ea   : > { %5014 = vst [vmem:[#allocation14_spill] sm:$0xff] %v4585_v20  ;;  %v4587_v27 = vpop.permute.xlu0 %1885 }
 0x2eb   : > { %5015 = vst [vmem:[#allocation15_spill] sm:$0xff] %v4587_v27  ;;  %v5019_v27 = vld [vmem:[#allocation61_spill] sm:$0xff] }
 0x2ec   : > { %v1513_v25 = vmul.f32 %v5019_v27, %v1481_v48  ;;  %v1516_v48 = vmul.f32 %v5020_v54, %v1484_v18  ;;  %v1487_v27 = vld [vmem:[#allocation3 + $0x30] sm:$0xff]  ;;  %v1489_v18 = vld [vmem:[#allocation3 + $0x40] sm:$0xff] }
 0x2ed   : > { %v4589_v57 = vpop.permute.xlu1 %1880 }
 0x2ee   : > { %5016 = vst [vmem:[#allocation16_spill] sm:$0xff] %v4589_v57  ;;  %v4591_v15 = vpop.permute.xlu0 %1895  ;;  %v1485_v57 = vld [vmem:[#allocation3 + $0x20] sm:$0xff] }
 0x2ef   : > { %5017 = vst [vmem:[#allocation17_spill] sm:$0xff] %v4591_v15  ;;  %v1898_v15 = vmul.f32 %v4504_v11, %v1706_v22  ;;  %v1899_v11 = vmul.f32 %v4513_v37, %v1707_v43 }
 0x2f1   : > { %v4594_v60 = vpop.permute.xlu1 %1890 }
 0x319   : > { %v1550_v28 = vpop.xlane.xlu0 %1549 }
 0x31a   : > { %v1642_v24 = vadd.f32 %v1550_v28, %v1514_v62 }
 0x31c   : > { %1675 = vst.msk [vmem:[#allocation3 + $0x8] sm:$0xff] %vm293_vm2, %v1642_v24  ;;  %v1517_v24 = vmul.f32 %v4256_v61, %v1485_v57 }
 0x31d   : > { %v1553_v20 = vpop.xlane.xlu0 %1552 }
 0x31e   : > { %v1643_v19 = vadd.f32 %v1553_v20, %v1515_v46  ;;  %v1547_v9 = vpop.xlane.xlu1 %1546  ;;  %v1486_v20 = vld [vmem:[#allocation3 + $0x28] sm:$0xff] }
 0x31f   : > { %v1996_v29 = vpop.f32.mrb[0].mxu1  ;;  %v1641_v35 = vadd.f32 %v1547_v9, %v1513_v25  ;;  %v1708_v9 = vld [vmem:[#allocation4 + $0x10] sm:$0xff]  ;;  %v1518_v37 = vmul.f32 %v4239_v8, %v1486_v20 }
 0x320   : > { %1676 = vst.msk [vmem:[#allocation3 + $0x10] sm:$0xff] %vm293_vm2, %v1643_v19  ;;  %v2155_v62 = vadd.f32 %v1996_v29, %v1898_v15  ;;  %v1998_v28 = vpop.f32.mrb[1].mxu1  ;;  %v1900_v43 = vmul.f32 %v4525_v56, %v1708_v9 }
 0x321   : > { %1674 = vst.msk [vmem:[#allocation3] sm:$0xff] %vm293_vm2, %v1641_v35  ;;  %v1559_v38 = vpop.xlane.xlu0 %1558  ;;  %v1519_v35 = vmul.f32 %v4268_v55, %v1487_v27  ;;  %v1521_v27 = vmul.f32 %v4282_v45, %v1489_v18 }
 0x322   : > { %2187 = vst.msk [vmem:[#allocation4] sm:$0xff] %vm358_vm0, %v2155_v62  ;;  %v1645_v22 = vadd.f32 %v1559_v38, %v1517_v24  ;;  %v1556_v46 = vpop.xlane.xlu1 %1555  ;;  %v1488_v24 = vld [vmem:[#allocation3 + $0x38] sm:$0xff] }
 0x323   : > { %v2001_v25 = vpop.f32.mrb[2].mxu1  ;;  %v1644_v19 = vadd.f32 %v1556_v46, %v1516_v48  ;;  %v2287_v29 = vld [vmem:[#allocation3 + $0x8] sm:$0xff]  ;;  %v1709_v38 = vld [vmem:[#allocation4 + $0x18] sm:$0xff]  ;;  %v1520_v56 = vmul.f32 %v4270_v0, %v1488_v24  ;;  %v1491_v46 = vld [vmem:[#allocation3 + $0x50] sm:$0xff] }
 0x324   : > { %1678 = vst.msk [vmem:[#allocation3 + $0x20] sm:$0xff] %vm293_vm2, %v1645_v22  ;;  %v2156_v61 = vadd.f32 %v2001_v25, %v1899_v11  ;;  %v2003_v57 = vpop.f32.mrb[3].mxu1  ;;  %2325 = vperm.xlu0 %3003, %v2287_v29   ;;  %v1901_v20 = vmul.f32 %v4518_v2, %v1709_v38  ;;  %v1710_v29 = vld [vmem:[#allocation4 + $0x20] sm:$0xff]  ;;  %v1492_v38 = vld [vmem:[#allocation3 + $0x58] sm:$0xff] }
 0x325   : > { %1677 = vst.msk [vmem:[#allocation3 + $0x18] sm:$0xff] %vm293_vm2, %v1644_v19  ;;  %v1565_v15 = vpop.xlane.xlu0 %1564  ;;  %v1490_v19 = vld [vmem:[#allocation3 + $0x48] sm:$0xff] }
 0x326   : > { %2188 = vst.msk [vmem:[#allocation4 + $0x8] sm:$0xff] %vm358_vm0, %v2156_v61  ;;  %v1647_v62 = vadd.f32 %v1565_v15, %v1519_v35  ;;  %v1562_v28 = vpop.xlane.xlu1 %1561  ;;  %v1523_v15 = vmul.f32 %v4296_v39, %v1491_v46  ;;  %v1522_v2 = vmul.f32 %v4284_v52, %v1490_v19  ;;  %v1712_v19 = vld [vmem:[#allocation4 + $0x30] sm:$0xff] }
 0x327   : > { %v2006_v54 = vpop.f32.mrb[4].mxu1  ;;  %v1646_v48 = vadd.f32 %v1562_v28, %v1518_v37  ;;  %v2288_v37 = vld [vmem:[#allocation3 + $0x10] sm:$0xff] }
 0x328   : > { %1680 = vst.msk [vmem:[#allocation3 + $0x30] sm:$0xff] %vm293_vm2, %v1647_v62  ;;  %v2157_v11 = vadd.f32 %v2006_v54, %v1900_v43  ;;  %v2008_v55 = vpop.f32.mrb[5].mxu1  ;;  %v2286_v22 = vld [vmem:[#allocation3] sm:$0xff]  ;;  %v1902_v62 = vmul.f32 %v4541_v63, %v1710_v29  ;;  %v1711_v54 = vld [vmem:[#allocation4 + $0x28] sm:$0xff]  ;;  %v1524_v63 = vmul.f32 %v4298_v1, %v1492_v38 }
 0x329   : > { %1679 = vst.msk [vmem:[#allocation3 + $0x28] sm:$0xff] %vm293_vm2, %v1646_v48  ;;  %v1571_v8 = vpop.xlane.xlu0 %1570  ;;  %2320 = vperm.xlu1 %3004, %v2286_v22   ;;  %v1493_v43 = vld [vmem:[#allocation3 + $0x60] sm:$0xff]  ;;  %v1903_v46 = vmul.f32 %v4530_v49, %v1711_v54 }
 0x32a   : > { %2189 = vst.msk [vmem:[#allocation4 + $0x10] sm:$0xff] %vm358_vm0, %v2157_v11  ;;  %v1649_v9 = vadd.f32 %v1571_v8, %v1521_v27  ;;  %v1568_v25 = vpop.xlane.xlu1 %1567  ;;  %v1525_v27 = vmul.f32 %v4310_v33, %v1493_v43  ;;  %v1496_v43 = vld [vmem:[#allocation3 + $0x78] sm:$0xff] }
 0x32b   : > { %v2011_v61 = vpop.f32.mrb[6].mxu1  ;;  %v1648_v57 = vadd.f32 %v1568_v25, %v1520_v56  ;;  %v2290_v22 = vld [vmem:[#allocation3 + $0x20] sm:$0xff]  ;;  %v1495_v56 = vld [vmem:[#allocation3 + $0x70] sm:$0xff]  ;;  %v1494_v25 = vld [vmem:[#allocation3 + $0x68] sm:$0xff] }
 0x32c   : > { %1682 = vst.msk [vmem:[#allocation3 + $0x40] sm:$0xff] %vm293_vm2, %v1649_v9  ;;  %v2158_v45 = vadd.f32 %v2011_v61, %v1901_v20  ;;  %v2013_v35 = vpop.f32.mrb[7].mxu1  ;;  %v2289_v18 = vld [vmem:[#allocation3 + $0x18] sm:$0xff]  ;;  %v1526_v49 = vmul.f32 %v4312_v7, %v1494_v25 }
 0x32d   : > { %1681 = vst.msk [vmem:[#allocation3 + $0x38] sm:$0xff] %vm293_vm2, %v1648_v57  ;;  %v1577_v0 = vpop.xlane.xlu0 %1576  ;;  %2330 = vperm.xlu1 %3004, %v2288_v37   ;;  %2335 = vperm.xlu0 %3003, %v2289_v18   ;;  %v1497_v37 = vld [vmem:[#allocation3 + $0x80] sm:$0xff]  ;;  %v1904_v18 = vmul.f32 %v4545_v50, %v1712_v19  ;;  %v1528_v50 = vmul.f32 %v4330_v59, %v1496_v43 }
 0x32e   : > { %2190 = vst.msk [vmem:[#allocation4 + $0x18] sm:$0xff] %vm358_vm0, %v2158_v45  ;;  %v1651_v28 = vadd.f32 %v1577_v0, %v1523_v15  ;;  %v1574_v24 = vpop.xlane.xlu1 %1573  ;;  %v1527_v45 = vmul.f32 %v4326_v4, %v1495_v56  ;;  %v1529_v54 = vmul.f32 %v4343_v40, %v1497_v37  ;;  %v1501_v19 = vld [vmem:[#allocation3 + $0xa0] sm:$0xff] }
 0x32f   : > { %v2016_v48 = vpop.f32.mrb[8].mxu1  ;;  %v1650_v39 = vadd.f32 %v1574_v24, %v1522_v2  ;;  %v2292_v35 = vld [vmem:[#allocation3 + $0x30] sm:$0xff] }
 0x330   : > { %1684 = vst.msk [vmem:[#allocation3 + $0x50] sm:$0xff] %vm293_vm2, %v1651_v28  ;;  %v2159_v11 = vadd.f32 %v2016_v48, %v1902_v62  ;;  %v2018_v55 = vpop.f32.mrb[9].mxu1  ;;  %v2291_v8 = vld [vmem:[#allocation3 + $0x28] sm:$0xff]  ;;  %v1713_v62 = vld [vmem:[#allocation4 + $0x38] sm:$0xff] }
 0x331   : > { %1683 = vst.msk [vmem:[#allocation3 + $0x48] sm:$0xff] %vm293_vm2, %v1650_v39  ;;  %v1583_v52 = vpop.xlane.xlu0 %1582  ;;  %2340 = vperm.xlu1 %3004, %v2290_v22   ;;  %2345 = vperm.xlu0 %3003, %v2291_v8   ;;  %v1905_v55 = vmul.f32 %v4543_v17, %v1713_v62  ;;  %v1498_v8 = vld [vmem:[#allocation3 + $0x88] sm:$0xff] }
 0x332   : > { %2191 = vst.msk [vmem:[#allocation4 + $0x20] sm:$0xff] %vm358_vm0, %v2159_v11  ;;  %v1653_v20 = vadd.f32 %v1583_v52, %v1525_v27  ;;  %v1580_v9 = vpop.xlane.xlu1 %1579  ;;  %v1499_v11 = vld [vmem:[#allocation3 + $0x90] sm:$0xff]  ;;  %v1714_v52 = vld [vmem:[#allocation4 + $0x40] sm:$0xff]  ;;  %v1530_v17 = vmul.f32 %v4347_v10, %v1498_v8  ;;  %v1717_v8 = vld [vmem:[#allocation4 + $0x58] sm:$0xff] }
 0x333   : > { %v2021_v29 = vpop.f32.mrb[10].mxu1  ;;  %v1652_v33 = vadd.f32 %v1580_v9, %v1524_v63  ;;  %v2294_v48 = vld [vmem:[#allocation3 + $0x40] sm:$0xff] }
 0x334   : > { %1686 = vst.msk [vmem:[#allocation3 + $0x60] sm:$0xff] %vm293_vm2, %v1653_v20  ;;  %v2160_v61 = vadd.f32 %v2021_v29, %v1903_v46  ;;  %v2023_v57 = vpop.f32.mrb[11].mxu1  ;;  %v2293_v15 = vld [vmem:[#allocation3 + $0x38] sm:$0xff]  ;;  %v1531_v20 = vmul.f32 %v4357_v53, %v1499_v11  ;;  %v1906_v29 = vmul.f32 %v4549_v42, %v1714_v52 }
 0x335   : > { %1685 = vst.msk [vmem:[#allocation3 + $0x58] sm:$0xff] %vm293_vm2, %v1652_v33  ;;  %v1589_v1 = vpop.xlane.xlu0 %1588  ;;  %2350 = vperm.xlu1 %3004, %v2292_v35   ;;  %2355 = vperm.xlu0 %3003, %v2293_v15   ;;  %v1500_v57 = vld [vmem:[#allocation3 + $0x98] sm:$0xff] }
 0x336   : > { %2192 = vst.msk [vmem:[#allocation4 + $0x28] sm:$0xff] %vm358_vm0, %v2160_v61  ;;  %v1655_v0 = vadd.f32 %v1589_v1, %v1527_v45  ;;  %v1586_v2 = vpop.xlane.xlu1 %1585  ;;  %v1715_v45 = vld [vmem:[#allocation4 + $0x48] sm:$0xff]  ;;  %v1532_v42 = vmul.f32 %v4361_v3, %v1500_v57 }
 0x337   : > { %v2026_v28 = vpop.f32.mrb[12].mxu1  ;;  %v1654_v4 = vadd.f32 %v1586_v2, %v1526_v49  ;;  %v2296_v9 = vld [vmem:[#allocation3 + $0x50] sm:$0xff]  ;;  %v1533_v49 = vmul.f32 %v4371_v58, %v1501_v19  ;;  %v1907_v2 = vmul.f32 %v4547_v30, %v1715_v45  ;;  %v1506_v19 = vld [vmem:[#allocation3 + $0xc8] sm:$0xff] }
 0x338   : > { %1688 = vst.msk [vmem:[#allocation3 + $0x70] sm:$0xff] %vm293_vm2, %v1655_v0  ;;  %v2161_v24 = vadd.f32 %v2026_v28, %v1904_v18  ;;  %v2028_v38 = vpop.f32.mrb[13].mxu1  ;;  %v2295_v39 = vld [vmem:[#allocation3 + $0x48] sm:$0xff]  ;;  %v1503_v0 = vld [vmem:[#allocation3 + $0xb0] sm:$0xff] }
 0x339   : > { %1687 = vst.msk [vmem:[#allocation3 + $0x68] sm:$0xff] %vm293_vm2, %v1654_v4  ;;  %v1595_v7 = vpop.xlane.xlu0 %1594  ;;  %2360 = vperm.xlu1 %3004, %v2294_v48   ;;  %2365 = vperm.xlu0 %3003, %v2295_v39   ;;  %v1502_v28 = vld [vmem:[#allocation3 + $0xa8] sm:$0xff]  ;;  %v1716_v4 = vld [vmem:[#allocation4 + $0x50] sm:$0xff]  ;;  %v1535_v48 = vmul.f32 %v4385_v13, %v1503_v0 }
 0x33a   : > { %2193 = vst.msk [vmem:[#allocation4 + $0x30] sm:$0xff] %vm358_vm0, %v2161_v24  ;;  %v1657_v27 = vadd.f32 %v1595_v7, %v1529_v54  ;;  %v1592_v22 = vpop.xlane.xlu1 %1591  ;;  %v1534_v30 = vmul.f32 %v4375_v44, %v1502_v28  ;;  %v1908_v11 = vmul.f32 %v4553_v41, %v1716_v4  ;;  %v1511_v4 = vld [vmem:[#allocation3 + $0xf0] sm:$0xff] }
 0x33b   : > { %v2031_v63 = vpop.f32.mrb[14].mxu1  ;;  %v1656_v40 = vadd.f32 %v1592_v22, %v1528_v50  ;;  %v2298_v37 = vld [vmem:[#allocation3 + $0x60] sm:$0xff]  ;;  %v1504_v22 = vld [vmem:[#allocation3 + $0xb8] sm:$0xff] }
 0x33c   : > { %1690 = vst.msk [vmem:[#allocation3 + $0x80] sm:$0xff] %vm293_vm2, %v1657_v27  ;;  %v2162_v56 = vadd.f32 %v2031_v63, %v1905_v55  ;;  %v2033_v46 = vpop.f32.mrb[15].mxu1  ;;  %v2297_v25 = vld [vmem:[#allocation3 + $0x58] sm:$0xff]  ;;  %v1505_v50 = vld [vmem:[#allocation3 + $0xc0] sm:$0xff]  ;;  %v1536_v41 = vmul.f32 %v4389_v5, %v1504_v22 }
 0x33d   : > { %1689 = vst.msk [vmem:[#allocation3 + $0x78] sm:$0xff] %vm293_vm2, %v1656_v40  ;;  %v1601_v59 = vpop.xlane.xlu0 %1600  ;;  %2370 = vperm.xlu1 %3004, %v2296_v9   ;;  %2375 = vperm.xlu0 %3003, %v2297_v25   ;;  %v1507_v9 = vld [vmem:[#allocation3 + $0xd0] sm:$0xff]  ;;  %v1909_v25 = vmul.f32 %v4551_v31, %v1717_v8  ;;  %v1538_v31 = vmul.f32 %v4403_v26, %v1506_v19  ;;  %v1512_v8 = vld [vmem:[#allocation3 + $0xf8] sm:$0xff] }
 0x33e   : > { %2194 = vst.msk [vmem:[#allocation4 + $0x38] sm:$0xff] %vm358_vm0, %v2162_v56  ;;  %v1659_v33 = vadd.f32 %v1601_v59, %v1531_v20  ;;  %v1598_v61 = vpop.xlane.xlu1 %1597  ;;  %v1537_v56 = vmul.f32 %v4399_v12, %v1505_v50  ;;  %v1539_v45 = vmul.f32 %v4409_v14, %v1507_v9 }
 0x33f   : > { %v2036_v35 = vpop.f32.mrb[16].mxu1  ;;  %v1658_v53 = vadd.f32 %v1598_v61, %v1530_v17  ;;  %v2300_v39 = vld [vmem:[#allocation3 + $0x70] sm:$0xff] }
 0x340   : > { %1692 = vst.msk [vmem:[#allocation3 + $0x90] sm:$0xff] %vm293_vm2, %v1659_v33  ;;  %v2163_v15 = vadd.f32 %v2036_v35, %v1906_v29  ;;  %v2038_v1 = vpop.f32.mrb[17].mxu1  ;;  %v2299_v18 = vld [vmem:[#allocation3 + $0x68] sm:$0xff]  ;;  %v1718_v29 = vld [vmem:[#allocation4 + $0x60] sm:$0xff] }
 0x341   : > { %1691 = vst.msk [vmem:[#allocation3 + $0x88] sm:$0xff] %vm293_vm2, %v1658_v53  ;;  %v1607_v10 = vpop.xlane.xlu0 %1606  ;;  %2380 = vperm.xlu1 %3004, %v2298_v37   ;;  %2385 = vperm.xlu0 %3003, %v2299_v18   ;;  %v1910_v1 = vmul.f32 %v4557_v6, %v1718_v29  ;;  %v1508_v18 = vld [vmem:[#allocation3 + $0xd8] sm:$0xff]  ;;  %v5021_v29 = vld [vmem:[#allocation59_spill] sm:$0xff] }
 0x342   : > { %2195 = vst.msk [vmem:[#allocation4 + $0x40] sm:$0xff] %vm358_vm0, %v2163_v15  ;;  %v1661_v43 = vadd.f32 %v1607_v10, %v1533_v49  ;;  %v1604_v62 = vpop.xlane.xlu1 %1603  ;;  %v1509_v15 = vld [vmem:[#allocation3 + $0xe0] sm:$0xff]  ;;  %v1719_v10 = vld [vmem:[#allocation4 + $0x68] sm:$0xff]  ;;  %v1540_v6 = vmul.f32 %v4413_v36, %v1508_v18 }
 0x343   : > { %v2041_v24 = vpop.f32.mrb[18].mxu1  ;;  %v1660_v58 = vadd.f32 %v1604_v62, %v1532_v42  ;;  %v2302_v46 = vld [vmem:[#allocation3 + $0x80] sm:$0xff]  ;;  %v5023_v18 = vld [vmem:[#allocation6_spill] sm:$0xff] }
 0x344   : > { %1694 = vst.msk [vmem:[#allocation3 + $0xa0] sm:$0xff] %vm293_vm2, %v1661_v43  ;;  %v2164_v38 = vadd.f32 %v2041_v24, %v1907_v2  ;;  %v2043_v54 = vpop.f32.mrb[19].mxu1  ;;  %v2301_v7 = vld [vmem:[#allocation3 + $0x78] sm:$0xff]  ;;  %v1541_v43 = vmul.f32 %v4419_v23, %v1509_v15  ;;  %v1911_v24 = vmul.f32 %v4555_v16, %v1719_v10 }
 0x345   : > { %1693 = vst.msk [vmem:[#allocation3 + $0x98] sm:$0xff] %vm293_vm2, %v1660_v58  ;;  %v1613_v3 = vpop.xlane.xlu0 %1612  ;;  %2390 = vperm.xlu1 %3004, %v2300_v39   ;;  %2395 = vperm.xlu0 %3003, %v2301_v7   ;;  %v1510_v54 = vld [vmem:[#allocation3 + $0xe8] sm:$0xff] }
 0x346   : > { %2196 = vst.msk [vmem:[#allocation4 + $0x48] sm:$0xff] %vm358_vm0, %v2164_v38  ;;  %v1663_v55 = vadd.f32 %v1613_v3, %v1535_v48  ;;  %v1610_v27 = vpop.xlane.xlu1 %1609  ;;  %v1720_v48 = vld [vmem:[#allocation4 + $0x70] sm:$0xff]  ;;  %v1542_v16 = vmul.f32 %v4423_v51, %v1510_v54  ;;  %v1544_v51 = vmul.f32 %v4433_v32, %v1512_v8  ;;  %v1723_v32 = vld [vmem:[#allocation4 + $0x88] sm:$0xff] }
 0x347   : > { %v2046_v52 = vpop.f32.mrb[20].mxu1  ;;  %v1662_v13 = vadd.f32 %v1610_v27, %v1534_v30  ;;  %v2304_v35 = vld [vmem:[#allocation3 + $0x90] sm:$0xff]  ;;  %v1543_v30 = vmul.f32 %v4429_v21, %v1511_v4 }
 0x348   : > { %1696 = vst.msk [vmem:[#allocation3 + $0xb0] sm:$0xff] %vm293_vm2, %v1663_v55  ;;  %v2165_v63 = vadd.f32 %v2046_v52, %v1908_v11  ;;  %v2048_v40 = vpop.f32.mrb[21].mxu1  ;;  %v2303_v20 = vld [vmem:[#allocation3 + $0x88] sm:$0xff]  ;;  %v1912_v55 = vmul.f32 %v4561_v47, %v1720_v48  ;;  %v1721_v52 = vld [vmem:[#allocation4 + $0x78] sm:$0xff] }
 0x349   : > { %1695 = vst.msk [vmem:[#allocation3 + $0xa8] sm:$0xff] %vm293_vm2, %v1662_v13  ;;  %v1619_v44 = vpop.xlane.xlu0 %1618  ;;  %2400 = vperm.xlu1 %3004, %v2302_v46   ;;  %2405 = vperm.xlu0 %3003, %v2303_v20   ;;  %v1913_v47 = vmul.f32 %v4559_v34, %v1721_v52  ;;  %v5028_v52 = vld [vmem:[#allocation9_spill] sm:$0xff] }
 0x34a   : > { %2197 = vst.msk [vmem:[#allocation4 + $0x50] sm:$0xff] %vm358_vm0, %v2165_v63  ;;  %v1665_v59 = vadd.f32 %v1619_v44, %v1537_v56  ;;  %v1616_v17 = vpop.xlane.xlu1 %1615  ;;  %v1722_v44 = vld [vmem:[#allocation4 + $0x80] sm:$0xff] }
 0x34b   : > { %v2051_v33 = vpop.f32.mrb[22].mxu1  ;;  %v1664_v12 = vadd.f32 %v1616_v17, %v1536_v41  ;;  %v2306_v62 = vld [vmem:[#allocation3 + $0xa0] sm:$0xff] }
 0x34c   : > { %1698 = vst.msk [vmem:[#allocation3 + $0xc0] sm:$0xff] %vm293_vm2, %v1665_v59  ;;  %v2166_v61 = vadd.f32 %v2051_v33, %v1909_v25  ;;  %v2053_v57 = vpop.f32.mrb[23].mxu1  ;;  %v2305_v53 = vld [vmem:[#allocation3 + $0x98] sm:$0xff]  ;;  %v1914_v33 = vmul.f32 %v5021_v29, %v1722_v44 }
 0x34d   : > { %1697 = vst.msk [vmem:[#allocation3 + $0xb8] sm:$0xff] %vm293_vm2, %v1664_v12  ;;  %v1625_v5 = vpop.xlane.xlu0 %1624  ;;  %2410 = vperm.xlu1 %3004, %v2304_v35   ;;  %2415 = vperm.xlu0 %3003, %v2305_v53   ;;  %v5022_v35 = vld [vmem:[#allocation60_spill] sm:$0xff] }
 0x34e   : > { %2198 = vst.msk [vmem:[#allocation4 + $0x58] sm:$0xff] %vm358_vm0, %v2166_v61  ;;  %v1667_v49 = vadd.f32 %v1625_v5, %v1539_v45  ;;  %v1622_v37 = vpop.xlane.xlu1 %1621  ;;  %v1915_v53 = vmul.f32 %v5022_v35, %v1723_v32  ;;  %v1724_v5 = vld [vmem:[#allocation4 + $0x90] sm:$0xff] }
 0x34f   : > { %v2056_v42 = vpop.f32.mrb[24].mxu1  ;;  %v1666_v14 = vadd.f32 %v1622_v37, %v1538_v31  ;;  %v2308_v50 = vld [vmem:[#allocation3 + $0xb0] sm:$0xff]  ;;  %v1916_v10 = vmul.f32 %v5023_v18, %v1724_v5 }
 0x350   : > { %1700 = vst.msk [vmem:[#allocation3 + $0xd0] sm:$0xff] %vm293_vm2, %v1667_v49  ;;  %v2167_v0 = vadd.f32 %v2056_v42, %v1910_v1  ;;  %v2058_v2 = vpop.f32.mrb[25].mxu1  ;;  %v2307_v28 = vld [vmem:[#allocation3 + $0xa8] sm:$0xff]  ;;  %v1725_v42 = vld [vmem:[#allocation4 + $0x98] sm:$0xff] }
 0x351   : > { %1699 = vst.msk [vmem:[#allocation3 + $0xc8] sm:$0xff] %vm293_vm2, %v1666_v14  ;;  %v1631_v26 = vpop.xlane.xlu0 %1630  ;;  %2420 = vperm.xlu1 %3004, %v2306_v62   ;;  %2425 = vperm.xlu0 %3003, %v2307_v28   ;;  %v1726_v28 = vld [vmem:[#allocation4 + $0xa0] sm:$0xff] }
 0x352   : > { %2199 = vst.msk [vmem:[#allocation4 + $0x60] sm:$0xff] %vm358_vm0, %v2167_v0  ;;  %v1669_v58 = vadd.f32 %v1631_v26, %v1541_v43  ;;  %v1628_v38 = vpop.xlane.xlu1 %1627  ;;  %v5024_v43 = vld [vmem:[#allocation5_spill] sm:$0xff] }
 0x353   : > { %v2061_v39 = vpop.f32.mrb[26].mxu1  ;;  %v1668_v23 = vadd.f32 %v1628_v38, %v1540_v6  ;;  %v2310_v56 = vld [vmem:[#allocation3 + $0xc0] sm:$0xff]  ;;  %v1917_v62 = vmul.f32 %v5024_v43, %v1725_v42  ;;  %v1727_v38 = vld [vmem:[#allocation4 + $0xa8] sm:$0xff] }
 0x354   : > { %1702 = vst.msk [vmem:[#allocation3 + $0xe0] sm:$0xff] %vm293_vm2, %v1669_v58  ;;  %v2168_v7 = vadd.f32 %v2061_v39, %v1911_v24  ;;  %v2063_v3 = vpop.f32.mrb[27].mxu1  ;;  %v2309_v11 = vld [vmem:[#allocation3 + $0xb8] sm:$0xff] }
 0x355   : > { %1701 = vst.msk [vmem:[#allocation3 + $0xd8] sm:$0xff] %vm293_vm2, %v1668_v23  ;;  %v1637_v36 = vpop.xlane.xlu0 %1636  ;;  %2430 = vperm.xlu1 %3004, %v2308_v50   ;;  %2435 = vperm.xlu0 %3003, %v2309_v11   ;;  %v5025_v24 = vld [vmem:[#allocation8_spill] sm:$0xff]  ;;  %v5026_v23 = vld [vmem:[#allocation7_spill] sm:$0xff] }
 0x356   : > { %2200 = vst.msk [vmem:[#allocation4 + $0x68] sm:$0xff] %vm358_vm0, %v2168_v7  ;;  %v1671_v27 = vadd.f32 %v1637_v36, %v1543_v30  ;;  %v1634_v22 = vpop.xlane.xlu1 %1633  ;;  %v1918_v58 = vmul.f32 %v5025_v24, %v1726_v28  ;;  %v1919_v7 = vmul.f32 %v5026_v23, %v1727_v38  ;;  %v1728_v3 = vld [vmem:[#allocation4 + $0xb0] sm:$0xff]  ;;  %v5027_v36 = vld [vmem:[#allocation10_spill] sm:$0xff]  ;;  %v5035_v38 = vld [vmem:[#allocation17_spill] sm:$0xff] }
 0x357   : > { %v2066_v13 = vpop.f32.mrb[28].mxu1  ;;  %v1670_v63 = vadd.f32 %v1634_v22, %v1542_v16  ;;  %v2312_v17 = vld [vmem:[#allocation3 + $0xd0] sm:$0xff]  ;;  %v1920_v16 = vmul.f32 %v5027_v36, %v1728_v3 }
 0x358   : > { %1704 = vst.msk [vmem:[#allocation3 + $0xf0] sm:$0xff] %vm293_vm2, %v1671_v27  ;;  %v2169_v21 = vadd.f32 %v2066_v13, %v1912_v55  ;;  %v2068_v40 = vpop.f32.mrb[29].mxu1  ;;  %v2311_v46 = vld [vmem:[#allocation3 + $0xc8] sm:$0xff]  ;;  %v1729_v55 = vld [vmem:[#allocation4 + $0xb8] sm:$0xff] }
 0x359   : > { %1703 = vst.msk [vmem:[#allocation3 + $0xe8] sm:$0xff] %vm293_vm2, %v1670_v63  ;;  %2440 = vperm.xlu1 %3004, %v2310_v56   ;;  %2445 = vperm.xlu0 %3003, %v2311_v46   ;;  %v1921_v13 = vmul.f32 %v5028_v52, %v1729_v55  ;;  %v1730_v63 = vld [vmem:[#allocation4 + $0xc0] sm:$0xff]  ;;  %v5029_v46 = vld [vmem:[#allocation12_spill] sm:$0xff] }
 0x35a   : > { %2201 = vst.msk [vmem:[#allocation4 + $0x70] sm:$0xff] %vm358_vm0, %v2169_v21  ;;  %v1640_v20 = vpop.xlane.xlu1 %1639 }
 0x35b   : > { %v2071_v41 = vpop.f32.mrb[30].mxu1  ;;  %v1672_v9 = vadd.f32 %v1640_v20, %v1544_v51  ;;  %v2314_v57 = vld [vmem:[#allocation3 + $0xe0] sm:$0xff]  ;;  %v1922_v51 = vmul.f32 %v5029_v46, %v1730_v63  ;;  %v2256_v46 = vld [vmem:[#allocation4 + $0x10] sm:$0xff] }
 0x35c   : > { %v2170_v25 = vadd.f32 %v2071_v41, %v1913_v47  ;;  %v2073_v59 = vpop.f32.mrb[31].mxu1  ;;  %v2313_v19 = vld [vmem:[#allocation3 + $0xd8] sm:$0xff]  ;;  %v1731_v47 = vld [vmem:[#allocation4 + $0xc8] sm:$0xff] }
 0x35d   : > { %1705 = vst.msk [vmem:[#allocation3 + $0xf8] sm:$0xff] %vm293_vm2, %v1672_v9  ;;  %2450 = vperm.xlu1 %3004, %v2312_v17   ;;  %2455 = vperm.xlu0 %3003, %v2313_v19   ;;  %v5030_v9 = vld [vmem:[#allocation11_spill] sm:$0xff] }
 0x35e   : > { %2202 = vst.msk [vmem:[#allocation4 + $0x78] sm:$0xff] %vm358_vm0, %v2170_v25  ;;  %v1923_v25 = vmul.f32 %v5030_v9, %v1731_v47  ;;  %v1732_v59 = vld [vmem:[#allocation4 + $0xd0] sm:$0xff] }
 0x35f   : > { %v2076_v34 = vpop.f32.mrb[32].mxu1  ;;  %v2316_v49 = vld [vmem:[#allocation3 + $0xf0] sm:$0xff] }
 0x360   : > { %v2171_v12 = vadd.f32 %v2076_v34, %v1914_v33  ;;  %v2078_v61 = vpop.f32.mrb[33].mxu1  ;;  %v2315_v45 = vld [vmem:[#allocation3 + $0xe8] sm:$0xff]  ;;  %v1733_v34 = vld [vmem:[#allocation4 + $0xd8] sm:$0xff] }
 0x361   : > { %2460 = vperm.xlu1 %3004, %v2314_v57   ;;  %2465 = vperm.xlu0 %3003, %v2315_v45   ;;  %v5031_v33 = vld [vmem:[#allocation14_spill] sm:$0xff]  ;;  %v5032_v45 = vld [vmem:[#allocation13_spill] sm:$0xff] }
 0x362   : > { %2203 = vst.msk [vmem:[#allocation4 + $0x80] sm:$0xff] %vm358_vm0, %v2171_v12  ;;  %v1924_v32 = vmul.f32 %v5031_v33, %v1732_v59  ;;  %v1925_v35 = vmul.f32 %v5032_v45, %v1733_v34  ;;  %v2258_v59 = vld [vmem:[#allocation4 + $0x20] sm:$0xff] }
 0x363   : > { %v2081_v31 = vpop.f32.mrb[34].mxu1 }
 0x364   : > { %v2172_v15 = vadd.f32 %v2081_v31, %v1915_v53  ;;  %v2083_v1 = vpop.f32.mrb[35].mxu1  ;;  %v2317_v37 = vld [vmem:[#allocation3 + $0xf8] sm:$0xff]  ;;  %v1734_v53 = vld [vmem:[#allocation4 + $0xe0] sm:$0xff] }
 0x365   : > { %2470 = vperm.xlu1 %3004, %v2316_v49   ;;  %2475 = vperm.xlu0 %3003, %v2317_v37   ;;  %v5033_v1 = vld [vmem:[#allocation16_spill] sm:$0xff]  ;;  %v1735_v37 = vld [vmem:[#allocation4 + $0xe8] sm:$0xff] }
 0x366   : > { %2204 = vst.msk [vmem:[#allocation4 + $0x88] sm:$0xff] %vm358_vm0, %v2172_v15  ;;  %v1926_v49 = vmul.f32 %v5033_v1, %v1734_v53  ;;  %v2262_v1 = vld [vmem:[#allocation4 + $0x40] sm:$0xff] }
 0x367   : > { %v2086_v14 = vpop.f32.mrb[36].mxu1 }
 0x368   : > { %v2173_v0 = vadd.f32 %v2086_v14, %v1916_v10  ;;  %v2088_v2 = vpop.f32.mrb[37].mxu1  ;;  %v5034_v14 = vld [vmem:[#allocation15_spill] sm:$0xff] }
 0x369   : > { %v1736_v2 = vld [vmem:[#allocation4 + $0xf0] sm:$0xff] }
 0x36a   : > { %2205 = vst.msk [vmem:[#allocation4 + $0x90] sm:$0xff] %vm358_vm0, %v2173_v0  ;;  %v1927_v0 = vmul.f32 %v5034_v14, %v1735_v37 }
 0x36b   : > { %v2091_v26 = vpop.f32.mrb[38].mxu1 }
 0x36c   : > { %v2174_v6 = vadd.f32 %v2091_v26, %v1917_v62  ;;  %v2093_v4 = vpop.f32.mrb[39].mxu1  ;;  %v1928_v26 = vmul.f32 %v4594_v60, %v1736_v2  ;;  %v2264_v2 = vld [vmem:[#allocation4 + $0x50] sm:$0xff] }
 0x36e   : > { %2206 = vst.msk [vmem:[#allocation4 + $0x98] sm:$0xff] %vm358_vm0, %v2174_v6  ;;  %v1737_v6 = vld [vmem:[#allocation4 + $0xf8] sm:$0xff] }
 0x36f   : > { %v2096_v54 = vpop.f32.mrb[40].mxu1 }
 0x370   : > { %v2175_v48 = vadd.f32 %v2096_v54, %v1918_v58  ;;  %v2098_v39 = vpop.f32.mrb[41].mxu1  ;;  %v1929_v54 = vmul.f32 %v5035_v38, %v1737_v6  ;;  %v2267_v6 = vld [vmem:[#allocation4 + $0x68] sm:$0xff] }
 0x372   : > { %2207 = vst.msk [vmem:[#allocation4 + $0xa0] sm:$0xff] %vm358_vm0, %v2175_v48 }
 0x373   : > { %v2101_v30 = vpop.f32.mrb[42].mxu1 }
 0x374   : > { %v2176_v50 = vadd.f32 %v2101_v30, %v1919_v7  ;;  %v2103_v11 = vpop.f32.mrb[43].mxu1 }
 0x375   : > { %v2255_v11 = vld [vmem:[#allocation4 + $0x8] sm:$0xff] }
 0x376   : > { %2208 = vst.msk [vmem:[#allocation4 + $0xa8] sm:$0xff] %vm358_vm0, %v2176_v50 }
 0x377   : > { %v2106_v27 = vpop.f32.mrb[44].mxu1 }
 0x378   : > { %v2177_v22 = vadd.f32 %v2106_v27, %v1920_v16  ;;  %v2108_v8 = vpop.f32.mrb[45].mxu1 }
 0x37a   : > { %2209 = vst.msk [vmem:[#allocation4 + $0xb0] sm:$0xff] %vm358_vm0, %v2177_v22  ;;  %v2254_v22 = vld [vmem:[#allocation4] sm:$0xff] }
 0x37b   : > { %v2111_v21 = vpop.f32.mrb[46].mxu1 }
 0x37c   : > { %v2178_v40 = vadd.f32 %v2111_v21, %v1921_v13  ;;  %v2113_v56 = vpop.f32.mrb[47].mxu1  ;;  %v2257_v21 = vld [vmem:[#allocation4 + $0x18] sm:$0xff] }
 0x37e   : > { %2210 = vst.msk [vmem:[#allocation4 + $0xb8] sm:$0xff] %vm358_vm0, %v2178_v40 }
 0x37f   : > { %v2116_v20 = vpop.f32.mrb[48].mxu1 }
 0x380   : > { %v2179_v44 = vadd.f32 %v2116_v20, %v1922_v51  ;;  %v2118_v41 = vpop.f32.mrb[49].mxu1 }
 0x381   : > { %v2259_v41 = vld [vmem:[#allocation4 + $0x28] sm:$0xff] }
 0x382   : > { %2211 = vst.msk [vmem:[#allocation4 + $0xc0] sm:$0xff] %vm358_vm0, %v2179_v44 }
 0x383   : > { %v2121_v17 = vpop.f32.mrb[50].mxu1 }
 0x384   : > { %v2180_v19 = vadd.f32 %v2121_v17, %v1923_v25  ;;  %v2123_v29 = vpop.f32.mrb[51].mxu1 }
 0x386   : > { %2212 = vst.msk [vmem:[#allocation4 + $0xc8] sm:$0xff] %vm358_vm0, %v2180_v19 }
 0x387   : > { %v2126_v12 = vpop.f32.mrb[52].mxu1 }
 0x388   : > { %v2181_v61 = vadd.f32 %v2126_v12, %v1924_v32  ;;  %v2128_v57 = vpop.f32.mrb[53].mxu1  ;;  %v2261_v32 = vld [vmem:[#allocation4 + $0x38] sm:$0xff] }
 0x38a   : > { %2213 = vst.msk [vmem:[#allocation4 + $0xd0] sm:$0xff] %vm358_vm0, %v2181_v61  ;;  %v2260_v61 = vld [vmem:[#allocation4 + $0x30] sm:$0xff] }
 0x38b   : > { %v2131_v5 = vpop.f32.mrb[54].mxu1 }
 0x38c   : > { %v2182_v31 = vadd.f32 %v2131_v5, %v1925_v35  ;;  %v2133_v15 = vpop.f32.mrb[55].mxu1  ;;  %v2263_v5 = vld [vmem:[#allocation4 + $0x48] sm:$0xff] }
 0x38e   : > { %2214 = vst.msk [vmem:[#allocation4 + $0xd8] sm:$0xff] %vm358_vm0, %v2182_v31 }
 0x38f   : > { %v2136_v18 = vpop.f32.mrb[56].mxu1 }
 0x390   : > { %v2183_v10 = vadd.f32 %v2136_v18, %v1926_v49  ;;  %v2138_v42 = vpop.f32.mrb[57].mxu1 }
 0x391   : > { %v2265_v42 = vld [vmem:[#allocation4 + $0x58] sm:$0xff] }
 0x392   : > { %2215 = vst.msk [vmem:[#allocation4 + $0xe0] sm:$0xff] %vm358_vm0, %v2183_v10 }
 0x393   : > { %v2141_v43 = vpop.f32.mrb[58].mxu1 }
 0x394   : > { %v2184_v62 = vadd.f32 %v2141_v43, %v1927_v0  ;;  %v2143_v28 = vpop.f32.mrb[59].mxu1 }
 0x396   : > { %2216 = vst.msk [vmem:[#allocation4 + $0xe8] sm:$0xff] %vm358_vm0, %v2184_v62 }
 0x397   : > { %v2146_v4 = vpop.f32.mrb[60].mxu1 }
 0x398   : > { %v2185_v24 = vadd.f32 %v2146_v4, %v1928_v26  ;;  %v2148_v58 = vpop.f32.mrb[61].mxu1 }
 0x399   : > { %v2266_v58 = vld [vmem:[#allocation4 + $0x60] sm:$0xff] }
 0x39a   : > { %2217 = vst.msk [vmem:[#allocation4 + $0xf0] sm:$0xff] %vm358_vm0, %v2185_v24 }
 0x39b   : > { %v2151_v48 = vpop.f32.mrb[62].mxu1 }
 0x39c   : > { %v2186_v39 = vadd.f32 %v2151_v48, %v1929_v54  ;;  %v2153_v23 = vpop.f32.mrb[63].mxu1 }
 0x39d   : > { %v2269_v23 = vld [vmem:[#allocation4 + $0x78] sm:$0xff] }
 0x39e   : > { %2218 = vst.msk [vmem:[#allocation4 + $0xf8] sm:$0xff] %vm358_vm0, %v2186_v39 }
 0x3a3   : > { %v2326_v7 = vpop.permute.xlu0 %2325 }
 0x3a4   : > { %3197 = vrcp.f32 %v2326_v7 }
 0x3a8   : > { %v2321_v3 = vpop.permute.xlu1 %2320 }
 0x3a9   : > { %3199 = vrcp.f32 %v2321_v3 }
 0x3ac   : > { %v2336_v60 = vpop.permute.xlu0 %2335  ;;  %v2331_v30 = vpop.permute.xlu1 %2330 }
 0x3ad   : > { %3201 = vrcp.f32 %v2336_v60  ;;  %v2268_v60 = vld [vmem:[#allocation4 + $0x70] sm:$0xff] }
 0x3ae   : > { %v3198_v50 = vpop.eup %3197  ;;  %3203 = vrcp.f32 %v2331_v30 }
 0x3af   : > { %v2481_v36 = vmul.f32 %v3198_v50, %v2255_v11 }
 0x3b0   : > { %v2346_v16 = vpop.permute.xlu0 %2345  ;;  %v2341_v55 = vpop.permute.xlu1 %2340 }
 0x3b1   : > { %2543 = vst.msk [vmem:[%s4727_s28 + $0x8] sm:$0xff] %vm358_vm0, %v2481_v36  ;;  %3205 = vrcp.f32 %v2346_v16  ;;  %v2271_v16 = vld [vmem:[#allocation4 + $0x88] sm:$0xff] }
 0x3b2   : > { %3207 = vrcp.f32 %v2341_v55 }
 0x3b3   : > { %v3200_v27 = vpop.eup %3199 }
 0x3b4   : > { %v2479_v8 = vmul.f32 %v3200_v27, %v2254_v22  ;;  %v2356_v52 = vpop.permute.xlu0 %2355  ;;  %v2351_v13 = vpop.permute.xlu1 %2350  ;;  %v2270_v22 = vld [vmem:[#allocation4 + $0x80] sm:$0xff] }
 0x3b5   : > { %3209 = vrcp.f32 %v2356_v52 }
 0x3b6   : > { %2542 = vst.msk [vmem:[%s4727_s28] sm:$0xff] %vm358_vm0, %v2479_v8  ;;  %3211 = vrcp.f32 %v2351_v13 }
 0x3b7   : > { %v3202_v63 = vpop.eup %3201 }
 0x3b8   : > { %v3204_v40 = vpop.eup %3203  ;;  %v2485_v56 = vmul.f32 %v3202_v63, %v2257_v21  ;;  %v2366_v51 = vpop.permute.xlu0 %2365  ;;  %v2273_v21 = vld [vmem:[#allocation4 + $0x98] sm:$0xff] }
 0x3b9   : > { %v2361_v47 = vpop.permute.xlu1 %2360  ;;  %v2483_v20 = vmul.f32 %v3204_v40, %v2256_v46  ;;  %3213 = vrcp.f32 %v2366_v51  ;;  %v2272_v46 = vld [vmem:[#allocation4 + $0x90] sm:$0xff] }
 0x3ba   : > { %2545 = vst.msk [vmem:[%s4727_s28 + $0x18] sm:$0xff] %vm358_vm0, %v2485_v56  ;;  %3215 = vrcp.f32 %v2361_v47 }
 0x3bb   : > { %v3206_v44 = vpop.eup %3205  ;;  %2544 = vst.msk [vmem:[%s4727_s28 + $0x10] sm:$0xff] %vm358_vm0, %v2483_v20 }
 0x3bc   : > { %v3208_v9 = vpop.eup %3207  ;;  %v2489_v25 = vmul.f32 %v3206_v44, %v2259_v41  ;;  %v2376_v17 = vpop.permute.xlu0 %2375  ;;  %v2275_v41 = vld [vmem:[#allocation4 + $0xa8] sm:$0xff] }
 0x3bd   : > { %v2371_v19 = vpop.permute.xlu1 %2370  ;;  %v2487_v29 = vmul.f32 %v3208_v9, %v2258_v59  ;;  %3217 = vrcp.f32 %v2376_v17  ;;  %v2274_v59 = vld [vmem:[#allocation4 + $0xa0] sm:$0xff] }
 0x3be   : > { %2547 = vst.msk [vmem:[%s4727_s28 + $0x28] sm:$0xff] %vm358_vm0, %v2489_v25  ;;  %3219 = vrcp.f32 %v2371_v19 }
 0x3bf   : > { %v3210_v33 = vpop.eup %3209  ;;  %2546 = vst.msk [vmem:[%s4727_s28 + $0x20] sm:$0xff] %vm358_vm0, %v2487_v29 }
 0x3c0   : > { %v3212_v34 = vpop.eup %3211  ;;  %v2493_v12 = vmul.f32 %v3210_v33, %v2261_v32  ;;  %v2386_v57 = vpop.permute.xlu0 %2385  ;;  %v2277_v32 = vld [vmem:[#allocation4 + $0xb8] sm:$0xff] }
 0x3c1   : > { %v2381_v45 = vpop.permute.xlu1 %2380  ;;  %v2491_v35 = vmul.f32 %v3212_v34, %v2260_v61  ;;  %3221 = vrcp.f32 %v2386_v57  ;;  %v2276_v61 = vld [vmem:[#allocation4 + $0xb0] sm:$0xff] }
 0x3c2   : > { %2549 = vst.msk [vmem:[%s4727_s28 + $0x38] sm:$0xff] %vm358_vm0, %v2493_v12  ;;  %3223 = vrcp.f32 %v2381_v45 }
 0x3c3   : > { %v3214_v53 = vpop.eup %3213  ;;  %2548 = vst.msk [vmem:[%s4727_s28 + $0x30] sm:$0xff] %vm358_vm0, %v2491_v35 }
 0x3c4   : > { %v3216_v31 = vpop.eup %3215  ;;  %v2497_v15 = vmul.f32 %v3214_v53, %v2263_v5  ;;  %v2396_v49 = vpop.permute.xlu0 %2395  ;;  %v2279_v5 = vld [vmem:[#allocation4 + $0xc8] sm:$0xff] }
 0x3c5   : > { %v2391_v37 = vpop.permute.xlu1 %2390  ;;  %v2495_v18 = vmul.f32 %v3216_v31, %v2262_v1  ;;  %3225 = vrcp.f32 %v2396_v49  ;;  %v2278_v1 = vld [vmem:[#allocation4 + $0xc0] sm:$0xff] }
 0x3c6   : > { %2551 = vst.msk [vmem:[%s4727_s28 + $0x48] sm:$0xff] %vm358_vm0, %v2497_v15  ;;  %3227 = vrcp.f32 %v2391_v37 }
 0x3c7   : > { %v3218_v10 = vpop.eup %3217  ;;  %2550 = vst.msk [vmem:[%s4727_s28 + $0x40] sm:$0xff] %vm358_vm0, %v2495_v18 }
 0x3c8   : > { %v3220_v14 = vpop.eup %3219  ;;  %v2501_v0 = vmul.f32 %v3218_v10, %v2265_v42  ;;  %v2406_v43 = vpop.permute.xlu0 %2405  ;;  %v2281_v42 = vld [vmem:[#allocation4 + $0xd8] sm:$0xff] }
 0x3c9   : > { %v2401_v62 = vpop.permute.xlu1 %2400  ;;  %v2499_v28 = vmul.f32 %v3220_v14, %v2264_v2  ;;  %3229 = vrcp.f32 %v2406_v43  ;;  %v2280_v2 = vld [vmem:[#allocation4 + $0xd0] sm:$0xff] }
 0x3ca   : > { %2553 = vst.msk [vmem:[%s4727_s28 + $0x58] sm:$0xff] %vm358_vm0, %v2501_v0  ;;  %3231 = vrcp.f32 %v2401_v62 }
 0x3cb   : > { %v3222_v26 = vpop.eup %3221  ;;  %2552 = vst.msk [vmem:[%s4727_s28 + $0x50] sm:$0xff] %vm358_vm0, %v2499_v28  ;;  %v2283_v28 = vld [vmem:[#allocation4 + $0xe8] sm:$0xff] }
 0x3cc   : > { %v3224_v4 = vpop.eup %3223  ;;  %v2505_v24 = vmul.f32 %v3222_v26, %v2267_v6  ;;  %v2416_v38 = vpop.permute.xlu0 %2415 }
 0x3cd   : > { %v2411_v54 = vpop.permute.xlu1 %2410  ;;  %v2503_v48 = vmul.f32 %v3224_v4, %v2266_v58  ;;  %3233 = vrcp.f32 %v2416_v38  ;;  %v2282_v4 = vld [vmem:[#allocation4 + $0xe0] sm:$0xff]  ;;  %v2285_v38 = vld [vmem:[#allocation4 + $0xf8] sm:$0xff] }
 0x3ce   : > { %2555 = vst.msk [vmem:[%s4727_s28 + $0x68] sm:$0xff] %vm358_vm0, %v2505_v24  ;;  %3235 = vrcp.f32 %v2411_v54 }
 0x3cf   : > { %v3226_v39 = vpop.eup %3225  ;;  %2554 = vst.msk [vmem:[%s4727_s28 + $0x60] sm:$0xff] %vm358_vm0, %v2503_v48 }
 0x3d0   : > { %v3228_v7 = vpop.eup %3227  ;;  %v2509_v3 = vmul.f32 %v3226_v39, %v2269_v23  ;;  %v2426_v30 = vpop.permute.xlu0 %2425  ;;  %v2284_v39 = vld [vmem:[#allocation4 + $0xf0] sm:$0xff] }
 0x3d1   : > { %v2421_v50 = vpop.permute.xlu1 %2420  ;;  %v2507_v11 = vmul.f32 %v3228_v7, %v2268_v60  ;;  %3237 = vrcp.f32 %v2426_v30 }
 0x3d2   : > { %2557 = vst.msk [vmem:[%s4727_s28 + $0x78] sm:$0xff] %vm358_vm0, %v2509_v3  ;;  %3239 = vrcp.f32 %v2421_v50 }
 0x3d3   : > { %v3230_v36 = vpop.eup %3229  ;;  %2556 = vst.msk [vmem:[%s4727_s28 + $0x70] sm:$0xff] %vm358_vm0, %v2507_v11 }
 0x3d4   : > { %v3232_v55 = vpop.eup %3231  ;;  %v2513_v27 = vmul.f32 %v3230_v36, %v2271_v16  ;;  %v2436_v8 = vpop.permute.xlu0 %2435 }
 0x3d5   : > { %v2431_v52 = vpop.permute.xlu1 %2430  ;;  %v2511_v13 = vmul.f32 %v3232_v55, %v2270_v22  ;;  %3241 = vrcp.f32 %v2436_v8 }
 0x3d6   : > { %2559 = vst.msk [vmem:[%s4727_s28 + $0x88] sm:$0xff] %vm358_vm0, %v2513_v27  ;;  %3243 = vrcp.f32 %v2431_v52 }
 0x3d7   : > { %v3234_v63 = vpop.eup %3233  ;;  %2558 = vst.msk [vmem:[%s4727_s28 + $0x80] sm:$0xff] %vm358_vm0, %v2511_v13 }
 0x3d8   : > { %v3236_v40 = vpop.eup %3235  ;;  %v2517_v56 = vmul.f32 %v3234_v63, %v2273_v21  ;;  %v2446_v51 = vpop.permute.xlu0 %2445 }
 0x3d9   : > { %v2441_v47 = vpop.permute.xlu1 %2440  ;;  %v2515_v20 = vmul.f32 %v3236_v40, %v2272_v46  ;;  %3245 = vrcp.f32 %v2446_v51 }
 0x3da   : > { %2561 = vst.msk [vmem:[%s4727_s28 + $0x98] sm:$0xff] %vm358_vm0, %v2517_v56  ;;  %3247 = vrcp.f32 %v2441_v47 }
 0x3db   : > { %v3238_v44 = vpop.eup %3237  ;;  %2560 = vst.msk [vmem:[%s4727_s28 + $0x90] sm:$0xff] %vm358_vm0, %v2515_v20 }
 0x3dc   : > { %v3240_v9 = vpop.eup %3239  ;;  %v2521_v25 = vmul.f32 %v3238_v44, %v2275_v41  ;;  %v2456_v17 = vpop.permute.xlu0 %2455 }
 0x3dd   : > { %v2451_v19 = vpop.permute.xlu1 %2450  ;;  %v2519_v29 = vmul.f32 %v3240_v9, %v2274_v59  ;;  %3249 = vrcp.f32 %v2456_v17 }
 0x3de   : > { %2563 = vst.msk [vmem:[%s4727_s28 + $0xa8] sm:$0xff] %vm358_vm0, %v2521_v25  ;;  %3251 = vrcp.f32 %v2451_v19 }
 0x3df   : > { %v3242_v33 = vpop.eup %3241  ;;  %2562 = vst.msk [vmem:[%s4727_s28 + $0xa0] sm:$0xff] %vm358_vm0, %v2519_v29 }
 0x3e0   : > { %v3244_v34 = vpop.eup %3243  ;;  %v2525_v12 = vmul.f32 %v3242_v33, %v2277_v32  ;;  %v2466_v57 = vpop.permute.xlu0 %2465 }
 0x3e1   : > { %v2461_v45 = vpop.permute.xlu1 %2460  ;;  %v2523_v35 = vmul.f32 %v3244_v34, %v2276_v61  ;;  %3253 = vrcp.f32 %v2466_v57 }
 0x3e2   : > { %2565 = vst.msk [vmem:[%s4727_s28 + $0xb8] sm:$0xff] %vm358_vm0, %v2525_v12  ;;  %3255 = vrcp.f32 %v2461_v45 }
 0x3e3   : > { %v3246_v53 = vpop.eup %3245  ;;  %2564 = vst.msk [vmem:[%s4727_s28 + $0xb0] sm:$0xff] %vm358_vm0, %v2523_v35 }
 0x3e4   : > { %v3248_v31 = vpop.eup %3247  ;;  %v2529_v15 = vmul.f32 %v3246_v53, %v2279_v5  ;;  %v2476_v49 = vpop.permute.xlu0 %2475 }
 0x3e5   : > { %v2471_v37 = vpop.permute.xlu1 %2470  ;;  %v2527_v18 = vmul.f32 %v3248_v31, %v2278_v1  ;;  %3257 = vrcp.f32 %v2476_v49 }
 0x3e6   : > { %2567 = vst.msk [vmem:[%s4727_s28 + $0xc8] sm:$0xff] %vm358_vm0, %v2529_v15  ;;  %3259 = vrcp.f32 %v2471_v37 }
 0x3e7   : > { %v3250_v10 = vpop.eup %3249  ;;  %2566 = vst.msk [vmem:[%s4727_s28 + $0xc0] sm:$0xff] %vm358_vm0, %v2527_v18 }
 0x3e8   : > { %v3252_v14 = vpop.eup %3251  ;;  %v2533_v0 = vmul.f32 %v3250_v10, %v2281_v42 }
 0x3e9   : > { %v2531_v43 = vmul.f32 %v3252_v14, %v2280_v2 }
 0x3ea   : > { %2569 = vst.msk [vmem:[%s4727_s28 + $0xd8] sm:$0xff] %vm358_vm0, %v2533_v0 }
 0x3eb   : > { %v3254_v62 = vpop.eup %3253  ;;  %2568 = vst.msk [vmem:[%s4727_s28 + $0xd0] sm:$0xff] %vm358_vm0, %v2531_v43 }
 0x3ec   : > { %v3256_v26 = vpop.eup %3255  ;;  %v2537_v6 = vmul.f32 %v3254_v62, %v2283_v28 }
 0x3ed   : > { %v2535_v24 = vmul.f32 %v3256_v26, %v2282_v4 }
 0x3ee   : > { %2571 = vst.msk [vmem:[%s4727_s28 + $0xe8] sm:$0xff] %vm358_vm0, %v2537_v6 }
 0x3ef   : > { %v3258_v58 = vpop.eup %3257  ;;  %2570 = vst.msk [vmem:[%s4727_s28 + $0xe0] sm:$0xff] %vm358_vm0, %v2535_v24 }
 0x3f0   : > { %v3260_v54 = vpop.eup %3259  ;;  %v2541_v48 = vmul.f32 %v3258_v58, %v2285_v38 }
 0x3f1   : > { %v2539_v23 = vmul.f32 %v3260_v54, %v2284_v39 }
 0x3f2   : > { %2573 = vst.msk [vmem:[%s4727_s28 + $0xf8] sm:$0xff] %vm358_vm0, %v2541_v48 }
 0x3f3   : > { %2572 = vst.msk [vmem:[%s4727_s28 + $0xf0] sm:$0xff] %vm358_vm0, %v2539_v23 }
 0x3f4 PF: > { %s13_s14 = sadd.s32 1, %s3283_s14   ;;  %s5036_s12 = smov %s3279_s13 }
 0x3f5   : > { %p10_p5 = scmp.ge.s32.totalorder %s13_s14, 6   ;;  %s5037_s13 = smov %s5039_s15 }
 0x3f7   :  { %12 = sbr.rel (!%p10_p5) target bundleno = 2 (0x2), region = 76 }

</bundles_post_ra>
